<compile_context>
chip_gen: v5e
topology: v5e:2x2
jax: 0.10.0
libtpu: 0.0.40
codegen_flags: <defaults>
</compile_context>

<pallas_src>
import numpy as np
import jax
import jax.numpy as jnp
from jax.experimental import pallas as pl
from jax.experimental.pallas import tpu as pltpu

# ------------------------- model hyper-params (from the module) ---------------
EMBED_DIM = 300
KERNEL_NUMS = (100, 100, 100)
KERNEL_SIZES = (3, 4, 5)
HIDDEN_DIM = 100
NUM_CLASSES = 1
KMAX = max(KERNEL_SIZES)
C_TOTAL = sum(KERNEL_NUMS)

GROUP = 128                              # lane-aligned channels per conv bank
CT_PAD = GROUP * len(KERNEL_SIZES)       # 384 = 3 x 128
H_PAD = 128                              # hidden dim padded to one lane vreg


# --------------------------- row-shift helpers --------------------------------
def _shift_rows_roll(y, k):
    """acc[r] (+)= y[r + k]: roll rows up by k on the XLU.

    Wrapped rows (the last k) land only on timesteps that the -1e30 validity
    mask kills for every column group live at tap k (kernel size >= k + 1).
    """
    return pltpu.roll(y, shift=y.shape[0] - k, axis=0)


def _shift_rows_concat(y, k):
    """Fallback row shift (zeros + concat). Correct, but more VALU/vst work."""
    return jnp.concatenate(
        [y[k:, :], jnp.zeros((k, y.shape[1]), y.dtype)], axis=0)


# ------------------------------- Pallas kernel --------------------------------
def make_textcnn_kernel(shift_rows):
    def textcnn_kernel(e_ref, w012_ref, wt3_ref, wt4_ref, bconv_ref, mask_ref,
                       fcw_ref, fcb_ref, ow_ref, ob_ref, out_ref):
        TB, L, E = e_ref.shape
        M = TB * L
        G = GROUP

        # (TB, L, E) bf16 -> (TB*L, E): one shared, unsliced LHS for all taps
        # (pure reinterpretation: L is a multiple of 16).
        e2d = e_ref[...].reshape(M, E)

        # Taps 0..2 are live for every bank -> full N=384 matmuls.
        acc = jnp.dot(e2d, w012_ref[0], preferred_element_type=jnp.float32)
        acc += shift_rows(
            jnp.dot(e2d, w012_ref[1], preferred_element_type=jnp.float32), 1)
        acc += shift_rows(
            jnp.dot(e2d, w012_ref[2], preferred_element_type=jnp.float32), 2)
        # Tap 3 is live only for banks K>=4 (acc columns [128:384)) -> N=256.
        y3 = shift_rows(
            jnp.dot(e2d, wt3_ref[...], preferred_element_type=jnp.float32), 3)
        # Tap 4 is live only for bank K=5 (acc columns [256:384)) -> N=128.
        y4 = shift_rows(
            jnp.dot(e2d, wt4_ref[...], preferred_element_type=jnp.float32), 4)
        # Stitch the narrow taps into their 128-aligned column groups.
        acc = jnp.concatenate(
            [acc[:, :G],
             acc[:, G:2 * G] + y3[:, :G],
             acc[:, 2 * G:] + y3[:, G:] + y4], axis=1)        # (M, 384)

        # Per-bank time-validity mask (incl. L padding), then max over time.
        acc = acc.reshape(TB, L, CT_PAD) + mask_ref[...][None, :, :]
        pooled = jnp.max(acc, axis=1) + bconv_ref[...]        # bias after max (==)

        # fc -> ReLU (dropout = identity at inference); bf16 MXU, f32 accum.
        h = jnp.dot(pooled.astype(jnp.bfloat16), fcw_ref[...],
                    preferred_element_type=jnp.float32)
        h = jnp.maximum(h + fcb_ref[...], 0.0)                # (TB, 128) f32

        # Output head (128 -> 1): VPU multiply + lane reduce, no N=1 matmul.
        logits = jnp.sum(h * ow_ref[...], axis=-1)            # (TB,)
        logits = logits[None, :] + ob_ref[...]                # (1, TB)
        out_ref[...] = logits[None, :, :].astype(out_ref.dtype)   # (1, 1, TB)

    return textcnn_kernel


# ----------------------- one-time weight packing (hoisted) ---------------------
def pack_params(params):
    """Pack weights into 128-lane-aligned, bf16 MXU-friendly layouts (once).

    Channel layout (CT_PAD = 384): bank K=3 -> cols [0:128), K=4 -> [128:256),
    K=5 -> [256:384); each bank's 100 live channels sit at the start of its
    group, the rest are zero (zero conv weights / bias / fc rows).
    """
    assert KERNEL_SIZES == (3, 4, 5) and KERNEL_NUMS == (100, 100, 100)
    f32, bf16 = jnp.float32, jnp.bfloat16
    w3, w4, w5 = params['w3'], params['w4'], params['w5']     # (K, E, 100)
    C = KERNEL_NUMS[0]

    w012 = jnp.zeros((3, EMBED_DIM, CT_PAD), f32)             # taps 0..2, all banks
    w012 = w012.at[:, :, 0:C].set(w3[:3])
    w012 = w012.at[:, :, GROUP:GROUP + C].set(w4[:3])
    w012 = w012.at[:, :, 2 * GROUP:2 * GROUP + C].set(w5[:3])

    wt3 = jnp.zeros((EMBED_DIM, 2 * GROUP), f32)              # tap 3, banks K>=4
    wt3 = wt3.at[:, 0:C].set(w4[3])
    wt3 = wt3.at[:, GROUP:GROUP + C].set(w5[3])

    wt4 = jnp.zeros((EMBED_DIM, GROUP), f32)                  # tap 4, bank K=5
    wt4 = wt4.at[:, 0:C].set(w5[4])

    bconv = jnp.zeros((1, CT_PAD), f32)
    bconv = bconv.at[:, 0:C].set(params['b3'])
    bconv = bconv.at[:, GROUP:GROUP + C].set(params['b4'])
    bconv = bconv.at[:, 2 * GROUP:2 * GROUP + C].set(params['b5'])

    fcw = jnp.zeros((CT_PAD, H_PAD), f32)
    fcw = fcw.at[0:C, 0:HIDDEN_DIM].set(params['fcw'][0:C])
    fcw = fcw.at[GROUP:GROUP + C, 0:HIDDEN_DIM].set(params['fcw'][C:2 * C])
    fcw = fcw.at[2 * GROUP:2 * GROUP + C, 0:HIDDEN_DIM].set(params['fcw'][2 * C:])
    fcb = jnp.zeros((1, H_PAD), f32).at[:, 0:HIDDEN_DIM].set(params['fcb'])
    ow = jnp.zeros((1, H_PAD), f32).at[:, 0:HIDDEN_DIM].set(params['ow'].T)

    return {
        'embed': params['embed'].astype(bf16),   # pre-cast once, not per call
        'w012': w012.astype(bf16), 'wt3': wt3.astype(bf16),
        'wt4': wt4.astype(bf16), 'bconv': bconv,
        'fcw': fcw.astype(bf16), 'fcb': fcb,
        'ow': ow, 'ob': params['ob'].astype(f32),
    }


# --------------------- generation-aware VMEM budget / tiling -------------------
def _vmem_budget():
    """Scoped-VMEM budget (bytes) and 'is v7x' flag."""
    kind = ""
    try:
        kind = jax.devices()[0].device_kind.lower()
    except Exception:
        pass
    is_v7 = "v7" in kind
    cap = None
    try:
        cap = int(pltpu.get_tpu_info().vmem_capacity_bytes)
    except Exception:
        cap = None
    if cap is None:
        cap = (64 if is_v7 else 128) << 20
    # Leave headroom: ~48 MiB on 64-MiB v7x parts, ~100 MiB on v5e/v6e.
    budget = min(int(0.75 * cap), (48 << 20) if is_v7 else (100 << 20))
    return budget, is_v7


# --------------------------------- wrapper -------------------------------------
def textcnn_forward(word_seq, packed, *, block_b=128):
    """Batched TextCNN forward. Returns (B,) pre-sigmoid logits."""
    # Embedding lookup stays in XLA; the table is already bf16 (packed once).
    # TODO(synk): fuse the gather into the kernel (scalar-prefetched ids +
    # per-row DMA) to remove the HBM round-trip of the (B, L, E) activations.
    e = jnp.take(packed['embed'], word_seq, axis=0)           # (B, L, E) bf16
    B, L, E = e.shape
    assert L >= KMAX, f"sequence length {L} must be >= {KMAX}"

    # Pad L to a multiple of 16 (bf16 sublane pack) so the in-kernel reshape
    # and the row rolls are pure reinterpretations.
    L_pad = max(16, -(-L // 16) * 16)
    if L_pad != L:
        e = jnp.pad(e, ((0, 0), (0, L_pad - L), (0, 0)))

    # Per-bank time-validity mask (host-built constant): timestep t is valid
    # for bank K iff t <= L - K (relative to the ORIGINAL L); every L-padding
    # timestep is invalid for every bank.
    mask_np = np.zeros((L_pad, CT_PAD), np.float32)
    t = np.arange(L_pad)
    for g, Ksz in enumerate(KERNEL_SIZES):
        mask_np[t > (L - Ksz), g * GROUP:(g + 1) * GROUP] = -1e30
    mask = jnp.asarray(mask_np)

    # ---- generation-aware batch tiling --------------------------------------
    budget, is_v7 = _vmem_budget()
    # Per-sequence VMEM: double-buffered bf16 e block + ~4 f32 (L, 384) conv
    # temporaries (acc / rolled taps / stitched acc).
    per_seq = L_pad * (2 * E * 2 + 4 * CT_PAD * 4)
    tb_cap = int(max(1, min(block_b, (budget - (8 << 20)) // per_seq)))
    # v7x has two TensorCores: keep >= 2 grid steps so the "parallel" batch
    # axis can shard across them.  v5e/v6e are single-TC: no forced split.
    nb_min = 2 if (is_v7 and B >= 2) else 1
    nb = max(nb_min, -(-B // tb_cap))
    TB = -(-B // nb)
    Bpad = nb * TB
    if Bpad != B:
        e = jnp.pad(e, ((0, Bpad - B), (0, 0), (0, 0)))

    consts = (packed['w012'], packed['wt3'], packed['wt4'], packed['bconv'],
              mask, packed['fcw'], packed['fcb'], packed['ow'], packed['ob'])

    def bcast_spec(a):
        return pl.BlockSpec(a.shape, lambda b, _n=a.ndim: (0,) * _n)

    def run(shift_rows):
        return pl.pallas_call(
            make_textcnn_kernel(shift_rows),
            out_shape=jax.ShapeDtypeStruct((nb, 1, TB), jnp.float32),
            grid=(nb,),
            in_specs=[pl.BlockSpec((TB, L_pad, E), lambda b: (b, 0, 0))]
                     + [bcast_spec(a) for a in consts],
            out_specs=pl.BlockSpec((1, 1, TB), lambda b: (b, 0, 0)),
            compiler_params=pltpu.CompilerParams(
                dimension_semantics=("parallel",),
                vmem_limit_bytes=int(budget)),
        )(e, *consts)

    try:
        out = run(_shift_rows_roll)      # preferred: XLU row rotate
    except Exception:                    # lowering safety net only
        out = run(_shift_rows_concat)
    return out.reshape(Bpad)[:B]


# ------------------------- deterministic parameter init ------------------------
def init_params(key, vocab_size, padding_idx=0):
    ks = jax.random.split(key, 10)

    def nrm(k, shape, scale=0.05):
        return (scale * jax.random.normal(k, shape)).astype(jnp.float32)

    embed = nrm(ks[0], (vocab_size, EMBED_DIM), 0.1)
    embed = embed.at[padding_idx].set(0.0)          # nn.Embedding padding_idx row
    params = {'embed': embed}
    for i, (K, C) in enumerate(zip(KERNEL_SIZES, KERNEL_NUMS)):
        params[f'w{K}'] = nrm(ks[1 + 2 * i], (K, EMBED_DIM, C))   # (K, E, C)
        params[f'b{K}'] = nrm(ks[2 + 2 * i], (1, C))
    params['fcw'] = nrm(ks[7], (C_TOTAL, HIDDEN_DIM))             # stored (in, out)
    params['fcb'] = nrm(ks[8], (1, HIDDEN_DIM))
    params['ow'] = nrm(ks[9], (HIDDEN_DIM, NUM_CLASSES))
    params['ob'] = jnp.zeros((1, NUM_CLASSES), jnp.float32)
    return params


# ----------------------- pure-JAX f32 reference (for checking) -----------------
def reference_forward(word_seq, params):
    e = jnp.take(params['embed'], word_seq, axis=0)    # (B, L, E)
    x = jnp.transpose(e, (0, 2, 1))                    # (B, E, L) == PyTorch NCL
    ps = []
    for K in KERNEL_SIZES:
        w = jnp.transpose(params[f'w{K}'], (2, 1, 0))  # (C, E, K) == PyTorch OIK
        c = jax.lax.conv_general_dilated(
            x, w, window_strides=(1,), padding='VALID',
            dimension_numbers=('NCH', 'OIH', 'NCH'))
        c = c + params[f'b{K}'][0][None, :, None]
        ps.append(jnp.max(c, axis=-1))                 # max-pool over time
    p = jnp.concatenate(ps, axis=1)
    f = jnp.maximum(p @ params['fcw'] + params['fcb'][0], 0.0)
    return (f @ params['ow'] + params['ob'][0])[:, 0]


# ----------------------------------- main ---------------------------------------
if __name__ == "__main__":
    B, L, VOCAB = 2, 16, 50                            # small shapes, fix_length-like L
    key = jax.random.PRNGKey(0)
    kp, kd = jax.random.split(key)
    params = init_params(kp, vocab_size=VOCAB, padding_idx=0)
    packed = pack_params(params)                       # one-time weight packing
    word_seq = jax.random.randint(kd, (B, L), 0, VOCAB, dtype=jnp.int32)

    logits = jax.block_until_ready(textcnn_forward(word_seq, packed))
    ref = jax.block_until_ready(reference_forward(word_seq, params))

    assert logits.shape == (B,)
    # Kernel uses bf16 activations / conv+fc weights (f32 accumulation), so
    # compare against the f32 reference at bf16-level tolerance.
    assert jnp.allclose(logits, ref, rtol=2e-2, atol=2e-2), (logits, ref)
    print("KERNEL_OK")
</pallas_src>

<mosaic_0001>
module attributes {stable_mosaic.version = 11 : i64} {
  func.func @textcnn_kernel(%arg0: i32, %arg1: memref<2x16x300xbf16, #tpu.memory_space<vmem>>, %arg2: memref<3x300x384xbf16, #tpu.memory_space<vmem>>, %arg3: memref<300x256xbf16, #tpu.memory_space<vmem>>, %arg4: memref<300x128xbf16, #tpu.memory_space<vmem>>, %arg5: memref<1x384xf32, #tpu.memory_space<vmem>>, %arg6: memref<16x384xf32, #tpu.memory_space<vmem>>, %arg7: memref<384x128xbf16, #tpu.memory_space<vmem>>, %arg8: memref<1x128xf32, #tpu.memory_space<vmem>>, %arg9: memref<1x128xf32, #tpu.memory_space<vmem>>, %arg10: memref<1x1xf32, #tpu.memory_space<vmem>>, %arg11: memref<1x1x2xf32, #tpu.memory_space<vmem>>) attributes {dimension_semantics = [#tpu.dimension_semantics<parallel>], iteration_bounds = array<i64: 1>, scalar_prefetch = 0 : i64, scratch_operands = 0 : i64, tpu.core_type = #tpu.core_type<tc>, window_params = [{transform_indices = @transform_0, window_bounds = array<i64: 2, 16, 300>}, {pipeline_mode = #tpu.pipeline_mode<synchronous>, transform_indices = @transform_1, window_bounds = array<i64: 3, 300, 384>}, {pipeline_mode = #tpu.pipeline_mode<synchronous>, transform_indices = @transform_2, window_bounds = array<i64: 300, 256>}, {pipeline_mode = #tpu.pipeline_mode<synchronous>, transform_indices = @transform_3, window_bounds = array<i64: 300, 128>}, {pipeline_mode = #tpu.pipeline_mode<synchronous>, transform_indices = @transform_4, window_bounds = array<i64: 1, 384>}, {pipeline_mode = #tpu.pipeline_mode<synchronous>, transform_indices = @transform_5, window_bounds = array<i64: 16, 384>}, {pipeline_mode = #tpu.pipeline_mode<synchronous>, transform_indices = @transform_6, window_bounds = array<i64: 384, 128>}, {pipeline_mode = #tpu.pipeline_mode<synchronous>, transform_indices = @transform_7, window_bounds = array<i64: 1, 128>}, {pipeline_mode = #tpu.pipeline_mode<synchronous>, transform_indices = @transform_8, window_bounds = array<i64: 1, 128>}, {pipeline_mode = #tpu.pipeline_mode<synchronous>, transform_indices = @transform_9, window_bounds = array<i64: 1, 1>}, {transform_indices = @transform_10, window_bounds = array<i64: 1, 1, 2>}]} {
    %c0 = arith.constant 0 : index
    %c0_0 = arith.constant 0 : index
    %c0_1 = arith.constant 0 : index
    %0 = vector.load %arg1[%c0, %c0_0, %c0_1] : memref<2x16x300xbf16, #tpu.memory_space<vmem>>, vector<2x16x300xbf16>
    %1 = vector.shape_cast %0 : vector<2x16x300xbf16> to vector<32x300xbf16>
    %c0_2 = arith.constant 0 : index
    %c0_3 = arith.constant 0 : index
    %c0_4 = arith.constant 0 : index
    %2 = vector.load %arg2[%c0_2, %c0_3, %c0_4] : memref<3x300x384xbf16, #tpu.memory_space<vmem>>, vector<1x300x384xbf16>
    %3 = vector.shape_cast %2 : vector<1x300x384xbf16> to vector<300x384xbf16>
    %cst = arith.constant dense<0.000000e+00> : vector<32x384xf32>
    %4 = tpu.matmul %1, %3, %cst {dimension_numbers = #tpu.dot_dimension_numbers<[1], [0], [0], [1], [0, 0, 1, 1], [], []>} : vector<32x300xbf16>, vector<300x384xbf16>, vector<32x384xf32> -> vector<32x384xf32>
    %c1 = arith.constant 1 : index
    %c0_5 = arith.constant 0 : index
    %c0_6 = arith.constant 0 : index
    %5 = vector.load %arg2[%c1, %c0_5, %c0_6] : memref<3x300x384xbf16, #tpu.memory_space<vmem>>, vector<1x300x384xbf16>
    %6 = vector.shape_cast %5 : vector<1x300x384xbf16> to vector<300x384xbf16>
    %cst_7 = arith.constant dense<0.000000e+00> : vector<32x384xf32>
    %7 = tpu.matmul %1, %6, %cst_7 {dimension_numbers = #tpu.dot_dimension_numbers<[1], [0], [0], [1], [0, 0, 1, 1], [], []>} : vector<32x300xbf16>, vector<300x384xbf16>, vector<32x384xf32> -> vector<32x384xf32>
    %c31_i32 = arith.constant 31 : i32
    %8 = tpu.dynamic_rotate %7 by %c31_i32 dim 0 : vector<32x384xf32>, i32 -> vector<32x384xf32>
    %9 = arith.addf %4, %8 : vector<32x384xf32>
    %c2 = arith.constant 2 : index
    %c0_8 = arith.constant 0 : index
    %c0_9 = arith.constant 0 : index
    %10 = vector.load %arg2[%c2, %c0_8, %c0_9] : memref<3x300x384xbf16, #tpu.memory_space<vmem>>, vector<1x300x384xbf16>
    %11 = vector.shape_cast %10 : vector<1x300x384xbf16> to vector<300x384xbf16>
    %cst_10 = arith.constant dense<0.000000e+00> : vector<32x384xf32>
    %12 = tpu.matmul %1, %11, %cst_10 {dimension_numbers = #tpu.dot_dimension_numbers<[1], [0], [0], [1], [0, 0, 1, 1], [], []>} : vector<32x300xbf16>, vector<300x384xbf16>, vector<32x384xf32> -> vector<32x384xf32>
    %c30_i32 = arith.constant 30 : i32
    %13 = tpu.dynamic_rotate %12 by %c30_i32 dim 0 : vector<32x384xf32>, i32 -> vector<32x384xf32>
    %14 = arith.addf %9, %13 : vector<32x384xf32>
    %c0_11 = arith.constant 0 : index
    %c0_12 = arith.constant 0 : index
    %15 = vector.load %arg3[%c0_11, %c0_12] : memref<300x256xbf16, #tpu.memory_space<vmem>>, vector<300x256xbf16>
    %cst_13 = arith.constant dense<0.000000e+00> : vector<32x256xf32>
    %16 = tpu.matmul %1, %15, %cst_13 {dimension_numbers = #tpu.dot_dimension_numbers<[1], [0], [0], [1], [0, 0, 1, 1], [], []>} : vector<32x300xbf16>, vector<300x256xbf16>, vector<32x256xf32> -> vector<32x256xf32>
    %c29_i32 = arith.constant 29 : i32
    %17 = tpu.dynamic_rotate %16 by %c29_i32 dim 0 : vector<32x256xf32>, i32 -> vector<32x256xf32>
    %c0_14 = arith.constant 0 : index
    %c0_15 = arith.constant 0 : index
    %18 = vector.load %arg4[%c0_14, %c0_15] : memref<300x128xbf16, #tpu.memory_space<vmem>>, vector<300x128xbf16>
    %cst_16 = arith.constant dense<0.000000e+00> : vector<32x128xf32>
    %19 = tpu.matmul %1, %18, %cst_16 {dimension_numbers = #tpu.dot_dimension_numbers<[1], [0], [0], [1], [0, 0, 1, 1], [], []>} : vector<32x300xbf16>, vector<300x128xbf16>, vector<32x128xf32> -> vector<32x128xf32>
    %c28_i32 = arith.constant 28 : i32
    %20 = tpu.dynamic_rotate %19 by %c28_i32 dim 0 : vector<32x128xf32>, i32 -> vector<32x128xf32>
    %21 = vector.extract_strided_slice %14 {offsets = [0, 0], sizes = [32, 128], strides = [1, 1]} : vector<32x384xf32> to vector<32x128xf32>
    %22 = vector.extract_strided_slice %14 {offsets = [0, 128], sizes = [32, 128], strides = [1, 1]} : vector<32x384xf32> to vector<32x128xf32>
    %23 = vector.extract_strided_slice %17 {offsets = [0, 0], sizes = [32, 128], strides = [1, 1]} : vector<32x256xf32> to vector<32x128xf32>
    %24 = arith.addf %22, %23 : vector<32x128xf32>
    %25 = vector.extract_strided_slice %14 {offsets = [0, 256], sizes = [32, 128], strides = [1, 1]} : vector<32x384xf32> to vector<32x128xf32>
    %26 = vector.extract_strided_slice %17 {offsets = [0, 128], sizes = [32, 128], strides = [1, 1]} : vector<32x256xf32> to vector<32x128xf32>
    %27 = arith.addf %25, %26 : vector<32x128xf32>
    %28 = arith.addf %27, %20 : vector<32x128xf32>
    %29 = tpu.concatenate %21, %24, %28 in 1 : vector<32x128xf32>, vector<32x128xf32>, vector<32x128xf32> -> vector<32x384xf32>
    %30 = vector.shape_cast %29 : vector<32x384xf32> to vector<2x16x384xf32>
    %c0_17 = arith.constant 0 : index
    %c0_18 = arith.constant 0 : index
    %31 = vector.load %arg6[%c0_17, %c0_18] : memref<16x384xf32, #tpu.memory_space<vmem>>, vector<16x384xf32>
    %32 = vector.shape_cast %31 : vector<16x384xf32> to vector<1x16x384xf32>
    %33 = vector.broadcast %32 : vector<1x16x384xf32> to vector<2x16x384xf32>
    %34 = arith.addf %30, %33 : vector<2x16x384xf32>
    %cst_19 = arith.constant dense<0xFF800000> : vector<2x384xf32>
    %35 = vector.multi_reduction <maximumf>, %34, %cst_19 [1] : vector<2x16x384xf32> to vector<2x384xf32>
    %c0_20 = arith.constant 0 : index
    %c0_21 = arith.constant 0 : index
    %36 = vector.load %arg5[%c0_20, %c0_21] : memref<1x384xf32, #tpu.memory_space<vmem>>, vector<1x384xf32>
    %37 = vector.broadcast %36 : vector<1x384xf32> to vector<2x384xf32>
    %38 = arith.addf %35, %37 : vector<2x384xf32>
    %39 = arith.truncf %38 : vector<2x384xf32> to vector<2x384xbf16>
    %c0_22 = arith.constant 0 : index
    %c0_23 = arith.constant 0 : index
    %40 = vector.load %arg7[%c0_22, %c0_23] : memref<384x128xbf16, #tpu.memory_space<vmem>>, vector<384x128xbf16>
    %cst_24 = arith.constant dense<0.000000e+00> : vector<2x128xf32>
    %41 = tpu.matmul %39, %40, %cst_24 {dimension_numbers = #tpu.dot_dimension_numbers<[1], [0], [0], [1], [0, 0, 1, 1], [], []>} : vector<2x384xbf16>, vector<384x128xbf16>, vector<2x128xf32> -> vector<2x128xf32>
    %c0_25 = arith.constant 0 : index
    %c0_26 = arith.constant 0 : index
    %42 = vector.load %arg8[%c0_25, %c0_26] : memref<1x128xf32, #tpu.memory_space<vmem>>, vector<1x128xf32>
    %43 = vector.broadcast %42 : vector<1x128xf32> to vector<2x128xf32>
    %44 = arith.addf %41, %43 : vector<2x128xf32>
    %cst_27 = arith.constant 0.000000e+00 : f32
    %45 = vector.broadcast %cst_27 : f32 to vector<2x128xf32>
    %46 = arith.maximumf %44, %45 : vector<2x128xf32>
    %c0_28 = arith.constant 0 : index
    %c0_29 = arith.constant 0 : index
    %47 = vector.load %arg9[%c0_28, %c0_29] : memref<1x128xf32, #tpu.memory_space<vmem>>, vector<1x128xf32>
    %48 = vector.broadcast %47 : vector<1x128xf32> to vector<2x128xf32>
    %49 = arith.mulf %46, %48 : vector<2x128xf32>
    %cst_30 = arith.constant dense<0.000000e+00> : vector<2xf32>
    %50 = vector.multi_reduction <add>, %49, %cst_30 [1] : vector<2x128xf32> to vector<2xf32>
    %51 = vector.shape_cast %50 : vector<2xf32> to vector<1x2xf32>
    %c0_31 = arith.constant 0 : index
    %c0_32 = arith.constant 0 : index
    %52 = vector.load %arg10[%c0_31, %c0_32] : memref<1x1xf32, #tpu.memory_space<vmem>>, vector<1x1xf32>
    %53 = vector.broadcast %52 : vector<1x1xf32> to vector<1x2xf32>
    %54 = arith.addf %51, %53 : vector<1x2xf32>
    %55 = vector.shape_cast %54 : vector<1x2xf32> to vector<1x1x2xf32>
    %c0_33 = arith.constant 0 : index
    %c0_34 = arith.constant 0 : index
    %c0_35 = arith.constant 0 : index
    %56 = vector.load %arg11[%c0_33, %c0_34, %c0_35] : memref<1x1x2xf32, #tpu.memory_space<vmem>>, vector<1x1x2xf32>
    tpu.vector_store %arg11[%c0_33, %c0_34, %c0_35], %55 {strides = array<i32>} : memref<1x1x2xf32, #tpu.memory_space<vmem>>, vector<1x1x2xf32>,
    return
  }
  func.func @transform_0(%arg0: i32) -> (i32, i32, i32) {
    %c0_i32 = arith.constant 0 : i32
    %c0_i32_0 = arith.constant 0 : i32
    %c0_i32_1 = arith.constant 0 : i32
    return %arg0, %c0_i32, %c0_i32_0 : i32, i32, i32
  }
  func.func @transform_1(%arg0: i32) -> (i32, i32, i32) {
    %c0_i32 = arith.constant 0 : i32
    %c0_i32_0 = arith.constant 0 : i32
    %c0_i32_1 = arith.constant 0 : i32
    %c0_i32_2 = arith.constant 0 : i32
    return %c0_i32, %c0_i32_0, %c0_i32_1 : i32, i32, i32
  }
  func.func @transform_2(%arg0: i32) -> (i32, i32) {
    %c0_i32 = arith.constant 0 : i32
    %c0_i32_0 = arith.constant 0 : i32
    %c0_i32_1 = arith.constant 0 : i32
    return %c0_i32, %c0_i32_0 : i32, i32
  }
  func.func @transform_3(%arg0: i32) -> (i32, i32) {
    %c0_i32 = arith.constant 0 : i32
    %c0_i32_0 = arith.constant 0 : i32
    %c0_i32_1 = arith.constant 0 : i32
    return %c0_i32, %c0_i32_0 : i32, i32
  }
  func.func @transform_4(%arg0: i32) -> (i32, i32) {
    %c0_i32 = arith.constant 0 : i32
    %c0_i32_0 = arith.constant 0 : i32
    %c0_i32_1 = arith.constant 0 : i32
    return %c0_i32, %c0_i32_0 : i32, i32
  }
  func.func @transform_5(%arg0: i32) -> (i32, i32) {
    %c0_i32 = arith.constant 0 : i32
    %c0_i32_0 = arith.constant 0 : i32
    %c0_i32_1 = arith.constant 0 : i32
    return %c0_i32, %c0_i32_0 : i32, i32
  }
  func.func @transform_6(%arg0: i32) -> (i32, i32) {
    %c0_i32 = arith.constant 0 : i32
    %c0_i32_0 = arith.constant 0 : i32
    %c0_i32_1 = arith.constant 0 : i32
    return %c0_i32, %c0_i32_0 : i32, i32
  }
  func.func @transform_7(%arg0: i32) -> (i32, i32) {
    %c0_i32 = arith.constant 0 : i32
    %c0_i32_0 = arith.constant 0 : i32
    %c0_i32_1 = arith.constant 0 : i32
    return %c0_i32, %c0_i32_0 : i32, i32
  }
  func.func @transform_8(%arg0: i32) -> (i32, i32) {
    %c0_i32 = arith.constant 0 : i32
    %c0_i32_0 = arith.constant 0 : i32
    %c0_i32_1 = arith.constant 0 : i32
    return %c0_i32, %c0_i32_0 : i32, i32
  }
  func.func @transform_9(%arg0: i32) -> (i32, i32) {
    %c0_i32 = arith.constant 0 : i32
    %c0_i32_0 = arith.constant 0 : i32
    %c0_i32_1 = arith.constant 0 : i32
    return %c0_i32, %c0_i32_0 : i32, i32
  }
  func.func @transform_10(%arg0: i32) -> (i32, i32, i32) {
    %c0_i32 = arith.constant 0 : i32
    %c0_i32_0 = arith.constant 0 : i32
    %c0_i32_1 = arith.constant 0 : i32
    return %arg0, %c0_i32, %c0_i32_0 : i32, i32, i32
  }
}

module attributes {stable_mosaic.version = 11 : i64} {
  func.func @textcnn_kernel(%arg0: i32, %arg1: memref<2x16x300xbf16, #tpu.memory_space<vmem>>, %arg2: memref<3x300x384xbf16, #tpu.memory_space<vmem>>, %arg3: memref<300x256xbf16, #tpu.memory_space<vmem>>, %arg4: memref<300x128xbf16, #tpu.memory_space<vmem>>, %arg5: memref<1x384xf32, #tpu.memory_space<vmem>>, %arg6: memref<16x384xf32, #tpu.memory_space<vmem>>, %arg7: memref<384x128xbf16, #tpu.memory_space<vmem>>, %arg8: memref<1x128xf32, #tpu.memory_space<vmem>>, %arg9: memref<1x128xf32, #tpu.memory_space<vmem>>, %arg10: memref<1x1xf32, #tpu.memory_space<vmem>>, %arg11: memref<1x1x2xf32, #tpu.memory_space<vmem>>) attributes {dimension_semantics = [#tpu.dimension_semantics<parallel>], iteration_bounds = array<i64: 1>, scalar_prefetch = 0 : i64, scratch_operands = 0 : i64, tpu.core_type = #tpu.core_type<tc>, window_params = [{transform_indices = @transform_0, window_bounds = array<i64: 2, 16, 300>}, {pipeline_mode = #tpu.pipeline_mode<synchronous>, transform_indices = @transform_1, window_bounds = array<i64: 3, 300, 384>}, {pipeline_mode = #tpu.pipeline_mode<synchronous>, transform_indices = @transform_2, window_bounds = array<i64: 300, 256>}, {pipeline_mode = #tpu.pipeline_mode<synchronous>, transform_indices = @transform_3, window_bounds = array<i64: 300, 128>}, {pipeline_mode = #tpu.pipeline_mode<synchronous>, transform_indices = @transform_4, window_bounds = array<i64: 1, 384>}, {pipeline_mode = #tpu.pipeline_mode<synchronous>, transform_indices = @transform_5, window_bounds = array<i64: 16, 384>}, {pipeline_mode = #tpu.pipeline_mode<synchronous>, transform_indices = @transform_6, window_bounds = array<i64: 384, 128>}, {pipeline_mode = #tpu.pipeline_mode<synchronous>, transform_indices = @transform_7, window_bounds = array<i64: 1, 128>}, {pipeline_mode = #tpu.pipeline_mode<synchronous>, transform_indices = @transform_8, window_bounds = array<i64: 1, 128>}, {pipeline_mode = #tpu.pipeline_mode<synchronous>, transform_indices = @transform_9, window_bounds = array<i64: 1, 1>}, {transform_indices = @transform_10, window_bounds = array<i64: 1, 1, 2>}]} {
    %c0 = arith.constant 0 : index
    %c0_0 = arith.constant 0 : index
    %c0_1 = arith.constant 0 : index
    %0 = vector.load %arg1[%c0, %c0_0, %c0_1] : memref<2x16x300xbf16, #tpu.memory_space<vmem>>, vector<2x16x300xbf16>
    %1 = vector.shape_cast %0 : vector<2x16x300xbf16> to vector<32x300xbf16>
    %c0_2 = arith.constant 0 : index
    %c0_3 = arith.constant 0 : index
    %c0_4 = arith.constant 0 : index
    %2 = vector.load %arg2[%c0_2, %c0_3, %c0_4] : memref<3x300x384xbf16, #tpu.memory_space<vmem>>, vector<1x300x384xbf16>
    %3 = vector.shape_cast %2 : vector<1x300x384xbf16> to vector<300x384xbf16>
    %cst = arith.constant dense<0.000000e+00> : vector<32x384xf32>
    %4 = tpu.matmul %1, %3, %cst {dimension_numbers = #tpu.dot_dimension_numbers<[1], [0], [0], [1], [0, 0, 1, 1], [], []>} : vector<32x300xbf16>, vector<300x384xbf16>, vector<32x384xf32> -> vector<32x384xf32>
    %c1 = arith.constant 1 : index
    %c0_5 = arith.constant 0 : index
    %c0_6 = arith.constant 0 : index
    %5 = vector.load %arg2[%c1, %c0_5, %c0_6] : memref<3x300x384xbf16, #tpu.memory_space<vmem>>, vector<1x300x384xbf16>
    %6 = vector.shape_cast %5 : vector<1x300x384xbf16> to vector<300x384xbf16>
    %cst_7 = arith.constant dense<0.000000e+00> : vector<32x384xf32>
    %7 = tpu.matmul %1, %6, %cst_7 {dimension_numbers = #tpu.dot_dimension_numbers<[1], [0], [0], [1], [0, 0, 1, 1], [], []>} : vector<32x300xbf16>, vector<300x384xbf16>, vector<32x384xf32> -> vector<32x384xf32>
    %8 = vector.extract_strided_slice %7 {offsets = [1, 0], sizes = [31, 384], strides = [1, 1]} : vector<32x384xf32> to vector<31x384xf32>
    %cst_8 = arith.constant 0.000000e+00 : f32
    %9 = vector.broadcast %cst_8 : f32 to vector<1x384xf32>
    %10 = tpu.concatenate %8, %9 in 0 : vector<31x384xf32>, vector<1x384xf32> -> vector<32x384xf32>
    %11 = arith.addf %4, %10 : vector<32x384xf32>
    %c2 = arith.constant 2 : index
    %c0_9 = arith.constant 0 : index
    %c0_10 = arith.constant 0 : index
    %12 = vector.load %arg2[%c2, %c0_9, %c0_10] : memref<3x300x384xbf16, #tpu.memory_space<vmem>>, vector<1x300x384xbf16>
    %13 = vector.shape_cast %12 : vector<1x300x384xbf16> to vector<300x384xbf16>
    %cst_11 = arith.constant dense<0.000000e+00> : vector<32x384xf32>
    %14 = tpu.matmul %1, %13, %cst_11 {dimension_numbers = #tpu.dot_dimension_numbers<[1], [0], [0], [1], [0, 0, 1, 1], [], []>} : vector<32x300xbf16>, vector<300x384xbf16>, vector<32x384xf32> -> vector<32x384xf32>
    %15 = vector.extract_strided_slice %14 {offsets = [2, 0], sizes = [30, 384], strides = [1, 1]} : vector<32x384xf32> to vector<30x384xf32>
    %cst_12 = arith.constant 0.000000e+00 : f32
    %16 = vector.broadcast %cst_12 : f32 to vector<2x384xf32>
    %17 = tpu.concatenate %15, %16 in 0 : vector<30x384xf32>, vector<2x384xf32> -> vector<32x384xf32>
    %18 = arith.addf %11, %17 : vector<32x384xf32>
    %c0_13 = arith.constant 0 : index
    %c0_14 = arith.constant 0 : index
    %19 = vector.load %arg3[%c0_13, %c0_14] : memref<300x256xbf16, #tpu.memory_space<vmem>>, vector<300x256xbf16>
    %cst_15 = arith.constant dense<0.000000e+00> : vector<32x256xf32>
    %20 = tpu.matmul %1, %19, %cst_15 {dimension_numbers = #tpu.dot_dimension_numbers<[1], [0], [0], [1], [0, 0, 1, 1], [], []>} : vector<32x300xbf16>, vector<300x256xbf16>, vector<32x256xf32> -> vector<32x256xf32>
    %21 = vector.extract_strided_slice %20 {offsets = [3, 0], sizes = [29, 256], strides = [1, 1]} : vector<32x256xf32> to vector<29x256xf32>
    %cst_16 = arith.constant 0.000000e+00 : f32
    %22 = vector.broadcast %cst_16 : f32 to vector<3x256xf32>
    %23 = tpu.concatenate %21, %22 in 0 : vector<29x256xf32>, vector<3x256xf32> -> vector<32x256xf32>
    %c0_17 = arith.constant 0 : index
    %c0_18 = arith.constant 0 : index
    %24 = vector.load %arg4[%c0_17, %c0_18] : memref<300x128xbf16, #tpu.memory_space<vmem>>, vector<300x128xbf16>
    %cst_19 = arith.constant dense<0.000000e+00> : vector<32x128xf32>
    %25 = tpu.matmul %1, %24, %cst_19 {dimension_numbers = #tpu.dot_dimension_numbers<[1], [0], [0], [1], [0, 0, 1, 1], [], []>} : vector<32x300xbf16>, vector<300x128xbf16>, vector<32x128xf32> -> vector<32x128xf32>
    %26 = vector.extract_strided_slice %25 {offsets = [4, 0], sizes = [28, 128], strides = [1, 1]} : vector<32x128xf32> to vector<28x128xf32>
    %cst_20 = arith.constant 0.000000e+00 : f32
    %27 = vector.broadcast %cst_20 : f32 to vector<4x128xf32>
    %28 = tpu.concatenate %26, %27 in 0 : vector<28x128xf32>, vector<4x128xf32> -> vector<32x128xf32>
    %29 = vector.extract_strided_slice %18 {offsets = [0, 0], sizes = [32, 128], strides = [1, 1]} : vector<32x384xf32> to vector<32x128xf32>
    %30 = vector.extract_strided_slice %18 {offsets = [0, 128], sizes = [32, 128], strides = [1, 1]} : vector<32x384xf32> to vector<32x128xf32>
    %31 = vector.extract_strided_slice %23 {offsets = [0, 0], sizes = [32, 128], strides = [1, 1]} : vector<32x256xf32> to vector<32x128xf32>
    %32 = arith.addf %30, %31 : vector<32x128xf32>
    %33 = vector.extract_strided_slice %18 {offsets = [0, 256], sizes = [32, 128], strides = [1, 1]} : vector<32x384xf32> to vector<32x128xf32>
    %34 = vector.extract_strided_slice %23 {offsets = [0, 128], sizes = [32, 128], strides = [1, 1]} : vector<32x256xf32> to vector<32x128xf32>
    %35 = arith.addf %33, %34 : vector<32x128xf32>
    %36 = arith.addf %35, %28 : vector<32x128xf32>
    %37 = tpu.concatenate %29, %32, %36 in 1 : vector<32x128xf32>, vector<32x128xf32>, vector<32x128xf32> -> vector<32x384xf32>
    %38 = vector.shape_cast %37 : vector<32x384xf32> to vector<2x16x384xf32>
    %c0_21 = arith.constant 0 : index
    %c0_22 = arith.constant 0 : index
    %39 = vector.load %arg6[%c0_21, %c0_22] : memref<16x384xf32, #tpu.memory_space<vmem>>, vector<16x384xf32>
    %40 = vector.shape_cast %39 : vector<16x384xf32> to vector<1x16x384xf32>
    %41 = vector.broadcast %40 : vector<1x16x384xf32> to vector<2x16x384xf32>
    %42 = arith.addf %38, %41 : vector<2x16x384xf32>
    %cst_23 = arith.constant dense<0xFF800000> : vector<2x384xf32>
    %43 = vector.multi_reduction <maximumf>, %42, %cst_23 [1] : vector<2x16x384xf32> to vector<2x384xf32>
    %c0_24 = arith.constant 0 : index
    %c0_25 = arith.constant 0 : index
    %44 = vector.load %arg5[%c0_24, %c0_25] : memref<1x384xf32, #tpu.memory_space<vmem>>, vector<1x384xf32>
    %45 = vector.broadcast %44 : vector<1x384xf32> to vector<2x384xf32>
    %46 = arith.addf %43, %45 : vector<2x384xf32>
    %47 = arith.truncf %46 : vector<2x384xf32> to vector<2x384xbf16>
    %c0_26 = arith.constant 0 : index
    %c0_27 = arith.constant 0 : index
    %48 = vector.load %arg7[%c0_26, %c0_27] : memref<384x128xbf16, #tpu.memory_space<vmem>>, vector<384x128xbf16>
    %cst_28 = arith.constant dense<0.000000e+00> : vector<2x128xf32>
    %49 = tpu.matmul %47, %48, %cst_28 {dimension_numbers = #tpu.dot_dimension_numbers<[1], [0], [0], [1], [0, 0, 1, 1], [], []>} : vector<2x384xbf16>, vector<384x128xbf16>, vector<2x128xf32> -> vector<2x128xf32>
    %c0_29 = arith.constant 0 : index
    %c0_30 = arith.constant 0 : index
    %50 = vector.load %arg8[%c0_29, %c0_30] : memref<1x128xf32, #tpu.memory_space<vmem>>, vector<1x128xf32>
    %51 = vector.broadcast %50 : vector<1x128xf32> to vector<2x128xf32>
    %52 = arith.addf %49, %51 : vector<2x128xf32>
    %cst_31 = arith.constant 0.000000e+00 : f32
    %53 = vector.broadcast %cst_31 : f32 to vector<2x128xf32>
    %54 = arith.maximumf %52, %53 : vector<2x128xf32>
    %c0_32 = arith.constant 0 : index
    %c0_33 = arith.constant 0 : index
    %55 = vector.load %arg9[%c0_32, %c0_33] : memref<1x128xf32, #tpu.memory_space<vmem>>, vector<1x128xf32>
    %56 = vector.broadcast %55 : vector<1x128xf32> to vector<2x128xf32>
    %57 = arith.mulf %54, %56 : vector<2x128xf32>
    %cst_34 = arith.constant dense<0.000000e+00> : vector<2xf32>
    %58 = vector.multi_reduction <add>, %57, %cst_34 [1] : vector<2x128xf32> to vector<2xf32>
    %59 = vector.shape_cast %58 : vector<2xf32> to vector<1x2xf32>
    %c0_35 = arith.constant 0 : index
    %c0_36 = arith.constant 0 : index
    %60 = vector.load %arg10[%c0_35, %c0_36] : memref<1x1xf32, #tpu.memory_space<vmem>>, vector<1x1xf32>
    %61 = vector.broadcast %60 : vector<1x1xf32> to vector<1x2xf32>
    %62 = arith.addf %59, %61 : vector<1x2xf32>
    %63 = vector.shape_cast %62 : vector<1x2xf32> to vector<1x1x2xf32>
    %c0_37 = arith.constant 0 : index
    %c0_38 = arith.constant 0 : index
    %c0_39 = arith.constant 0 : index
    %64 = vector.load %arg11[%c0_37, %c0_38, %c0_39] : memref<1x1x2xf32, #tpu.memory_space<vmem>>, vector<1x1x2xf32>
    tpu.vector_store %arg11[%c0_37, %c0_38, %c0_39], %63 {strides = array<i32>} : memref<1x1x2xf32, #tpu.memory_space<vmem>>, vector<1x1x2xf32>,
    return
  }
  func.func @transform_0(%arg0: i32) -> (i32, i32, i32) {
    %c0_i32 = arith.constant 0 : i32
    %c0_i32_0 = arith.constant 0 : i32
    %c0_i32_1 = arith.constant 0 : i32
    return %arg0, %c0_i32, %c0_i32_0 : i32, i32, i32
  }
  func.func @transform_1(%arg0: i32) -> (i32, i32, i32) {
    %c0_i32 = arith.constant 0 : i32
    %c0_i32_0 = arith.constant 0 : i32
    %c0_i32_1 = arith.constant 0 : i32
    %c0_i32_2 = arith.constant 0 : i32
    return %c0_i32, %c0_i32_0, %c0_i32_1 : i32, i32, i32
  }
  func.func @transform_2(%arg0: i32) -> (i32, i32) {
    %c0_i32 = arith.constant 0 : i32
    %c0_i32_0 = arith.constant 0 : i32
    %c0_i32_1 = arith.constant 0 : i32
    return %c0_i32, %c0_i32_0 : i32, i32
  }
  func.func @transform_3(%arg0: i32) -> (i32, i32) {
    %c0_i32 = arith.constant 0 : i32
    %c0_i32_0 = arith.constant 0 : i32
    %c0_i32_1 = arith.constant 0 : i32
    return %c0_i32, %c0_i32_0 : i32, i32
  }
  func.func @transform_4(%arg0: i32) -> (i32, i32) {
    %c0_i32 = arith.constant 0 : i32
    %c0_i32_0 = arith.constant 0 : i32
    %c0_i32_1 = arith.constant 0 : i32
    return %c0_i32, %c0_i32_0 : i32, i32
  }
  func.func @transform_5(%arg0: i32) -> (i32, i32) {
    %c0_i32 = arith.constant 0 : i32
    %c0_i32_0 = arith.constant 0 : i32
    %c0_i32_1 = arith.constant 0 : i32
    return %c0_i32, %c0_i32_0 : i32, i32
  }
  func.func @transform_6(%arg0: i32) -> (i32, i32) {
    %c0_i32 = arith.constant 0 : i32
    %c0_i32_0 = arith.constant 0 : i32
    %c0_i32_1 = arith.constant 0 : i32
    return %c0_i32, %c0_i32_0 : i32, i32
  }
  func.func @transform_7(%arg0: i32) -> (i32, i32) {
    %c0_i32 = arith.constant 0 : i32
    %c0_i32_0 = arith.constant 0 : i32
    %c0_i32_1 = arith.constant 0 : i32
    return %c0_i32, %c0_i32_0 : i32, i32
  }
  func.func @transform_8(%arg0: i32) -> (i32, i32) {
    %c0_i32 = arith.constant 0 : i32
    %c0_i32_0 = arith.constant 0 : i32
    %c0_i32_1 = arith.constant 0 : i32
    return %c0_i32, %c0_i32_0 : i32, i32
  }
  func.func @transform_9(%arg0: i32) -> (i32, i32) {
    %c0_i32 = arith.constant 0 : i32
    %c0_i32_0 = arith.constant 0 : i32
    %c0_i32_1 = arith.constant 0 : i32
    return %c0_i32, %c0_i32_0 : i32, i32
  }
  func.func @transform_10(%arg0: i32) -> (i32, i32, i32) {
    %c0_i32 = arith.constant 0 : i32
    %c0_i32_0 = arith.constant 0 : i32
    %c0_i32_1 = arith.constant 0 : i32
    return %arg0, %c0_i32, %c0_i32_0 : i32, i32, i32
  }
}

</mosaic_0001>

<bundles_post_ra>
// kernel: tpu_custom_call.1
= control target key start
LH: loop header
LB: loop body
LE: loop exit
PB: predicated region body
PF: predicated region fallthrough
CT: control target
= control target key end

     0   :  { %s4893_s0 = inlined_call_operand.hbm [shape: bf16[2,16,300], index: 0, kind: input, shape index: {}]   ;;  %s4894_s1 = inlined_call_operand.hbm [shape: bf16[3,300,384], index: 1, kind: input, shape index: {}]   ;;  %s4895_s2 = inlined_call_operand.hbm [shape: bf16[300,256], index: 2, kind: input, shape index: {}]   ;;  %s4896_s3 = inlined_call_operand.hbm [shape: bf16[300,128], index: 3, kind: input, shape index: {}]   ;;  %s4897_s4 = inlined_call_operand.vmem [shape: f32[1,384], index: 4, kind: input, shape index: {}]   ;;  %s4898_s5 = inlined_call_operand.hbm [shape: f32[16,384], index: 5, kind: input, shape index: {}]   ;;  %s4899_s6 = inlined_call_operand.hbm [shape: bf16[384,128], index: 6, kind: input, shape index: {}]   ;;  %s4900_s7 = inlined_call_operand.vmem [shape: f32[1,128], index: 7, kind: input, shape index: {}]   ;;  %s4901_s8 = inlined_call_operand.vmem [shape: f32[1,128], index: 8, kind: input, shape index: {}]   ;;  %s4902_s9 = inlined_call_operand.<no memory space> [shape: f32[1,1], index: 9, kind: input, shape index: {}]   ;;  %s4903_s10 = inlined_call_operand.hbm [shape: f32[1,1,2], index: 10, kind: output, shape index: {}]  }
   0x1   :  { %v15_v0 = vstv %s4902_s9 }
   0x2   :  { %16 = vst [vmem:[#allocation2] sm:$0x1] %v15_v0 }
   0x3   :  { %17 = vsyncpa [#allocation4], 0 }
   0x4   :  { %18 = vsyncpa [#allocation7], 0 }
   0x5   :  { %19 = vsyncpa [#allocation10], 0 }
   0x6   :  { %20 = vsyncpa [#allocation13], 0 }
   0x7   :  { %21 = vsyncpa [#allocation5], 0  ;;  %s39_s17 = sshll.u32 %s4894_s1, 4  ;;  %s4407_s18 = smov [#allocation6]   ;;  %s40_s17 = int_to_ptr.hbm [resolvable:$true] %s39_s17 }
   0x8   :  { %s41_s19 = sshll.u32 %s4407_s18, 4  ;;  %s65_s22 = sshll.u32 %s4896_s3, 4  ;;  %s42_s19 = int_to_ptr.vmem [resolvable:$true] %s41_s19  ;;  %s66_s22 = int_to_ptr.hbm [resolvable:$true] %s65_s22 }
   0x9   :  { %s4408_s23 = smov 192   ;;  %s4409_s9 = smov 12  }
   0xa   :  { %47 = dma.hbm_to_vmem [thread:$0]  %s40_s17, 21888, %s42_s19, [#allocation7], %s4408_s23, %s4408_s23, %s4409_s9  }
   0xb   :  { %s4410_s24 = smov [#allocation9]   ;;  %s4411_s26 = smov 64  }
   0xc   :  { %s67_s25 = sshll.u32 %s4410_s24, 4  ;;  %s4412_s27 = smov 4   ;;  %s68_s25 = int_to_ptr.vmem [resolvable:$true] %s67_s25 }
   0xd   :  { %73 = dma.hbm_to_vmem [thread:$0]  %s66_s22, 2432, %s68_s25, [#allocation10], %s4411_s26, %s4411_s26, %s4412_s27  }
   0xe   :  { %s26_s29 = sshll.u32 %s4893_s0, 4  ;;  %s4413_s30 = smov [#allocation3]   ;;  %s27_s29 = int_to_ptr.hbm [resolvable:$true] %s26_s29 }
   0xf   :  { %s28_s3 = sshll.u32 %s4413_s30, 4  ;;  %s52_s13 = sshll.u32 %s4895_s2, 4  ;;  %s29_s3 = int_to_ptr.vmem [resolvable:$true] %s28_s3  ;;  %s53_s13 = int_to_ptr.hbm [resolvable:$true] %s52_s13 }
  0x10   :  { %34 = dma.hbm_to_vmem [thread:$0]  %s27_s29, 768, %s29_s3, [#allocation4], %s4408_s23, %s4408_s23, %s4409_s9  }
  0x11   :  { %s4414_s14 = smov [#allocation8]   ;;  %s4415_s16 = smov 128  }
  0x12   :  { %s54_s15 = sshll.u32 %s4414_s14, 4  ;;  %s4416_s17 = smov 8   ;;  %s55_s15 = int_to_ptr.vmem [resolvable:$true] %s54_s15 }
  0x13   :  { %60 = dma.hbm_to_vmem [thread:$0]  %s53_s13, 4864, %s55_s15, [#allocation7], %s4415_s16, %s4415_s16, %s4416_s17  }
  0x14   :  { %s80_s0 = sshll.u32 %s4898_s5, 4  ;;  %s4417_s20 = smov [#allocation11]   ;;  %s81_s0 = int_to_ptr.hbm [resolvable:$true] %s80_s0 }
  0x15   :  { %s82_s21 = sshll.u32 %s4417_s20, 4  ;;  %s93_s2 = sshll.u32 %s4899_s6, 4  ;;  %s83_s21 = int_to_ptr.vmem [resolvable:$true] %s82_s21  ;;  %s94_s2 = int_to_ptr.hbm [resolvable:$true] %s93_s2 }
  0x16   :  { %s4418_s23 = smov 384   ;;  %s4419_s9 = smov 24  }
  0x17   :  { %88 = dma.hbm_to_vmem [thread:$0]  %s81_s0, 768, %s83_s21, [#allocation10], %s4418_s23, %s4418_s23, %s4419_s9  }
  0x18   :  { %s4420_s25 = smov [#allocation12]  }
  0x19   :  { %s95_s1 = sshll.u32 %s4420_s25, 4  ;;  %s96_s1 = int_to_ptr.vmem [resolvable:$true] %s95_s1 }
  0x1a   :  { %101 = dma.hbm_to_vmem [thread:$0]  %s94_s2, 3072, %s96_s1, [#allocation13], %s4411_s26, %s4411_s26, %s4412_s27  }
  0x1b   :  { %4397 = dma.done.wait [#allocation4], 768  }
  0x1c   :  { %4398 = vsyncadd [#allocation4], 4294966528 }
  0x1d   :  { %4399 = dma.done.wait [#allocation7], 26752  }
  0x1e   :  { %4400 = vsyncadd [#allocation7], 4294940544 }
  0x1f   :  { %4401 = dma.done.wait [#allocation10], 3200  }
  0x20   :  { %4402 = vsyncadd [#allocation10], 4294964096 }
  0x21   :  { %4403 = dma.done.wait [#allocation13], 3072  }
  0x22   :  { %4404 = vsyncadd [#allocation13], 4294964224  ;;  %vm632_vm0 = vcmask 1045504   ;;  %v3006_v1 = vld [vmem:[#allocation6 + $0x270] sm:$0xf]  ;;  %vm625_vm1 = vcmask 359424  }
  0x23   :  { %v4037_v2 = vld [vmem:[#allocation6 + $0x278] sm:$0xf0]  ;;  %v3102_v3 = vld [vmem:[#allocation6 + $0x330] sm:$0xf]  ;;  %v4036_v6 = vld [vmem:[#allocation6 + $0x274] sm:$0xf] }
  0x24   :  { %v3007_v4 = vor.u32 %v4037_v2, %v3006_v1  ;;  %v4061_v5 = vld [vmem:[#allocation6 + $0x338] sm:$0xf0]  ;;  %v3008_v7 = vld [vmem:[#allocation6 + $0x27c] sm:$0xf0]  ;;  %v3138_v10 = vld [vmem:[#allocation6 + $0x378] sm:$0xf] }
  0x25   :  { %v3103_v8 = vor.u32 %v4061_v5, %v3102_v3  ;;  %v3011_v9 = vor.u32 %v4036_v6, %v3008_v7  ;;  %v4070_v11 = vld [vmem:[#allocation6 + $0x380] sm:$0x30]  ;;  %v2994_v12 = vld [vmem:[#allocation6 + $0x258] sm:$0xf]  ;;  %v4033_v19 = vld [vmem:[#allocation6 + $0x25c] sm:$0xf] }
  0x26   :  { %642 = vmatpush.bf16.msra.mxu0 %v3007_v4  ;;  %v3139_v13 = vor.u32 %v4070_v11, %v3138_v10  ;;  %v4034_v14 = vld [vmem:[#allocation6 + $0x260] sm:$0xf0]  ;;  %v3090_v15 = vld [vmem:[#allocation6 + $0x318] sm:$0xf]  ;;  %v2996_v20 = vld [vmem:[#allocation6 + $0x264] sm:$0xf0] }
  0x27   :  { %v4058_v16 = vld [vmem:[#allocation6 + $0x320] sm:$0xf0]  ;;  %661 = vmatpush.bf16.msra.mxu1 %v3103_v8  ;;  %699 = vmatpush.bf16.msra.mxu3 %v3011_v9  ;;  %v2995_v17 = vor.u32 %v4034_v14, %v2994_v12  ;;  %v3126_v21 = vld [vmem:[#allocation6 + $0x360] sm:$0xf]  ;;  %v2999_v23 = vor.u32 %v4033_v19, %v2996_v20  ;;  %v4067_v24 = vld [vmem:[#allocation6 + $0x368] sm:$0xf0] }
  0x28   :  { %v3091_v18 = vor.u32 %v4058_v16, %v3090_v15  ;;  %v634_v22 = vsel %vm632_vm0, %v3139_v13, 0  ;;  %v2982_v25 = vld [vmem:[#allocation6 + $0x240] sm:$0xf]  ;;  %v3127_v26 = vor.u32 %v4067_v24, %v3126_v21  ;;  %v4031_v27 = vld [vmem:[#allocation6 + $0x248] sm:$0xf0]  ;;  %vm2656_vm4 = vcmask 1041409  }
  0x29   :  { %685 = vmatpush.bf16.msra.mxu2 %v634_v22  ;;  %v3078_v28 = vld [vmem:[#allocation6 + $0x300] sm:$0xf]  ;;  %v4055_v29 = vld [vmem:[#allocation6 + $0x308] sm:$0xf0]  ;;  %v2983_v30 = vor.u32 %v4031_v27, %v2982_v25  ;;  %v4030_v31 = vld [vmem:[#allocation6 + $0x244] sm:$0xf] }
  0x2a   :  { %643 = vmatpush.bf16.msra.mxu0 %v2995_v17  ;;  %v2984_v32 = vld [vmem:[#allocation6 + $0x24c] sm:$0xf0]  ;;  %v3114_v33 = vld [vmem:[#allocation6 + $0x348] sm:$0xf]  ;;  %v3079_v34 = vor.u32 %v4055_v29, %v3078_v28  ;;  %v4064_v36 = vld [vmem:[#allocation6 + $0x350] sm:$0xf0] }
  0x2b   :  { %662 = vmatpush.bf16.msra.mxu1 %v3091_v18  ;;  %700 = vmatpush.bf16.msra.mxu3 %v2999_v23  ;;  %v2987_v35 = vor.u32 %v4030_v31, %v2984_v32  ;;  %v2970_v37 = vld [vmem:[#allocation6 + $0x228] sm:$0xf]  ;;  %v4028_v38 = vld [vmem:[#allocation6 + $0x230] sm:$0xf0]  ;;  %v2906_v41 = vld [vmem:[#allocation3 + $0x8] sm:$0xf]  ;;  %v3115_v42 = vor.u32 %v4064_v36, %v3114_v33 }
  0x2c   :  { %v3066_v39 = vld [vmem:[#allocation6 + $0x2e8] sm:$0xf]  ;;  %v4052_v40 = vld [vmem:[#allocation6 + $0x2f0] sm:$0xf0]  ;;  %v3954_v43 = vld [vmem:[#allocation3 + $0x10] sm:$0xf0]  ;;  %v2971_v46 = vor.u32 %v4028_v38, %v2970_v37 }
  0x2d   :  { %686 = vmatpush.bf16.msra.mxu2 %v3127_v26  ;;  %v4027_v44 = vld [vmem:[#allocation6 + $0x22c] sm:$0xf]  ;;  %v2972_v45 = vld [vmem:[#allocation6 + $0x234] sm:$0xf0]  ;;  %v4060_v47 = vld [vmem:[#allocation6 + $0x334] sm:$0xf]  ;;  %v3067_v50 = vor.u32 %v4052_v40, %v3066_v39  ;;  %v4506_v56 = vor.u32 %v3954_v43, %v2906_v41 }
  0x2e   :  { %644 = vmatpush.bf16.msra.mxu0 %v2983_v30  ;;  %v3104_v48 = vld [vmem:[#allocation6 + $0x33c] sm:$0xf0]  ;;  %v2958_v49 = vld [vmem:[#allocation6 + $0x210] sm:$0xf]  ;;  %v2975_v51 = vor.u32 %v4027_v44, %v2972_v45  ;;  %v4025_v53 = vld [vmem:[#allocation6 + $0x218] sm:$0xf0] }
  0x2f   :  { %663 = vmatpush.bf16.msra.mxu1 %v3079_v34  ;;  %701 = vmatpush.bf16.msra.mxu3 %v2987_v35  ;;  %v3107_v52 = vor.u32 %v4060_v47, %v3104_v48  ;;  %v3054_v54 = vld [vmem:[#allocation6 + $0x2d0] sm:$0xf]  ;;  %v4049_v55 = vld [vmem:[#allocation6 + $0x2d8] sm:$0xf0]  ;;  %v4024_v57 = vld [vmem:[#allocation6 + $0x214] sm:$0xf]  ;;  %v2959_v61 = vor.u32 %v4025_v53, %v2958_v49 }
  0x30   :  { %v2960_v58 = vld [vmem:[#allocation6 + $0x21c] sm:$0xf0]  ;;  %v4057_v59 = vld [vmem:[#allocation6 + $0x31c] sm:$0xf]  ;;  %v3092_v60 = vld [vmem:[#allocation6 + $0x324] sm:$0xf0]  ;;  %v3055_v1 = vor.u32 %v4049_v55, %v3054_v54 }
  0x31   :  { %687 = vmatpush.bf16.msra.mxu2 %v3115_v42  ;;  %v3095_v62 = vor.u32 %v4057_v59, %v3092_v60  ;;  %v2946_v63 = vld [vmem:[#allocation6 + $0x1f8] sm:$0xf]  ;;  %v4022_v0 = vld [vmem:[#allocation6 + $0x200] sm:$0xf0]  ;;  %v2963_v2 = vor.u32 %v4024_v57, %v2960_v58  ;;  %v3080_v5 = vld [vmem:[#allocation6 + $0x30c] sm:$0xf0] }
  0x32   :  { %645 = vmatpush.bf16.msra.mxu0 %v2971_v46  ;;  %v3042_v3 = vld [vmem:[#allocation6 + $0x2b8] sm:$0xf]  ;;  %v4054_v4 = vld [vmem:[#allocation6 + $0x304] sm:$0xf]  ;;  %v4021_v7 = vld [vmem:[#allocation6 + $0x1fc] sm:$0xf]  ;;  %v2947_v9 = vor.u32 %v4022_v0, %v2946_v63 }
  0x33   :  { %664 = vmatpush.bf16.msra.mxu1 %v3067_v50  ;;  %702 = vmatpush.bf16.msra.mxu3 %v2975_v51  ;;  %v4046_v6 = vld [vmem:[#allocation6 + $0x2c0] sm:$0xf0]  ;;  %v2948_v8 = vld [vmem:[#allocation6 + $0x204] sm:$0xf0]  ;;  %v3083_v10 = vor.u32 %v4054_v4, %v3080_v5  ;;  %v2934_v11 = vld [vmem:[#allocation6 + $0x1e0] sm:$0xf] }
  0x34   :  { %3148 = vmatmul.msk.bf16.vlgmr.msra.gmra.mxu2 %vm625_vm1, %v4506_v56  ;;  %v4019_v12 = vld [vmem:[#allocation6 + $0x1e8] sm:$0xf0]  ;;  %v3043_v13 = vor.u32 %v4046_v6, %v3042_v3  ;;  %v2951_v14 = vor.u32 %v4021_v7, %v2948_v8  ;;  %v3030_v15 = vld [vmem:[#allocation6 + $0x2a0] sm:$0xf]  ;;  %v3068_v17 = vld [vmem:[#allocation6 + $0x2f4] sm:$0xf0] }
  0x35   :  { %718 = vmatpush.bf16.msrb.mxu2 %v3107_v52  ;;  %v4051_v16 = vld [vmem:[#allocation6 + $0x2ec] sm:$0xf]  ;;  %v4018_v19 = vld [vmem:[#allocation6 + $0x1e4] sm:$0xf]  ;;  %v2936_v20 = vld [vmem:[#allocation6 + $0x1ec] sm:$0xf0]  ;;  %v2935_v22 = vor.u32 %v4019_v12, %v2934_v11 }
  0x36   :  { %646 = vmatpush.bf16.msra.mxu0 %v2959_v61  ;;  %v4043_v18 = vld [vmem:[#allocation6 + $0x2a8] sm:$0xf0]  ;;  %v2922_v21 = vld [vmem:[#allocation6 + $0x1c8] sm:$0xf]  ;;  %v3071_v23 = vor.u32 %v4051_v16, %v3068_v17  ;;  %v4016_v24 = vld [vmem:[#allocation6 + $0x1d0] sm:$0xf0]  ;;  %v2939_v28 = vor.u32 %v4018_v19, %v2936_v20 }
  0x37   :  { %665 = vmatpush.bf16.msra.mxu1 %v3055_v1  ;;  %703 = vmatpush.bf16.msra.mxu3 %v2963_v2  ;;  %v3018_v25 = vld [vmem:[#allocation6 + $0x288] sm:$0xf]  ;;  %v4040_v26 = vld [vmem:[#allocation6 + $0x290] sm:$0xf0]  ;;  %v3031_v27 = vor.u32 %v4043_v18, %v3030_v15  ;;  %v2918_v29 = vld [vmem:[#allocation3 + $0x20] sm:$0xf]  ;;  %v2923_v40 = vor.u32 %v4016_v24, %v2922_v21 }
  0x38   :  { %v3957_v30 = vld [vmem:[#allocation3 + $0x28] sm:$0xf0]  ;;  %v4015_v31 = vld [vmem:[#allocation6 + $0x1cc] sm:$0xf]  ;;  %v4048_v32 = vld [vmem:[#allocation6 + $0x2d4] sm:$0xf]  ;;  %v3019_v45 = vor.u32 %v4040_v26, %v3018_v25 }
  0x39   :  { %719 = vmatpush.bf16.msrb.mxu2 %v3095_v62  ;;  %v3056_v33 = vld [vmem:[#allocation6 + $0x2dc] sm:$0xf0]  ;;  %v2924_v34 = vld [vmem:[#allocation6 + $0x1d4] sm:$0xf0]  ;;  %v2898_v35 = vld [vmem:[#allocation3] sm:$0xf]  ;;  %v4510_v49 = vor.u32 %v3957_v30, %v2918_v29 }
  0x3a   :  { %647 = vmatpush.bf16.msra.mxu0 %v2947_v9  ;;  %v3110_v36 = vld [vmem:[#allocation6 + $0x338] sm:$0xf]  ;;  %v4062_v37 = vld [vmem:[#allocation6 + $0x340] sm:$0xf0]  ;;  %v4069_v38 = vld [vmem:[#allocation6 + $0x37c] sm:$0xf]  ;;  %v3059_v41 = vor.u32 %v4048_v32, %v3056_v33  ;;  %v2927_v46 = vor.u32 %v4015_v31, %v2924_v34 }
  0x3b   :  { %666 = vmatpush.bf16.msra.mxu1 %v3043_v13  ;;  %704 = vmatpush.bf16.msra.mxu3 %v2951_v14  ;;  %v3140_v39 = vld [vmem:[#allocation6 + $0x384] sm:$0x30]  ;;  %v3953_v42 = vld [vmem:[#allocation3 + $0x8] sm:$0xf0]  ;;  %v3014_v43 = vld [vmem:[#allocation6 + $0x278] sm:$0xf]  ;;  %v3111_v50 = vor.u32 %v4062_v37, %v3110_v36 }
  0x3c   :  { %v4038_v44 = vld [vmem:[#allocation6 + $0x280] sm:$0xf0]  ;;  %v3952_v47 = vld [vmem:[#allocation3 + $0x4] sm:$0xf]  ;;  %v2900_v48 = vld [vmem:[#allocation3 + $0xc] sm:$0xf0]  ;;  %v3143_v53 = vor.u32 %v4069_v38, %v3140_v39  ;;  %v4512_v54 = vor.u32 %v3953_v42, %v2898_v35 }
  0x3d   :  { %720 = vmatpush.bf16.msrb.mxu2 %v3083_v10  ;;  %v4045_v51 = vld [vmem:[#allocation6 + $0x2bc] sm:$0xf]  ;;  %v3044_v52 = vld [vmem:[#allocation6 + $0x2c4] sm:$0xf0]  ;;  %v3015_v55 = vor.u32 %v4038_v44, %v3014_v43  ;;  %v3098_v57 = vld [vmem:[#allocation6 + $0x320] sm:$0xf]  ;;  %v4514_v59 = vor.u32 %v3952_v47, %v2900_v48 }
  0x3e   :  { %648 = vmatpush.bf16.msra.mxu0 %v2935_v22  ;;  %v4059_v58 = vld [vmem:[#allocation6 + $0x328] sm:$0xf0]  ;;  %v3002_v60 = vld [vmem:[#allocation6 + $0x260] sm:$0xf]  ;;  %v3047_v62 = vor.u32 %v4045_v51, %v3044_v52  ;;  %v4042_v63 = vld [vmem:[#allocation6 + $0x2a4] sm:$0xf] }
  0x3f   :  { %667 = vmatpush.bf16.msra.mxu1 %v3031_v27  ;;  %705 = vmatpush.bf16.msra.mxu3 %v2939_v28  ;;  %v4035_v61 = vld [vmem:[#allocation6 + $0x268] sm:$0xf0]  ;;  %v3032_v0 = vld [vmem:[#allocation6 + $0x2ac] sm:$0xf0]  ;;  %v637_v1 = vsel %vm632_vm0, %v3143_v53, 0  ;;  %v3099_v2 = vor.u32 %v4059_v58, %v3098_v57  ;;  %vm2857_vm7 = vcmask 1041408  }
  0x40   :  { %v4066_v3 = vld [vmem:[#allocation6 + $0x364] sm:$0xf]  ;;  %v3128_v4 = vld [vmem:[#allocation6 + $0x36c] sm:$0xf0]  ;;  %v3003_v5 = vor.u32 %v4035_v61, %v3002_v60  ;;  %v3086_v6 = vld [vmem:[#allocation6 + $0x308] sm:$0xf]  ;;  %v3035_v10 = vor.u32 %v4042_v63, %v3032_v0 }
  0x41   :  { %721 = vmatpush.bf16.msrb.mxu2 %v3071_v23  ;;  %v4056_v7 = vld [vmem:[#allocation6 + $0x310] sm:$0xf0]  ;;  %v2990_v8 = vld [vmem:[#allocation6 + $0x248] sm:$0xf]  ;;  %v3131_v11 = vor.u32 %v4066_v3, %v3128_v4  ;;  %v4039_v13 = vld [vmem:[#allocation6 + $0x28c] sm:$0xf] }
  0x42   :  { %649 = vmatpush.bf16.msra.mxu0 %v2923_v40  ;;  %v4032_v9 = vld [vmem:[#allocation6 + $0x250] sm:$0xf0]  ;;  %v3087_v12 = vor.u32 %v4056_v7, %v3086_v6  ;;  %v3020_v14 = vld [vmem:[#allocation6 + $0x294] sm:$0xf0]  ;;  %v3074_v16 = vld [vmem:[#allocation6 + $0x2f0] sm:$0xf] }
  0x43   :  { %668 = vmatpush.bf16.msra.mxu1 %v3019_v45  ;;  %706 = vmatpush.bf16.msra.mxu3 %v2927_v46  ;;  %v2991_v15 = vor.u32 %v4032_v9, %v2990_v8  ;;  %v4053_v17 = vld [vmem:[#allocation6 + $0x2f8] sm:$0xf0]  ;;  %v4063_v18 = vld [vmem:[#allocation6 + $0x34c] sm:$0xf]  ;;  %v2978_v19 = vld [vmem:[#allocation6 + $0x230] sm:$0xf]  ;;  %v3023_v22 = vor.u32 %v4039_v13, %v3020_v14 }
  0x44   :  { %3149 = vmatmul.msk.bf16.gmra.mxu2 %vm625_vm1, %v4510_v49  ;;  %v4029_v20 = vld [vmem:[#allocation6 + $0x238] sm:$0xf0]  ;;  %v3116_v21 = vld [vmem:[#allocation6 + $0x354] sm:$0xf0]  ;;  %v3146_v24 = vld [vmem:[#allocation6 + $0x380] sm:$0xf]  ;;  %v3075_v25 = vor.u32 %v4053_v17, %v3074_v16 }
  0x45   :  { %722 = vmatpush.bf16.msrb.mxu2 %v3059_v41  ;;  %650 = vmatmul.bf16.vlgmr.msra.gmra.mxu0 %v4512_v54  ;;  %v3119_v23 = vor.u32 %v4063_v18, %v3116_v21  ;;  %v2910_v26 = vld [vmem:[#allocation3 + $0x18] sm:$0xf]  ;;  %v3956_v27 = vld [vmem:[#allocation3 + $0x20] sm:$0xf0]  ;;  %v3062_v28 = vld [vmem:[#allocation6 + $0x2d8] sm:$0xf]  ;;  %v2979_v30 = vor.u32 %v4029_v20, %v2978_v19 }
  0x46   :  { %669 = vmatmul.bf16.vlgmr.msra.gmra.mxu1 %v4514_v59  ;;  %707 = vmatmul.bf16.vlgmr.msra.gmra.mxu3 %v4512_v54  ;;  %v4071_v29 = vld [vmem:[#allocation6 + $0x388] sm:$0x30]  ;;  %v4050_v31 = vld [vmem:[#allocation6 + $0x2e0] sm:$0xf0]  ;;  %v3240_v33 = vld [vmem:[#allocation6 + $0xa8] sm:$0xf]  ;;  %v4523_v46 = vor.u32 %v3956_v27, %v2910_v26 }
  0x47   :  { %775 = vmatpush.bf16.msrb.mxu3 %v3111_v50  ;;  %756 = vmatpush.bf16.msrb.mxu1 %v3015_v55  ;;  %v3147_v32 = vor.u32 %v4071_v29, %v3146_v24  ;;  %v3980_v34 = vld [vmem:[#allocation6 + $0xb0] sm:$0xf0]  ;;  %v3955_v35 = vld [vmem:[#allocation3 + $0x1c] sm:$0xf]  ;;  %v2966_v36 = vld [vmem:[#allocation6 + $0x218] sm:$0xf]  ;;  %v3063_v42 = vor.u32 %v4050_v31, %v3062_v28 }
  0x48   :  { %742 = vmatpush.bf16.msrb.mxu0 %v637_v1  ;;  %v4026_v37 = vld [vmem:[#allocation6 + $0x220] sm:$0xf0]  ;;  %v3241_v38 = vor.u32 %v3980_v34, %v3240_v33  ;;  %v2912_v39 = vld [vmem:[#allocation3 + $0x24] sm:$0xf0]  ;;  %v3228_v41 = vld [vmem:[#allocation6 + $0x90] sm:$0xf] }
  0x49   :  { %723 = vmatpush.bf16.msrb.mxu2 %v3047_v62  ;;  %v640_v40 = vsel %vm632_vm0, %v3147_v32, 0  ;;  %v3977_v43 = vld [vmem:[#allocation6 + $0x98] sm:$0xf0]  ;;  %v3134_v44 = vld [vmem:[#allocation6 + $0x368] sm:$0xf]  ;;  %v2967_v47 = vor.u32 %v4026_v37, %v2966_v36  ;;  %v4525_v51 = vor.u32 %v3955_v35, %v2912_v39  ;;  %s2883_s11 = sshll.u32 %s4903_s10, 4  ;;  %s2884_s11 = int_to_ptr.hbm [resolvable:$true] %s2883_s11 }
  0x4a   :  { %v4068_v45 = vld [vmem:[#allocation6 + $0x370] sm:$0xf0]  ;;  %v3050_v48 = vld [vmem:[#allocation6 + $0x2c0] sm:$0xf]  ;;  %v4047_v50 = vld [vmem:[#allocation6 + $0x2c8] sm:$0xf0]  ;;  %v3229_v57 = vor.u32 %v3977_v43, %v3228_v41 }
  0x4b   :  { %776 = vmatpush.bf16.msrb.mxu3 %v3099_v2  ;;  %757 = vmatpush.bf16.msrb.mxu1 %v3003_v5  ;;  %v2954_v52 = vld [vmem:[#allocation6 + $0x200] sm:$0xf]  ;;  %v4023_v53 = vld [vmem:[#allocation6 + $0x208] sm:$0xf0]  ;;  %v3038_v55 = vld [vmem:[#allocation6 + $0x2a8] sm:$0xf]  ;;  %v3135_v58 = vor.u32 %v4068_v45, %v3134_v44  ;;  %v3051_v61 = vor.u32 %v4047_v50, %v3050_v48 }
  0x4c   :  { %743 = vmatpush.bf16.msrb.mxu0 %v3131_v11  ;;  %v3216_v60 = vld [vmem:[#allocation6 + $0x78] sm:$0xf]  ;;  %v3974_v62 = vld [vmem:[#allocation6 + $0x80] sm:$0xf0]  ;;  %v3122_v63 = vld [vmem:[#allocation6 + $0x350] sm:$0xf]  ;;  %v2955_v1 = vor.u32 %v4023_v53, %v2954_v52 }
  0x4d   :  { %724 = vmatpush.bf16.msrb.mxu2 %v3035_v10  ;;  %v4065_v0 = vld [vmem:[#allocation6 + $0x358] sm:$0xf0]  ;;  %v4044_v2 = vld [vmem:[#allocation6 + $0x2b0] sm:$0xf0]  ;;  %v3979_v3 = vld [vmem:[#allocation6 + $0xac] sm:$0xf]  ;;  %v3217_v9 = vor.u32 %v3974_v62, %v3216_v60 }
  0x4e   :  { %v3242_v4 = vld [vmem:[#allocation6 + $0xb4] sm:$0xf0]  ;;  %v2942_v5 = vld [vmem:[#allocation6 + $0x1e8] sm:$0xf]  ;;  %v4020_v6 = vld [vmem:[#allocation6 + $0x1f0] sm:$0xf0]  ;;  %v3123_v10 = vor.u32 %v4065_v0, %v3122_v63  ;;  %v3039_v11 = vor.u32 %v4044_v2, %v3038_v55 }
  0x4f   :  { %777 = vmatpush.bf16.msrb.mxu3 %v3087_v12  ;;  %758 = vmatpush.bf16.msrb.mxu1 %v2991_v15  ;;  %v3372_v7 = vld [vmem:[#allocation6 + $0x1b0] sm:$0xf]  ;;  %v4013_v8 = vld [vmem:[#allocation6 + $0x1b8] sm:$0x30]  ;;  %v3204_v13 = vld [vmem:[#allocation6 + $0x60] sm:$0xf]  ;;  %v3245_v15 = vor.u32 %v3979_v3, %v3242_v4  ;;  %v2943_v16 = vor.u32 %v4020_v6, %v2942_v5 }
  0x50   :  { %744 = vmatpush.bf16.msrb.mxu0 %v3119_v23  ;;  %v3026_v12 = vld [vmem:[#allocation6 + $0x290] sm:$0xf]  ;;  %v3971_v14 = vld [vmem:[#allocation6 + $0x68] sm:$0xf0]  ;;  %v4041_v17 = vld [vmem:[#allocation6 + $0x298] sm:$0xf0] }
  0x51   :  { %725 = vmatpush.bf16.msrb.mxu2 %v3023_v22  ;;  %v3976_v18 = vld [vmem:[#allocation6 + $0x94] sm:$0xf]  ;;  %v3230_v19 = vld [vmem:[#allocation6 + $0x9c] sm:$0xf0]  ;;  %v2930_v20 = vld [vmem:[#allocation6 + $0x1d0] sm:$0xf]  ;;  %v3373_v22 = vor.u32 %v4013_v8, %v3372_v7  ;;  %v3027_v27 = vor.u32 %v4041_v17, %v3026_v12 }
  0x52   :  { %v4017_v21 = vld [vmem:[#allocation6 + $0x1d8] sm:$0xf0]  ;;  %v3336_v23 = vld [vmem:[#allocation6 + $0x168] sm:$0xf]  ;;  %v4004_v24 = vld [vmem:[#allocation6 + $0x170] sm:$0xf0]  ;;  %v3233_v29 = vor.u32 %v3976_v18, %v3230_v19 }
  0x53   :  { %778 = vmatpush.bf16.msrb.mxu3 %v3075_v25  ;;  %759 = vmatpush.bf16.msrb.mxu1 %v2979_v30  ;;  %v3205_v25 = vor.u32 %v3971_v14, %v3204_v13  ;;  %v3192_v26 = vld [vmem:[#allocation6 + $0x48] sm:$0xf]  ;;  %v3968_v28 = vld [vmem:[#allocation6 + $0x50] sm:$0xf0]  ;;  %v2931_v30 = vor.u32 %v4017_v21, %v2930_v20  ;;  %v1142_v31 = vsel %vm632_vm0, %v3373_v22, 0  ;;  %v3337_v32 = vor.u32 %v4004_v24, %v3336_v23 }
  0x54   :  { %1150 = vmatpush.bf16.msra.mxu0 %v3241_v38  ;;  %726 = vmatmul.bf16.vlgmr.msrb.gmra.mxu2 %v4514_v59  ;;  %v3360_v33 = vld [vmem:[#allocation6 + $0x198] sm:$0xf]  ;;  %v4010_v34 = vld [vmem:[#allocation6 + $0x1a0] sm:$0xf0]  ;;  %v3324_v35 = vld [vmem:[#allocation6 + $0x150] sm:$0xf]  ;;  %v3193_v36 = vor.u32 %v3968_v28, %v3192_v26 }
  0x55   :  { %799 = vmatpush.bf16.msra.mxu2 %v640_v40  ;;  %655 = vmatmul.bf16.gmra.mxu0 %v4523_v46  ;;  %v4001_v37 = vld [vmem:[#allocation6 + $0x158] sm:$0xf0]  ;;  %v3180_v38 = vld [vmem:[#allocation6 + $0x30] sm:$0xf]  ;;  %v3361_v40 = vor.u32 %v4010_v34, %v3360_v33  ;;  %v3348_v43 = vld [vmem:[#allocation6 + $0x180] sm:$0xf] }
  0x56   :  { %674 = vmatmul.bf16.gmra.mxu1 %v4525_v51  ;;  %712 = vmatmul.bf16.gmra.mxu3 %v4523_v46  ;;  %v3965_v39 = vld [vmem:[#allocation6 + $0x38] sm:$0xf0]  ;;  %v4007_v44 = vld [vmem:[#allocation6 + $0x188] sm:$0xf0]  ;;  %v3325_v45 = vor.u32 %v4001_v37, %v3324_v35  ;;  %v3998_v48 = vld [vmem:[#allocation6 + $0x140] sm:$0xf0] }
  0x57   :  { %779 = vmatpush.bf16.msrb.mxu3 %v3063_v42  ;;  %760 = vmatpush.bf16.msrb.mxu1 %v2967_v47  ;;  %v3973_v41 = vld [vmem:[#allocation6 + $0x7c] sm:$0xf]  ;;  %v3218_v42 = vld [vmem:[#allocation6 + $0x84] sm:$0xf0]  ;;  %v3312_v47 = vld [vmem:[#allocation6 + $0x138] sm:$0xf]  ;;  %v3181_v50 = vor.u32 %v3965_v39, %v3180_v38 }
  0x58   :  { %1151 = vmatpush.bf16.msra.mxu0 %v3229_v57  ;;  %v3221_v52 = vor.u32 %v3973_v41, %v3218_v42  ;;  %v3168_v53 = vld [vmem:[#allocation6 + $0x18] sm:$0xf]  ;;  %v3962_v55 = vld [vmem:[#allocation6 + $0x20] sm:$0xf0]  ;;  %v3206_v60 = vld [vmem:[#allocation6 + $0x6c] sm:$0xf0] }
  0x59   :  { %800 = vmatpush.bf16.msra.mxu2 %v3135_v58  ;;  %v3970_v57 = vld [vmem:[#allocation6 + $0x64] sm:$0xf]  ;;  %v3349_v58 = vor.u32 %v4007_v44, %v3348_v43  ;;  %v3981_v62 = vld [vmem:[#allocation6 + $0xb8] sm:$0xf0]  ;;  %v3300_v63 = vld [vmem:[#allocation6 + $0x120] sm:$0xf]  ;;  %v3169_v3 = vor.u32 %v3962_v55, %v3168_v53 }
  0x5a   :  { %v3995_v2 = vld [vmem:[#allocation6 + $0x128] sm:$0xf0]  ;;  %v3156_v4 = vld [vmem:[#allocation6] sm:$0xf]  ;;  %v3236_v5 = vld [vmem:[#allocation6 + $0x98] sm:$0xf]  ;;  %v3209_v6 = vor.u32 %v3970_v57, %v3206_v60 }
  0x5b   :  { %780 = vmatpush.bf16.msrb.mxu3 %v3051_v61  ;;  %761 = vmatpush.bf16.msrb.mxu1 %v2955_v1  ;;  %v3248_v61 = vld [vmem:[#allocation6 + $0xb0] sm:$0xf]  ;;  %v3313_v1 = vor.u32 %v3998_v48, %v3312_v47  ;;  %v3959_v7 = vld [vmem:[#allocation6 + $0x8] sm:$0xf0]  ;;  %v3338_v12 = vld [vmem:[#allocation6 + $0x174] sm:$0xf0]  ;;  %v3301_v14 = vor.u32 %v3995_v2, %v3300_v63 }
  0x5c   :  { %1152 = vmatpush.bf16.msra.mxu0 %v3217_v9  ;;  %v3249_v0 = vor.u32 %v3981_v62, %v3248_v61  ;;  %v3967_v8 = vld [vmem:[#allocation6 + $0x4c] sm:$0xf]  ;;  %v3978_v9 = vld [vmem:[#allocation6 + $0xa0] sm:$0xf0]  ;;  %v3288_v18 = vld [vmem:[#allocation6 + $0x108] sm:$0xf] }
  0x5d   :  { %801 = vmatpush.bf16.msra.mxu2 %v3123_v10  ;;  %v3194_v10 = vld [vmem:[#allocation6 + $0x54] sm:$0xf0]  ;;  %v3237_v13 = vor.u32 %v3978_v9, %v3236_v5  ;;  %v3975_v17 = vld [vmem:[#allocation6 + $0x88] sm:$0xf0]  ;;  %v3992_v19 = vld [vmem:[#allocation6 + $0x110] sm:$0xf0] }
  0x5e   :  { %v3197_v20 = vor.u32 %v3967_v8, %v3194_v10  ;;  %v4000_v22 = vld [vmem:[#allocation6 + $0x154] sm:$0xf]  ;;  %v3326_v23 = vld [vmem:[#allocation6 + $0x15c] sm:$0xf0]  ;;  %v3276_v28 = vld [vmem:[#allocation6 + $0xf0] sm:$0xf] }
  0x5f   :  { %781 = vmatpush.bf16.msrb.mxu3 %v3039_v11  ;;  %762 = vmatpush.bf16.msrb.mxu1 %v2943_v16  ;;  %v4003_v11 = vld [vmem:[#allocation6 + $0x16c] sm:$0xf]  ;;  %v3224_v16 = vld [vmem:[#allocation6 + $0x80] sm:$0xf]  ;;  %v3964_v24 = vld [vmem:[#allocation6 + $0x34] sm:$0xf] }
  0x60   :  { %1153 = vmatpush.bf16.msra.mxu0 %v3205_v25  ;;  %v3341_v21 = vor.u32 %v4003_v11, %v3338_v12  ;;  %v3182_v25 = vld [vmem:[#allocation6 + $0x3c] sm:$0xf0]  ;;  %v3225_v26 = vor.u32 %v3975_v17, %v3224_v16  ;;  %v3997_v34 = vld [vmem:[#allocation6 + $0x13c] sm:$0xf]  ;;  %v3314_v35 = vld [vmem:[#allocation6 + $0x144] sm:$0xf0] }
  0x61   :  { %1207 = vmatpush.bf16.msrb.mxu2 %v3245_v15  ;;  %v3157_v15 = vor.u32 %v3959_v7, %v3156_v4  ;;  %v3185_v33 = vor.u32 %v3964_v24, %v3182_v25  ;;  %v3170_v37 = vld [vmem:[#allocation6 + $0x24] sm:$0xf0]  ;;  %v3264_v39 = vld [vmem:[#allocation6 + $0xd8] sm:$0xf]  ;;  %v3986_v41 = vld [vmem:[#allocation6 + $0xe0] sm:$0xf0]  ;;  %v3317_v43 = vor.u32 %v3997_v34, %v3314_v35 }
  0x62   :  { %v4012_v42 = vld [vmem:[#allocation6 + $0x1b4] sm:$0xf]  ;;  %v3994_v44 = vld [vmem:[#allocation6 + $0x124] sm:$0xf]  ;;  %v3302_v47 = vld [vmem:[#allocation6 + $0x12c] sm:$0xf0]  ;;  %v3265_v57 = vor.u32 %v3986_v41, %v3264_v39 }
  0x63   :  { %782 = vmatpush.bf16.msrb.mxu3 %v3027_v27  ;;  %763 = vmatpush.bf16.msrb.mxu1 %v2931_v30  ;;  %v3289_v27 = vor.u32 %v3992_v19, %v3288_v18  ;;  %v3329_v30 = vor.u32 %v4000_v22, %v3326_v23  ;;  %v3200_v48 = vld [vmem:[#allocation6 + $0x50] sm:$0xf]  ;;  %v3958_v53 = vld [vmem:[#allocation6 + $0x4] sm:$0xf]  ;;  %v4005_v61 = vld [vmem:[#allocation6 + $0x178] sm:$0xf0] }
  0x64   :  { %1154 = vmatpush.bf16.msra.mxu0 %v3193_v36  ;;  %731 = vmatmul.bf16.gmra.mxu2 %v4525_v51  ;;  %v3961_v36 = vld [vmem:[#allocation6 + $0x1c] sm:$0xf]  ;;  %v3158_v55 = vld [vmem:[#allocation6 + $0xc] sm:$0xf0]  ;;  %v3983_v63 = vld [vmem:[#allocation6 + $0xc8] sm:$0xf0] }
  0x65   :  { %1208 = vmatpush.bf16.msrb.mxu2 %v3233_v29  ;;  %3150 = vmatmul.msk.bf16.vlgmr.msrb.gmra.mxu0 %vm625_vm1, %v4506_v56  ;;  %v3989_v29 = vld [vmem:[#allocation6 + $0xf8] sm:$0xf0]  ;;  %v3344_v60 = vld [vmem:[#allocation6 + $0x170] sm:$0xf]  ;;  %v3966_v2 = vld [vmem:[#allocation6 + $0x40] sm:$0xf0]  ;;  %v3161_v4 = vor.u32 %v3958_v53, %v3158_v55 }
  0x66   :  { %764 = vmatmul.bf16.vlgmr.msrb.gmra.mxu1 %v4512_v54  ;;  %783 = vmatmul.bf16.vlgmr.msrb.gmra.mxu3 %v4514_v59  ;;  %v3277_v38 = vor.u32 %v3989_v29, %v3276_v28  ;;  %v3991_v5 = vld [vmem:[#allocation6 + $0x10c] sm:$0xf]  ;;  %v3345_v7 = vor.u32 %v4005_v61, %v3344_v60  ;;  %v3332_v9 = vld [vmem:[#allocation6 + $0x158] sm:$0xf]  ;;  %v4002_v10 = vld [vmem:[#allocation6 + $0x160] sm:$0xf0] }
  0x67   :  { %1193 = vmatpush.bf16.msra.mxu3 %v1142_v31  ;;  %1169 = vmatpush.bf16.msra.mxu1 %v3337_v32  ;;  %v3212_v31 = vld [vmem:[#allocation6 + $0x68] sm:$0xf]  ;;  %v3972_v32 = vld [vmem:[#allocation6 + $0x70] sm:$0xf0]  ;;  %v4009_v16 = vld [vmem:[#allocation6 + $0x19c] sm:$0xf]  ;;  %v3333_v18 = vor.u32 %v4002_v10, %v3332_v9 }
  0x68   :  { %1155 = vmatpush.bf16.msra.mxu0 %v3181_v50  ;;  %v3969_v50 = vld [vmem:[#allocation6 + $0x58] sm:$0xf0]  ;;  %v3362_v17 = vld [vmem:[#allocation6 + $0x1a4] sm:$0xf0]  ;;  %v3988_v19 = vld [vmem:[#allocation6 + $0xf4] sm:$0xf] }
  0x69   :  { %1209 = vmatpush.bf16.msrb.mxu2 %v3221_v52  ;;  %v3374_v52 = vld [vmem:[#allocation6 + $0x1bc] sm:$0x30]  ;;  %v3201_v62 = vor.u32 %v3969_v50, %v3200_v48  ;;  %v3365_v22 = vor.u32 %v4009_v16, %v3362_v17  ;;  %v3999_v24 = vld [vmem:[#allocation6 + $0x148] sm:$0xf0]  ;;  %v4006_v25 = vld [vmem:[#allocation6 + $0x184] sm:$0xf] }
  0x6a   :  { %v3320_v23 = vld [vmem:[#allocation6 + $0x140] sm:$0xf]  ;;  %v3960_v28 = vld [vmem:[#allocation6 + $0x10] sm:$0xf0]  ;;  %v3308_v34 = vld [vmem:[#allocation6 + $0x128] sm:$0xf] }
  0x6b   :  { %1194 = vmatpush.bf16.msra.mxu3 %v3361_v40  ;;  %1170 = vmatpush.bf16.msra.mxu1 %v3325_v45  ;;  %v3213_v40 = vor.u32 %v3972_v32, %v3212_v31  ;;  %v3173_v45 = vor.u32 %v3961_v36, %v3170_v37  ;;  %v3985_v31 = vld [vmem:[#allocation6 + $0xdc] sm:$0xf]  ;;  %v3266_v32 = vld [vmem:[#allocation6 + $0xe4] sm:$0xf0]  ;;  %v3996_v35 = vld [vmem:[#allocation6 + $0x130] sm:$0xf0] }
  0x6c   :  { %1156 = vmatpush.bf16.msra.mxu0 %v3169_v3  ;;  %v3377_v3 = vor.u32 %v4012_v42, %v3374_v52  ;;  %v3570_v37 = vld [vmem:[#allocation6 + $0x4f8] sm:$0xf]  ;;  %v3254_v41 = vld [vmem:[#allocation6 + $0xcc] sm:$0xf0]  ;;  %v3309_v48 = vor.u32 %v3996_v35, %v3308_v34  ;;  %v4014_v53 = vld [vmem:[#allocation6 + $0x1c0] sm:$0x30] }
  0x6d   :  { %1210 = vmatpush.bf16.msrb.mxu2 %v3209_v6  ;;  %v3290_v6 = vld [vmem:[#allocation6 + $0x114] sm:$0xf0]  ;;  %v3296_v42 = vld [vmem:[#allocation6 + $0x110] sm:$0xf]  ;;  %v3558_v55 = vld [vmem:[#allocation6 + $0x4e0] sm:$0xf] }
  0x6e   :  { %v3293_v12 = vor.u32 %v3991_v5, %v3290_v6  ;;  %v3474_v39 = vld [vmem:[#allocation6 + $0x438] sm:$0xf]  ;;  %v4091_v60 = vld [vmem:[#allocation6 + $0x428] sm:$0xf0]  ;;  %v4088_v5 = vld [vmem:[#allocation6 + $0x410] sm:$0xf0] }
  0x6f   :  { %1195 = vmatpush.bf16.msra.mxu3 %v3349_v58  ;;  %1171 = vmatpush.bf16.msra.mxu1 %v3313_v1  ;;  %v3252_v58 = vld [vmem:[#allocation6 + $0xc0] sm:$0xf]  ;;  %v3188_v1 = vld [vmem:[#allocation6 + $0x38] sm:$0xf]  ;;  %v3438_v17 = vld [vmem:[#allocation6 + $0x3f0] sm:$0xf] }
  0x70   :  { %1157 = vmatpush.bf16.msra.mxu0 %v3157_v15  ;;  %v3253_v8 = vor.u32 %v3983_v63, %v3252_v58  ;;  %v3189_v11 = vor.u32 %v3966_v2, %v3188_v1  ;;  %v1145_v15 = vsel %vm632_vm0, %v3377_v3, 0  ;;  %v3380_v52 = vld [vmem:[#allocation6 + $0x1b8] sm:$0xf]  ;;  %v3462_v58 = vld [vmem:[#allocation6 + $0x420] sm:$0xf]  ;;  %vm2874_vm8 = vcmask 8192  }
  0x71   :  { %1211 = vmatpush.bf16.msrb.mxu2 %v3197_v20  ;;  %v3278_v20 = vld [vmem:[#allocation6 + $0xfc] sm:$0xf0]  ;;  %v3381_v61 = vor.u32 %v4014_v53, %v3380_v52  ;;  %v3463_v63 = vor.u32 %v4091_v60, %v3462_v58  ;;  %v4112_v1 = vld [vmem:[#allocation6 + $0x4d0] sm:$0xf0]  ;;  %v3450_v2 = vld [vmem:[#allocation6 + $0x408] sm:$0xf] }
  0x72   :  { %v3281_v29 = vor.u32 %v3988_v19, %v3278_v20  ;;  %v3284_v6 = vld [vmem:[#allocation6 + $0xf8] sm:$0xf]  ;;  %v3451_v10 = vor.u32 %v4088_v5, %v3450_v2  ;;  %v3260_v20 = vld [vmem:[#allocation6 + $0xc8] sm:$0xf]  ;;  %v4103_v34 = vld [vmem:[#allocation6 + $0x488] sm:$0xf0] }
  0x73   :  { %1264 = vmatpush.bf16.msrb.mxu3 %v3249_v0  ;;  %1172 = vmatpush.bf16.msra.mxu1 %v3301_v14  ;;  %v3305_v0 = vor.u32 %v3994_v44, %v3302_v47  ;;  %v3963_v14 = vld [vmem:[#allocation6 + $0x28] sm:$0xf0]  ;;  %v3269_v47 = vor.u32 %v3985_v31, %v3266_v32  ;;  %v3414_v35 = vld [vmem:[#allocation6 + $0x3c0] sm:$0xf]  ;;  %v4097_v52 = vld [vmem:[#allocation6 + $0x458] sm:$0xf0] }
  0x74   :  { %1226 = vmatpush.bf16.msrb.mxu0 %v3341_v21  ;;  %3152 = vmatmul.msk.bf16.vlgmr.msra.gmra.mxu2 %vm625_vm1, %v4506_v56  ;;  %v3606_v60 = vld [vmem:[#allocation6 + $0x540] sm:$0xf]  ;;  %v3572_v2 = vld [vmem:[#allocation6 + $0x504] sm:$0xf0] }
  0x75   :  { %3151 = vmatmul.msk.bf16.gmra.mxu0 %vm625_vm1, %v4510_v49  ;;  %1212 = vmatpush.bf16.msrb.mxu2 %v3185_v33 }
  0x76   :  { %769 = vmatmul.bf16.gmra.mxu1 %v4523_v46  ;;  %788 = vmatmul.bf16.gmra.mxu3 %v4525_v51 }
  0x77   :  { %1265 = vmatpush.bf16.msrb.mxu3 %v3237_v13  ;;  %1173 = vmatpush.bf16.msra.mxu1 %v3289_v27  ;;  %v3176_v13 = vld [vmem:[#allocation6 + $0x20] sm:$0xf]  ;;  %v3164_v27 = vld [vmem:[#allocation6 + $0x8] sm:$0xf] }
  0x78   :  { %1227 = vmatpush.bf16.msrb.mxu0 %v3329_v30  ;;  %v3177_v21 = vor.u32 %v3963_v14, %v3176_v13  ;;  %v3321_v30 = vor.u32 %v3999_v24, %v3320_v23  ;;  %v3165_v36 = vor.u32 %v3960_v28, %v3164_v27  ;;  %v3272_v14 = vld [vmem:[#allocation6 + $0xe0] sm:$0xf]  ;;  %v4011_v24 = vld [vmem:[#allocation6 + $0x1a8] sm:$0xf0]  ;;  %v4106_v27 = vld [vmem:[#allocation6 + $0x4a0] sm:$0xf0] }
  0x79   :  { %1213 = vmatpush.bf16.msrb.mxu2 %v3173_v45  ;;  %v4094_v45 = vld [vmem:[#allocation6 + $0x440] sm:$0xf0]  ;;  %v3368_v23 = vld [vmem:[#allocation6 + $0x1a0] sm:$0xf]  ;;  %v3426_v28 = vld [vmem:[#allocation6 + $0x3d8] sm:$0xf] }
  0x7a   :  { %v3475_v50 = vor.u32 %v4094_v45, %v3474_v39  ;;  %v3498_v39 = vld [vmem:[#allocation6 + $0x468] sm:$0xf] }
  0x7b   :  { %1266 = vmatpush.bf16.msrb.mxu3 %v3225_v26  ;;  %1174 = vmatpush.bf16.msra.mxu1 %v3277_v38  ;;  %v3350_v26 = vld [vmem:[#allocation6 + $0x18c] sm:$0xf0]  ;;  %v4118_v38 = vld [vmem:[#allocation6 + $0x500] sm:$0xf0]  ;;  %v3356_v45 = vld [vmem:[#allocation6 + $0x188] sm:$0xf] }
  0x7c   :  { %1228 = vmatpush.bf16.msrb.mxu0 %v3317_v43  ;;  %v3353_v33 = vor.u32 %v4006_v25, %v3350_v26  ;;  %v3993_v43 = vld [vmem:[#allocation6 + $0x118] sm:$0xf0]  ;;  %v3571_v44 = vor.u32 %v4118_v38, %v3570_v37  ;;  %v3369_v25 = vor.u32 %v4011_v24, %v3368_v23  ;;  %v3522_v26 = vld [vmem:[#allocation6 + $0x498] sm:$0xf]  ;;  %v3582_v24 = vld [vmem:[#allocation6 + $0x510] sm:$0xf] }
  0x7d   :  { %1214 = vmatpush.bf16.msrb.mxu2 %v3161_v4  ;;  %v3297_v4 = vor.u32 %v3993_v43, %v3296_v42  ;;  %v4076_v43 = vld [vmem:[#allocation6 + $0x3b0] sm:$0xf0]  ;;  %v3548_v23 = vld [vmem:[#allocation6 + $0x4d4] sm:$0xf0] }
  0x7f   :  { %1267 = vmatpush.bf16.msrb.mxu3 %v3213_v40  ;;  %1175 = vmatpush.bf16.msra.mxu1 %v3265_v57  ;;  %v3982_v40 = vld [vmem:[#allocation6 + $0xc4] sm:$0xf]  ;;  %v4115_v57 = vld [vmem:[#allocation6 + $0x4e8] sm:$0xf0] }
  0x80   :  { %1229 = vmatpush.bf16.msrb.mxu0 %v3305_v0  ;;  %v3546_v0 = vld [vmem:[#allocation6 + $0x4c8] sm:$0xf]  ;;  %v3257_v3 = vor.u32 %v3982_v40, %v3254_v41  ;;  %v4100_v40 = vld [vmem:[#allocation6 + $0x470] sm:$0xf0] }
  0x81   :  { %1283 = vmatpush.bf16.msra.mxu2 %v3345_v7  ;;  %v3990_v7 = vld [vmem:[#allocation6 + $0x100] sm:$0xf0]  ;;  %v3547_v9 = vor.u32 %v4112_v1, %v3546_v0  ;;  %v3402_v41 = vld [vmem:[#allocation6 + $0x3a8] sm:$0xf]  ;;  %v3499_v42 = vor.u32 %v4100_v40, %v3498_v39  ;;  %v4117_v1 = vld [vmem:[#allocation6 + $0x4fc] sm:$0xf] }
  0x82   :  { %v3285_v13 = vor.u32 %v3990_v7, %v3284_v6  ;;  %v3476_v0 = vld [vmem:[#allocation6 + $0x444] sm:$0xf0]  ;;  %v4126_v6 = vld [vmem:[#allocation6 + $0x544] sm:$0xf]  ;;  %v3608_v7 = vld [vmem:[#allocation6 + $0x54c] sm:$0x30] }
  0x83   :  { %1268 = vmatpush.bf16.msrb.mxu3 %v3201_v62  ;;  %1176 = vmatpush.bf16.msra.mxu1 %v3253_v8  ;;  %v3559_v62 = vor.u32 %v4115_v57, %v3558_v55  ;;  %v1148_v8 = vsel %vm632_vm0, %v3381_v61, 0  ;;  %v3390_v55 = vld [vmem:[#allocation6 + $0x390] sm:$0xf]  ;;  %v4073_v57 = vld [vmem:[#allocation6 + $0x398] sm:$0xf0] }
  0x84   :  { %1230 = vmatpush.bf16.msrb.mxu0 %v3293_v12  ;;  %3153 = vmatmul.msk.bf16.gmra.mxu2 %vm625_vm1, %v4510_v49  ;;  %v4109_v12 = vld [vmem:[#allocation6 + $0x4b8] sm:$0xf0]  ;;  %v3391_v58 = vor.u32 %v4073_v57, %v3390_v55  ;;  %v4127_v61 = vld [vmem:[#allocation6 + $0x548] sm:$0x30]  ;;  %v3416_v55 = vld [vmem:[#allocation6 + $0x3cc] sm:$0xf0] }
  0x85   :  { %1284 = vmatpush.bf16.msra.mxu2 %v3333_v18  ;;  %1158 = vmatmul.bf16.vlgmr.msra.gmra.mxu0 %v4512_v54  ;;  %v4085_v18 = vld [vmem:[#allocation6 + $0x3f8] sm:$0xf0]  ;;  %v4102_v57 = vld [vmem:[#allocation6 + $0x484] sm:$0xf] }
  0x86   :  { %1177 = vmatmul.bf16.vlgmr.msra.gmra.mxu1 %v4514_v59  ;;  %3382 = vmatmul.msk.bf16.vlgmr.msra.gmra.mxu3 %vm625_vm1, %v4506_v56  ;;  %v4081_v40 = vld [vmem:[#allocation6 + $0x3dc] sm:$0xf] }
  0x87   :  { %1269 = vmatpush.bf16.msrb.mxu3 %v3189_v11  ;;  %1250 = vmatpush.bf16.msrb.mxu1 %v1145_v15  ;;  %v3534_v11 = vld [vmem:[#allocation6 + $0x4b0] sm:$0xf]  ;;  %v3987_v15 = vld [vmem:[#allocation6 + $0xe8] sm:$0xf0] }
  0x88   :  { %1231 = vmatpush.bf16.msrb.mxu0 %v3281_v29  ;;  %v3535_v16 = vor.u32 %v4109_v12, %v3534_v11  ;;  %v3273_v19 = vor.u32 %v3987_v15, %v3272_v14  ;;  %v3523_v29 = vor.u32 %v4106_v27, %v3522_v26  ;;  %v4114_v11 = vld [vmem:[#allocation6 + $0x4e4] sm:$0xf]  ;;  %v3594_v14 = vld [vmem:[#allocation6 + $0x528] sm:$0xf]  ;;  %v4124_v15 = vld [vmem:[#allocation6 + $0x530] sm:$0xf0] }
  0x89   :  { %1285 = vmatpush.bf16.msra.mxu2 %v3321_v30  ;;  %v4082_v30 = vld [vmem:[#allocation6 + $0x3e0] sm:$0xf0] }
  0x8a   :  { %v3427_v32 = vor.u32 %v4082_v30, %v3426_v28  ;;  %v4123_v28 = vld [vmem:[#allocation6 + $0x52c] sm:$0xf]  ;;  %v4084_v30 = vld [vmem:[#allocation6 + $0x3f4] sm:$0xf] }
  0x8b   :  { %1270 = vmatpush.bf16.msrb.mxu3 %v3177_v21  ;;  %1251 = vmatpush.bf16.msrb.mxu1 %v3365_v22  ;;  %v3439_v21 = vor.u32 %v4085_v18, %v3438_v17  ;;  %v3984_v22 = vld [vmem:[#allocation6 + $0xd0] sm:$0xf0]  ;;  %v3595_v18 = vor.u32 %v4124_v15, %v3594_v14  ;;  %v3392_v15 = vld [vmem:[#allocation6 + $0x39c] sm:$0xf0] }
  0x8c   :  { %1232 = vmatpush.bf16.msrb.mxu0 %v3269_v47  ;;  %v3261_v31 = vor.u32 %v3984_v22, %v3260_v20  ;;  %v4008_v47 = vld [vmem:[#allocation6 + $0x190] sm:$0xf0]  ;;  %v3452_v20 = vld [vmem:[#allocation6 + $0x414] sm:$0xf0] }
  0x8d   :  { %1286 = vmatpush.bf16.msra.mxu2 %v3309_v48  ;;  %v3486_v48 = vld [vmem:[#allocation6 + $0x450] sm:$0xf]  ;;  %v4072_v14 = vld [vmem:[#allocation6 + $0x394] sm:$0xf] }
  0x8e   :  { %v3487_v53 = vor.u32 %v4097_v52, %v3486_v48 }
  0x8f   :  { %1252 = vmatpush.bf16.msrb.mxu1 %v3353_v33  ;;  %1271 = vmatpush.bf16.msrb.mxu3 %v3165_v36  ;;  %v3510_v33 = vld [vmem:[#allocation6 + $0x480] sm:$0xf]  ;;  %v4079_v36 = vld [vmem:[#allocation6 + $0x3c8] sm:$0xf0] }
  0x90   :  { %1233 = vmatpush.bf16.msrb.mxu0 %v3257_v3  ;;  %v3511_v37 = vor.u32 %v4103_v34, %v3510_v33  ;;  %v3415_v38 = vor.u32 %v4079_v36, %v3414_v35  ;;  %v4108_v33 = vld [vmem:[#allocation6 + $0x4b4] sm:$0xf]  ;;  %v3536_v34 = vld [vmem:[#allocation6 + $0x4bc] sm:$0xf0] }
  0x91   :  { %1287 = vmatpush.bf16.msra.mxu2 %v3297_v4  ;;  %v3575_v4 = vor.u32 %v4117_v1, %v3572_v2  ;;  %v3539_v36 = vor.u32 %v4108_v33, %v3536_v34  ;;  %v4075_v1 = vld [vmem:[#allocation6 + $0x3ac] sm:$0xf]  ;;  %v3404_v2 = vld [vmem:[#allocation6 + $0x3b4] sm:$0xf0]  ;;  %v4080_v33 = vld [vmem:[#allocation6 + $0x3d0] sm:$0xf0] }
  0x93   :  { %1727 = vmatpush.bf16.msra.mxu3 %v3571_v44  ;;  %1708 = vmatpush.bf16.msra.mxu1 %v3475_v50  ;;  %v3403_v44 = vor.u32 %v4076_v43, %v3402_v41  ;;  %v3357_v50 = vor.u32 %v4008_v47, %v3356_v45  ;;  %v3428_v41 = vld [vmem:[#allocation6 + $0x3e4] sm:$0xf0]  ;;  %v4092_v45 = vld [vmem:[#allocation6 + $0x430] sm:$0xf0] }
  0x94   :  { %1307 = vmatpush.bf16.msra.mxu0 %v1148_v8  ;;  %1215 = vmatmul.bf16.vlgmr.msrb.gmra.mxu2 %v4512_v54  ;;  %v3611_v8 = vor.u32 %v4126_v6, %v3608_v7  ;;  %v3524_v43 = vld [vmem:[#allocation6 + $0x4a4] sm:$0xf0]  ;;  %v3431_v48 = vor.u32 %v4081_v40, %v3428_v41  ;;  %v4086_v6 = vld [vmem:[#allocation6 + $0x400] sm:$0xf0]  ;;  %v4142_v40 = vld [vmem:[#allocation8 + $0x64] sm:$0xf0] }
  0x95   :  { %1288 = vmatpush.bf16.msra.mxu2 %v3285_v13  ;;  %1163 = vmatmul.bf16.gmra.mxu0 %v4523_v46  ;;  %v3560_v13 = vld [vmem:[#allocation6 + $0x4ec] sm:$0xf0]  ;;  %v3566_v41 = vld [vmem:[#allocation6 + $0x4e8] sm:$0xf] }
  0x96   :  { %1182 = vmatmul.bf16.gmra.mxu1 %v4525_v51  ;;  %3383 = vmatmul.msk.bf16.gmra.mxu3 %vm625_vm1, %v4510_v49  ;;  %v3563_v17 = vor.u32 %v4114_v11, %v3560_v13 }
  0x97   :  { %1728 = vmatpush.bf16.msra.mxu3 %v3559_v62  ;;  %1709 = vmatpush.bf16.msra.mxu1 %v3463_v63  ;;  %v4093_v62 = vld [vmem:[#allocation6 + $0x43c] sm:$0xf]  ;;  %v3607_v63 = vor.u32 %v4127_v61, %v3606_v60  ;;  %v3458_v60 = vld [vmem:[#allocation6 + $0x410] sm:$0xf] }
  0x98   :  { %1308 = vmatpush.bf16.msra.mxu0 %v3369_v25  ;;  %v3479_v3 = vor.u32 %v4093_v62, %v3476_v0  ;;  %v4121_v25 = vld [vmem:[#allocation6 + $0x518] sm:$0xf0] }
  0x99   :  { %1289 = vmatpush.bf16.msra.mxu2 %v3273_v19  ;;  %v1700_v5 = vsel %vm632_vm0, %v3607_v63, 0  ;;  %v4087_v19 = vld [vmem:[#allocation6 + $0x40c] sm:$0xf]  ;;  %v3583_v27 = vor.u32 %v4121_v25, %v3582_v24  ;;  %v4089_v61 = vld [vmem:[#allocation6 + $0x418] sm:$0xf0] }
  0x9a   :  { %v3455_v22 = vor.u32 %v4087_v19, %v3452_v20  ;;  %v3459_v0 = vor.u32 %v4089_v61, %v3458_v60  ;;  %v3434_v19 = vld [vmem:[#allocation6 + $0x3e0] sm:$0xf]  ;;  %v4083_v20 = vld [vmem:[#allocation6 + $0x3e8] sm:$0xf0] }
  0x9b   :  { %1729 = vmatpush.bf16.msra.mxu3 %v3547_v9  ;;  %1710 = vmatpush.bf16.msra.mxu1 %v3451_v10  ;;  %v4090_v9 = vld [vmem:[#allocation6 + $0x424] sm:$0xf]  ;;  %v3464_v10 = vld [vmem:[#allocation6 + $0x42c] sm:$0xf0]  ;;  %v3435_v25 = vor.u32 %v4083_v20, %v3434_v19 }
  0x9c   :  { %1309 = vmatpush.bf16.msra.mxu0 %v3357_v50  ;;  %v3467_v12 = vor.u32 %v4090_v9, %v3464_v10  ;;  %v4120_v9 = vld [vmem:[#allocation6 + $0x514] sm:$0xf]  ;;  %v3584_v10 = vld [vmem:[#allocation6 + $0x51c] sm:$0xf0]  ;;  %v4160_v19 = vld [vmem:[#allocation8 + $0xf4] sm:$0xf0] }
  0x9d   :  { %1290 = vmatpush.bf16.msra.mxu2 %v3261_v31 }
  0x9f   :  { %1730 = vmatpush.bf16.msra.mxu3 %v3535_v16  ;;  %1711 = vmatpush.bf16.msra.mxu1 %v3439_v21  ;;  %v1703_v16 = vsel %vm632_vm0, %v3611_v8, 0  ;;  %v4111_v21 = vld [vmem:[#allocation6 + $0x4cc] sm:$0xf]  ;;  %v3407_v8 = vor.u32 %v4075_v1, %v3404_v2  ;;  %v3554_v2 = vld [vmem:[#allocation6 + $0x4d0] sm:$0xf] }
  0xa0   :  { %v3551_v26 = vor.u32 %v4111_v21, %v3548_v23 }
  0xa1   :  { %1751 = vmatpush.bf16.msrb.mxu2 %v1700_v5  ;;  %v3446_v5 = vld [vmem:[#allocation6 + $0x3f8] sm:$0xf] }
  0xa2   :  { %v3447_v13 = vor.u32 %v4086_v6, %v3446_v5 }
  0xa3   :  { %1731 = vmatpush.bf16.msra.mxu3 %v3523_v29  ;;  %1712 = vmatpush.bf16.msra.mxu1 %v3427_v32  ;;  %v3596_v29 = vld [vmem:[#allocation6 + $0x534] sm:$0xf0]  ;;  %v3440_v32 = vld [vmem:[#allocation6 + $0x3fc] sm:$0xf0] }
  0xa4   :  { %1220 = vmatmul.bf16.gmra.mxu2 %v4523_v46  ;;  %v3599_v31 = vor.u32 %v4123_v28, %v3596_v29  ;;  %v3443_v35 = vor.u32 %v4084_v30, %v3440_v32  ;;  %v3578_v28 = vld [vmem:[#allocation6 + $0x500] sm:$0xf]  ;;  %v3422_v32 = vld [vmem:[#allocation6 + $0x3c8] sm:$0xf] }
  0xa5   :  { %1234 = vmatmul.bf16.vlgmr.msrb.gmra.mxu0 %v4514_v59  ;;  %1752 = vmatpush.bf16.msrb.mxu2 %v3595_v18  ;;  %v3488_v18 = vld [vmem:[#allocation6 + $0x45c] sm:$0xf0] }
  0xa6   :  { %3384 = vmatmul.msk.bf16.vlgmr.msrb.gmra.mxu1 %vm625_vm1, %v4506_v56  ;;  %1272 = vmatmul.bf16.vlgmr.msrb.gmra.mxu3 %v4512_v54 }
  0xa7   :  { %1732 = vmatpush.bf16.msra.mxu3 %v3511_v37  ;;  %1713 = vmatpush.bf16.msra.mxu1 %v3415_v38  ;;  %v3482_v37 = vld [vmem:[#allocation6 + $0x440] sm:$0xf]  ;;  %v4095_v38 = vld [vmem:[#allocation6 + $0x448] sm:$0xf0] }
  0xa8   :  { %1765 = vmatpush.bf16.msrb.mxu0 %v3479_v3  ;;  %v3483_v39 = vor.u32 %v4095_v38, %v3482_v37  ;;  %v4099_v3 = vld [vmem:[#allocation6 + $0x46c] sm:$0xf]  ;;  %v3423_v38 = vor.u32 %v4080_v33, %v3422_v32  ;;  %v3530_v32 = vld [vmem:[#allocation6 + $0x4a0] sm:$0xf] }
  0xa9   :  { %1753 = vmatpush.bf16.msrb.mxu2 %v3583_v27  ;;  %v4144_v27 = vld [vmem:[#allocation8 + $0x74] sm:$0xf0]  ;;  %v4107_v33 = vld [vmem:[#allocation6 + $0x4a8] sm:$0xf0] }
  0xab   :  { %1733 = vmatpush.bf16.msra.mxu3 %v3499_v42  ;;  %1714 = vmatpush.bf16.msra.mxu1 %v3403_v44  ;;  %v4105_v42 = vld [vmem:[#allocation6 + $0x49c] sm:$0xf]  ;;  %v3470_v44 = vld [vmem:[#allocation6 + $0x428] sm:$0xf] }
  0xac   :  { %1766 = vmatpush.bf16.msrb.mxu0 %v3467_v12  ;;  %v3527_v50 = vor.u32 %v4105_v42, %v3524_v43  ;;  %v3471_v52 = vor.u32 %v4092_v45, %v3470_v44  ;;  %v3587_v12 = vor.u32 %v4120_v9, %v3584_v10  ;;  %v3614_v43 = vld [vmem:[#allocation6 + $0x548] sm:$0xf]  ;;  %v4128_v44 = vld [vmem:[#allocation6 + $0x550] sm:$0x30] }
  0xaf   :  { %1734 = vmatpush.bf16.msra.mxu3 %v3487_v53  ;;  %1715 = vmatpush.bf16.msra.mxu1 %v3391_v58  ;;  %v4078_v53 = vld [vmem:[#allocation6 + $0x3c4] sm:$0xf]  ;;  %v3512_v58 = vld [vmem:[#allocation6 + $0x48c] sm:$0xf0] }
  0xb0   :  { %1767 = vmatpush.bf16.msrb.mxu0 %v3455_v22  ;;  %v3419_v62 = vor.u32 %v4078_v53, %v3416_v55  ;;  %v3515_v63 = vor.u32 %v4102_v57, %v3512_v58  ;;  %v3395_v22 = vor.u32 %v4072_v14, %v3392_v15  ;;  %v3410_v53 = vld [vmem:[#allocation6 + $0x3b0] sm:$0xf]  ;;  %v4077_v55 = vld [vmem:[#allocation6 + $0x3b8] sm:$0xf0]  ;;  %v3542_v14 = vld [vmem:[#allocation6 + $0x4b8] sm:$0xf] }
  0xb1   :  { %v3411_v61 = vor.u32 %v4077_v55, %v3410_v53  ;;  %v4104_v53 = vld [vmem:[#allocation6 + $0x490] sm:$0xf0]  ;;  %v3728_v55 = vld [vmem:[#allocation8 + $0xd0] sm:$0xf] }
  0xb3   :  { %1784 = vmatpush.bf16.msrb.mxu1 %v3575_v4  ;;  %1808 = vmatpush.bf16.msrb.mxu3 %v1703_v16  ;;  %v3500_v4 = vld [vmem:[#allocation6 + $0x474] sm:$0xf0]  ;;  %v4096_v16 = vld [vmem:[#allocation6 + $0x454] sm:$0xf] }
  0xb4   :  { %1291 = vmatmul.bf16.vlgmr.msra.gmra.mxu2 %v4514_v59  ;;  %1768 = vmatpush.bf16.msrb.mxu0 %v3443_v35  ;;  %v3503_v11 = vor.u32 %v4099_v3, %v3500_v4  ;;  %v3491_v24 = vor.u32 %v4096_v16, %v3488_v18  ;;  %v4113_v3 = vld [vmem:[#allocation6 + $0x4d8] sm:$0xf0]  ;;  %v3398_v4 = vld [vmem:[#allocation6 + $0x398] sm:$0xf]  ;;  %v3744_v18 = vld [vmem:[#allocation8 + $0xf0] sm:$0xf] }
  0xb5   :  { %1239 = vmatmul.bf16.gmra.mxu0 %v4525_v51  ;;  %1822 = vmatpush.bf16.msra.mxu2 %v3483_v39  ;;  %v3672_v39 = vld [vmem:[#allocation8 + $0x60] sm:$0xf]  ;;  %v3555_v6 = vor.u32 %v4113_v3, %v3554_v2  ;;  %v3506_v2 = vld [vmem:[#allocation6 + $0x470] sm:$0xf] }
  0xb6   :  { %3385 = vmatmul.msk.bf16.gmra.mxu1 %vm625_vm1, %v4510_v49  ;;  %1277 = vmatmul.bf16.gmra.mxu3 %v4523_v46  ;;  %v3673_v45 = vor.u32 %v4142_v40, %v3672_v39  ;;  %v3531_v39 = vor.u32 %v4107_v33, %v3530_v32  ;;  %v3736_v40 = vld [vmem:[#allocation8 + $0xe0] sm:$0xf]  ;;  %v4152_v32 = vld [vmem:[#allocation8 + $0xb4] sm:$0xf0] }
  0xb7   :  { %1785 = vmatpush.bf16.msrb.mxu1 %v3563_v17  ;;  %1809 = vmatpush.bf16.msrb.mxu3 %v3599_v31  ;;  %v689_v47 = vpop.f32.mrf.mxu2  ;;  %v4119_v31 = vld [vmem:[#allocation6 + $0x508] sm:$0xf0] }
  0xb8   :  { %1769 = vmatpush.bf16.msrb.mxu0 %v3431_v48  ;;  %v3579_v35 = vor.u32 %v4119_v31, %v3578_v28  ;;  %v4136_v31 = vld [vmem:[#allocation8 + $0x34] sm:$0xf0] }
  0xb9   :  { %1823 = vmatpush.bf16.msra.mxu2 %v3471_v52 }
  0xbb   :  { %1786 = vmatpush.bf16.msrb.mxu1 %v3551_v26  ;;  %1810 = vmatpush.bf16.msrb.mxu3 %v3587_v12  ;;  %v3680_v26 = vld [vmem:[#allocation8 + $0x70] sm:$0xf]  ;;  %v3656_v12 = vld [vmem:[#allocation8 + $0x40] sm:$0xf] }
  0xbc   :  { %1770 = vmatpush.bf16.msrb.mxu0 %v3419_v62  ;;  %v3681_v30 = vor.u32 %v4144_v27, %v3680_v26  ;;  %v3664_v62 = vld [vmem:[#allocation8 + $0x50] sm:$0xf]  ;;  %v4125_v26 = vld [vmem:[#allocation6 + $0x538] sm:$0xf0] }
  0xbd   :  { %1824 = vmatpush.bf16.msra.mxu2 %v3459_v0  ;;  %v3648_v27 = vld [vmem:[#allocation8 + $0x30] sm:$0xf] }
  0xbf   :  { %1787 = vmatpush.bf16.msrb.mxu1 %v3539_v36  ;;  %v4568_v7 = vpop.f32.mrf.mxu2  ;;  %v825_v36 = vlaneseq }
  0xc0   :  { %1771 = vmatpush.bf16.msrb.mxu0 %v3407_v8  ;;  %v4074_v8 = vld [vmem:[#allocation6 + $0x3a0] sm:$0xf0] }
  0xc1   :  { %1825 = vmatpush.bf16.msra.mxu2 %v3447_v13  ;;  %v4582_v57 = vshrl.u32 %v825_v36, 7  ;;  %v4138_v13 = vld [vmem:[#allocation8 + $0x44] sm:$0xf0] }
  0xc2   :  { %v651_v17 = vpop.f32.mrf.mxu0  ;;  %v3657_v16 = vor.u32 %v4138_v13, %v3656_v12 }
  0xc3   :  { %1788 = vmatpush.bf16.msrb.mxu1 %v3527_v50  ;;  %v670_v21 = vpop.f32.mrf.mxu1  ;;  %v3615_v50 = vor.u32 %v4128_v44, %v3614_v43  ;;  %vm827_vm2 = vcmp.lt.s32.totalorder %v4582_v57, 7  ;;  %vm1891_vm3 = vcmp.lt.s32.totalorder %v4582_v57, 6  ;;  %vm2270_vm5 = vcmp.lt.s32.totalorder %v4582_v57, 5 }
  0xc4   :  { %v671_v23 = vadd.f32 %v670_v21, %v651_v17  ;;  %1296 = vmatmul.bf16.gmra.mxu2 %v4525_v51  ;;  %1772 = vmatpush.bf16.msrb.mxu0 %v3395_v22  ;;  %v4110_v17 = vld [vmem:[#allocation6 + $0x4c0] sm:$0xf0]  ;;  %vm2494_vm6 = vcmp.lt.s32.totalorder %v4582_v57, 4 }
  0xc5   :  { %3386 = vmatmul.msk.bf16.vlgmr.msra.gmra.mxu0 %vm625_vm1, %v4506_v56  ;;  %1826 = vmatpush.bf16.msra.mxu2 %v3435_v25  ;;  %v1706_v60 = vsel %vm632_vm0, %v3615_v50, 0  ;;  %v3543_v22 = vor.u32 %v4110_v17, %v3542_v14  ;;  %v3602_v25 = vld [vmem:[#allocation6 + $0x530] sm:$0xf]  ;;  %v3590_v17 = vld [vmem:[#allocation6 + $0x518] sm:$0xf] }
  0xc6   :  { %v4573_v29 = vadd.f32 %v689_v47, %v671_v23  ;;  %1716 = vmatmul.bf16.vlgmr.msra.gmra.mxu1 %v4512_v54  ;;  %1735 = vmatmul.bf16.vlgmr.msra.gmra.mxu3 %v4514_v59  ;;  %v4116_v47 = vld [vmem:[#allocation6 + $0x4f0] sm:$0xf0]  ;;  %v3745_v23 = vor.u32 %v4160_v19, %v3744_v18  ;;  %v4122_v18 = vld [vmem:[#allocation6 + $0x520] sm:$0xf0]  ;;  %v3624_v19 = vld [vmem:[#allocation8] sm:$0xf] }
  0xc7   :  { %1789 = vmatpush.bf16.msrb.mxu1 %v3515_v63  ;;  %v4577_v34 = vpop.f32.mrf.mxu2  ;;  %2148 = vmatpush.bf16.msra.mxu3 %v3681_v30  ;;  %v3567_v52 = vor.u32 %v4116_v47, %v3566_v41  ;;  %v4140_v63 = vld [vmem:[#allocation8 + $0x54] sm:$0xf0]  ;;  %v3603_v30 = vor.u32 %v4125_v26, %v3602_v25  ;;  %v4158_v41 = vld [vmem:[#allocation8 + $0xe4] sm:$0xf0] }
  0xc8   :  { %1841 = vmatpush.bf16.msra.mxu0 %v3579_v35  ;;  %v3665_v1 = vor.u32 %v4140_v63, %v3664_v62  ;;  %v813_v9 = vrot.slane %v4573_v29, 1  ;;  %v3737_v43 = vor.u32 %v4158_v41, %v3736_v40  ;;  %v4134_v47 = vld [vmem:[#allocation8 + $0x24] sm:$0xf0]  ;;  %v4159_v29 = vld [vmem:[#allocation8 + $0xf4] sm:$0xf] }
  0xc9   :  { %v4579_v37 = vpop.f32.mrf.mxu3  ;;  %1827 = vmatpush.bf16.msra.mxu2 %v3423_v38  ;;  %v3649_v38 = vor.u32 %v4136_v31, %v3648_v27  ;;  %v3712_v31 = vld [vmem:[#allocation8 + $0xb0] sm:$0xf]  ;;  %v3704_v40 = vld [vmem:[#allocation8 + $0xa0] sm:$0xf] }
  0xca   :  { %v653_v42 = vpop.f32.mrf.mxu0  ;;  %v3713_v33 = vor.u32 %v4152_v32, %v3712_v31 }
  0xcb   :  { %1790 = vmatpush.bf16.msrb.mxu1 %v3503_v11  ;;  %v672_v48 = vpop.f32.mrf.mxu1  ;;  %2149 = vmatpush.bf16.msra.mxu3 %v3673_v45  ;;  %v3640_v45 = vld [vmem:[#allocation8 + $0x20] sm:$0xf] }
  0xcc   :  { %v673_v58 = vadd.f32 %v672_v48, %v653_v42  ;;  %1842 = vmatpush.bf16.msra.mxu0 %v3567_v52  ;;  %v3518_v48 = vld [vmem:[#allocation6 + $0x488] sm:$0xf]  ;;  %v3641_v52 = vor.u32 %v4134_v47, %v3640_v45 }
  0xcd   :  { %1828 = vmatpush.bf16.msra.mxu2 %v3411_v61 }
  0xce   :  { %v4586_v0 = vadd.f32 %v4568_v7, %v673_v58  ;;  %v3399_v7 = vor.u32 %v4074_v8, %v3398_v4  ;;  %v4156_v58 = vld [vmem:[#allocation8 + $0xd4] sm:$0xf0]  ;;  %v3720_v8 = vld [vmem:[#allocation8 + $0xc0] sm:$0xf] }
  0xcf   :  { %1791 = vmatpush.bf16.msrb.mxu1 %v3491_v24  ;;  %v4588_v5 = vpop.f32.mrf.mxu2  ;;  %2150 = vmatpush.bf16.msra.mxu3 %v3665_v1  ;;  %v3729_v62 = vor.u32 %v4156_v58, %v3728_v55  ;;  %v4132_v1 = vld [vmem:[#allocation8 + $0x14] sm:$0xf0]  ;;  %v3768_v58 = vld [vmem:[#allocation8 + $0x120] sm:$0xf] }
  0xd0   :  { %v816_v10 = vrot.slane %v4586_v0, 1  ;;  %1843 = vmatpush.bf16.msra.mxu0 %v3555_v6  ;;  %v3632_v0 = vld [vmem:[#allocation8 + $0x10] sm:$0xf]  ;;  %v4101_v6 = vld [vmem:[#allocation6 + $0x478] sm:$0xf0] }
  0xd1   :  { %v4593_v11 = vpop.f32.mrf.mxu3  ;;  %1829 = vmatpush.bf16.msra.mxu2 %v3399_v7  ;;  %v3633_v4 = vor.u32 %v4132_v1, %v3632_v0  ;;  %v4154_v7 = vld [vmem:[#allocation8 + $0xc4] sm:$0xf0] }
  0xd2   :  { %v656_v15 = vpop.f32.mrf.mxu0  ;;  %v4599_v20 = vsel %vm827_vm2, %v813_v9, %v816_v10  ;;  %v3721_v13 = vor.u32 %v4154_v7, %v3720_v8 }
  0xd3   :  { %1865 = vmatpush.bf16.msra.mxu1 %v1706_v60  ;;  %v675_v21 = vpop.f32.mrf.mxu1  ;;  %2151 = vmatpush.bf16.msra.mxu3 %v3657_v16 }
  0xd4   :  { %v676_v24 = vadd.f32 %v675_v21, %v656_v15  ;;  %3616 = vmatmul.msk.bf16.vlgmr.msrb.gmra.mxu2 %vm625_vm1, %v4506_v56  ;;  %1844 = vmatpush.bf16.msra.mxu0 %v3543_v22  ;;  %v4130_v22 = vld [vmem:[#allocation8 + $0x4] sm:$0xf0] }
  0xd5   :  { %3387 = vmatmul.msk.bf16.gmra.mxu0 %vm625_vm1, %v4510_v49  ;;  %2167 = vmatpush.bf16.msrb.mxu2 %v3745_v23  ;;  %v3494_v23 = vld [vmem:[#allocation6 + $0x458] sm:$0xf] }
  0xd6   :  { %v4606_v28 = vadd.f32 %v4577_v34, %v676_v24  ;;  %1721 = vmatmul.bf16.gmra.mxu1 %v4523_v46  ;;  %1740 = vmatmul.bf16.gmra.mxu3 %v4525_v51  ;;  %v4098_v24 = vld [vmem:[#allocation6 + $0x460] sm:$0xf0] }
  0xd7   :  { %v727_v35 = vpop.f32.mrf.mxu2  ;;  %1866 = vmatpush.bf16.msra.mxu1 %v3603_v30  ;;  %2152 = vmatpush.bf16.msra.mxu3 %v3649_v38  ;;  %v3495_v30 = vor.u32 %v4098_v24, %v3494_v23  ;;  %v4143_v38 = vld [vmem:[#allocation8 + $0x74] sm:$0xf] }
  0xd8   :  { %v819_v42 = vrot.slane %v4606_v28, 1  ;;  %v728_v34 = vadd.f32 %v727_v35, %v4579_v37  ;;  %1845 = vmatpush.bf16.msra.mxu0 %v3531_v39  ;;  %v3519_v37 = vor.u32 %v4104_v53, %v3518_v48  ;;  %v3625_v28 = vor.u32 %v4130_v22, %v3624_v19  ;;  %v3682_v39 = vld [vmem:[#allocation8 + $0x78] sm:$0xf0]  ;;  %v4157_v48 = vld [vmem:[#allocation8 + $0xe4] sm:$0xf] }
  0xd9   :  { %v4612_v44 = vpop.f32.mrf.mxu3  ;;  %2168 = vmatpush.bf16.msrb.mxu2 %v3737_v43 }
  0xda   :  { %v658_v50 = vpop.f32.mrf.mxu0  ;;  %v4616_v60 = vsel %vm827_vm2, %v816_v10, %v819_v42  ;;  %v3507_v10 = vor.u32 %v4101_v6, %v3506_v2 }
  0xdb   :  { %v677_v61 = vpop.f32.mrf.mxu1  ;;  %2153 = vmatpush.bf16.msra.mxu3 %v3641_v52  ;;  %v4141_v52 = vld [vmem:[#allocation8 + $0x64] sm:$0xf] }
  0xdc   :  { %v678_v63 = vadd.f32 %v677_v61, %v658_v50  ;;  %1846 = vmatpush.bf16.msra.mxu0 %v3519_v37  ;;  %v3738_v50 = vld [vmem:[#allocation8 + $0xe8] sm:$0xf0]  ;;  %v4166_v61 = vld [vmem:[#allocation8 + $0x124] sm:$0x30] }
  0xdd   :  { %2169 = vmatpush.bf16.msrb.mxu2 %v3729_v62  ;;  %v3741_v37 = vor.u32 %v4157_v48, %v3738_v50  ;;  %v3674_v62 = vld [vmem:[#allocation8 + $0x68] sm:$0xf0]  ;;  %v3769_v1 = vor.u32 %v4166_v61, %v3768_v58  ;;  %v3650_v48 = vld [vmem:[#allocation8 + $0x38] sm:$0xf0]  ;;  %v4149_v61 = vld [vmem:[#allocation8 + $0xa4] sm:$0xf] }
  0xde   :  { %v697_v3 = vadd.f32 %v4588_v5, %v678_v63  ;;  %v3591_v5 = vor.u32 %v4122_v18, %v3590_v17  ;;  %v3677_v2 = vor.u32 %v4141_v52, %v3674_v62  ;;  %v3688_v17 = vld [vmem:[#allocation8 + $0x80] sm:$0xf]  ;;  %v4133_v62 = vld [vmem:[#allocation8 + $0x24] sm:$0xf] }
  0xdf   :  { %v729_v12 = vpop.f32.mrf.mxu2  ;;  %2154 = vmatpush.bf16.msra.mxu3 %v3633_v4  ;;  %v2143_v7 = vsel %vm632_vm0, %v3769_v1, 0 }
  0xe0   :  { %v822_v14 = vrot.slane %v697_v3, 1  ;;  %v730_v15 = vadd.f32 %v729_v12, %v4593_v11  ;;  %1847 = vmatpush.bf16.msra.mxu0 %v3507_v10  ;;  %1867 = vmatpush.bf16.msra.mxu1 %v3591_v5  ;;  %v4148_v3 = vld [vmem:[#allocation8 + $0x94] sm:$0xf0]  ;;  %v4155_v12 = vld [vmem:[#allocation8 + $0xd4] sm:$0xf] }
  0xe1   :  { %v4620_v16 = vpop.f32.mrf.mxu3  ;;  %2170 = vmatpush.bf16.msrb.mxu2 %v3721_v13  ;;  %v3730_v10 = vld [vmem:[#allocation8 + $0xd8] sm:$0xf0] }
  0xe2   :  { %v746_v21 = vpop.f32.mrf.mxu0  ;;  %v4624_v25 = vsel %vm827_vm2, %v819_v42, %v822_v14  ;;  %v4630_v11 = vsel %vm827_vm2, %v822_v14, %v813_v9  ;;  %v3746_v9 = vld [vmem:[#allocation8 + $0xf8] sm:$0xf0]  ;;  %v3685_v42 = vor.u32 %v4143_v38, %v3682_v39  ;;  %v3733_v13 = vor.u32 %v4155_v12, %v3730_v10  ;;  %v4139_v14 = vld [vmem:[#allocation8 + $0x54] sm:$0xf] }
  0xe3   :  { %v4632_v26 = vadd.f32 %v746_v21, %v728_v34  ;;  %v765_v27 = vpop.f32.mrf.mxu1  ;;  %2155 = vmatpush.bf16.msra.mxu3 %v3625_v28  ;;  %v3749_v35 = vor.u32 %v4159_v29, %v3746_v9  ;;  %v4150_v34 = vld [vmem:[#allocation8 + $0xa4] sm:$0xf0]  ;;  %v3722_v28 = vld [vmem:[#allocation8 + $0xc8] sm:$0xf0]  ;;  %v4131_v10 = vld [vmem:[#allocation8 + $0x14] sm:$0xf] }
  0xe4   :  { %3617 = vmatmul.msk.bf16.gmra.mxu2 %vm625_vm1, %v4510_v49  ;;  %1848 = vmatpush.bf16.msra.mxu0 %v3495_v30  ;;  %v3705_v45 = vor.u32 %v4150_v34, %v3704_v40  ;;  %v4146_v21 = vld [vmem:[#allocation8 + $0x84] sm:$0xf0]  ;;  %v4137_v30 = vld [vmem:[#allocation8 + $0x44] sm:$0xf]  ;;  %v3658_v29 = vld [vmem:[#allocation8 + $0x48] sm:$0xf0] }
  0xe5   :  { %1773 = vmatmul.bf16.vlgmr.msrb.gmra.mxu0 %v4512_v54  ;;  %2171 = vmatpush.bf16.msrb.mxu2 %v3713_v33  ;;  %v814_v4 = vrot.slane %v4632_v26, 1  ;;  %v3689_v23 = vor.u32 %v4146_v21, %v3688_v17  ;;  %v3661_v38 = vor.u32 %v4137_v30, %v3658_v29  ;;  %v4164_v40 = vld [vmem:[#allocation8 + $0x114] sm:$0xf0]  ;;  %v3714_v34 = vld [vmem:[#allocation8 + $0xb8] sm:$0xf0] }
  0xe6   :  { %1792 = vmatmul.bf16.vlgmr.msrb.gmra.mxu1 %v4514_v59  ;;  %3618 = vmatmul.msk.bf16.vlgmr.msrb.gmra.mxu3 %vm625_vm1, %v4506_v56  ;;  %v3752_v21 = vld [vmem:[#allocation8 + $0x100] sm:$0xf]  ;;  %v4129_v30 = vld [vmem:[#allocation8 + $0x4] sm:$0xf] }
  0xe7   :  { %v732_v41 = vpop.f32.mrf.mxu2  ;;  %2224 = vmatpush.bf16.msrb.mxu3 %v3749_v35  ;;  %2205 = vmatpush.bf16.msrb.mxu1 %v3685_v42  ;;  %v4151_v42 = vld [vmem:[#allocation8 + $0xb4] sm:$0xf] }
  0xe8   :  { %v733_v43 = vadd.f32 %v732_v41, %v4612_v44  ;;  %v3696_v44 = vld [vmem:[#allocation8 + $0x90] sm:$0xf]  ;;  %2191 = vmatpush.bf16.msrb.mxu0 %v2143_v7  ;;  %v4147_v7 = vld [vmem:[#allocation8 + $0x94] sm:$0xf] }
  0xe9   :  { %v784_v47 = vpop.f32.mrf.mxu3  ;;  %2172 = vmatpush.bf16.msrb.mxu2 %v3705_v45  ;;  %v3697_v6 = vor.u32 %v4148_v3, %v3696_v44 }
  0xea   :  { %v4641_v53 = vadd.f32 %v784_v47, %v765_v27  ;;  %v748_v55 = vpop.f32.mrf.mxu0  ;;  %v4153_v27 = vld [vmem:[#allocation8 + $0xc4] sm:$0xf]  ;;  %v3717_v47 = vor.u32 %v4151_v42, %v3714_v34  ;;  %v4174_v42 = vld [vmem:[#allocation9 + $0x38] sm:$0xff] }
  0xeb   :  { %v749_v63 = vadd.f32 %v748_v55, %v730_v15  ;;  %v767_v0 = vpop.f32.mrf.mxu1  ;;  %2225 = vmatpush.bf16.msrb.mxu3 %v3741_v37  ;;  %2206 = vmatpush.bf16.msrb.mxu1 %v3677_v2  ;;  %v3666_v15 = vld [vmem:[#allocation8 + $0x58] sm:$0xf0]  ;;  %v3725_v33 = vor.u32 %v4153_v27, %v3722_v28  ;;  %v3706_v37 = vld [vmem:[#allocation8 + $0xa8] sm:$0xf0]  ;;  %v4145_v27 = vld [vmem:[#allocation8 + $0x84] sm:$0xf] }
  0xec   :  { %v3669_v19 = vor.u32 %v4139_v14, %v3666_v15  ;;  %v3709_v1 = vor.u32 %v4149_v61, %v3706_v37  ;;  %v3642_v2 = vld [vmem:[#allocation8 + $0x28] sm:$0xf0] }
  0xed   :  { %v817_v8 = vrot.slane %v749_v63, 1  ;;  %2173 = vmatpush.bf16.msrb.mxu2 %v3697_v6  ;;  %v3645_v6 = vor.u32 %v4133_v62, %v3642_v2  ;;  %v3690_v28 = vld [vmem:[#allocation8 + $0x88] sm:$0xf0]  ;;  %v4181_v2 = vld [vmem:[#allocation9 + $0x70] sm:$0xff] }
  0xee   :  { %v3693_v26 = vor.u32 %v4145_v27, %v3690_v28  ;;  %v4182_v34 = vld [vmem:[#allocation9 + $0x78] sm:$0xff]  ;;  %v4184_v28 = vld [vmem:[#allocation9 + $0x88] sm:$0xff] }
  0xef   :  { %v734_v18 = vpop.f32.mrf.mxu2  ;;  %v4649_v5 = vsel %vm827_vm2, %v814_v4, %v817_v8  ;;  %2226 = vmatpush.bf16.msrb.mxu3 %v3733_v13  ;;  %2207 = vmatpush.bf16.msrb.mxu1 %v3669_v19  ;;  %v3634_v13 = vld [vmem:[#allocation8 + $0x18] sm:$0xf0] }
  0xf0   :  { %v735_v22 = vadd.f32 %v734_v18, %v4620_v16  ;;  %v3760_v16 = vld [vmem:[#allocation8 + $0x110] sm:$0xf]  ;;  %v3637_v15 = vor.u32 %v4131_v10, %v3634_v13  ;;  %v4172_v10 = vld [vmem:[#allocation9 + $0x28] sm:$0xff] }
  0xf1   :  { %v786_v24 = vpop.f32.mrf.mxu3  ;;  %2174 = vmatpush.bf16.msrb.mxu2 %v3689_v23  ;;  %v3761_v41 = vor.u32 %v4164_v40, %v3760_v16  ;;  %v4165_v40 = vld [vmem:[#allocation8 + $0x124] sm:$0xf]  ;;  %v4180_v13 = vld [vmem:[#allocation9 + $0x68] sm:$0xff] }
  0xf2   :  { %v787_v31 = vadd.f32 %v786_v24, %v767_v0  ;;  %v751_v32 = vpop.f32.mrf.mxu0 }
  0xf3   :  { %v752_v9 = vadd.f32 %v751_v32, %v733_v43  ;;  %v770_v35 = vpop.f32.mrf.mxu1  ;;  %2227 = vmatpush.bf16.msrb.mxu3 %v3725_v33  ;;  %2208 = vmatpush.bf16.msrb.mxu1 %v3661_v38  ;;  %v4135_v43 = vld [vmem:[#allocation8 + $0x34] sm:$0xf] }
  0xf4   :  { %1830 = vmatmul.bf16.vlgmr.msra.gmra.mxu2 %v4512_v54  ;;  %2192 = vmatpush.bf16.msrb.mxu0 %v3761_v41  ;;  %v3653_v55 = vor.u32 %v4135_v43, %v3650_v48  ;;  %v3770_v41 = vld [vmem:[#allocation8 + $0x128] sm:$0x30]  ;;  %v3852_v48 = vld [vmem:[#allocation9 + $0x90] sm:$0xf] }
  0xf5   :  { %v820_v39 = vrot.slane %v752_v9, 1  ;;  %1778 = vmatmul.bf16.gmra.mxu0 %v4523_v46 }
  0xf6   :  { %1797 = vmatmul.bf16.gmra.mxu1 %v4525_v51  ;;  %3619 = vmatmul.msk.bf16.gmra.mxu3 %vm625_vm1, %v4510_v49 }
  0xf7   :  { %v803_v45 = vpop.f32.mrf.mxu2  ;;  %v4659_v50 = vsel %vm827_vm2, %v817_v8, %v820_v39  ;;  %2228 = vmatpush.bf16.msrb.mxu3 %v3717_v47  ;;  %2209 = vmatpush.bf16.msrb.mxu1 %v3653_v55  ;;  %v4185_v55 = vld [vmem:[#allocation9 + $0x90] sm:$0x30] }
  0xf8   :  { %v4662_v52 = vadd.f32 %v803_v45, %v4641_v53  ;;  %v3698_v53 = vld [vmem:[#allocation8 + $0x98] sm:$0xf0]  ;;  %v3853_v61 = vor.u32 %v4185_v55, %v3852_v48 }
  0xf9   :  { %v789_v58 = vpop.f32.mrf.mxu3  ;;  %v3701_v12 = vor.u32 %v4147_v7, %v3698_v53 }
  0xfa   :  { %v790_v63 = vadd.f32 %v789_v58, %v770_v35  ;;  %v753_v0 = vpop.f32.mrf.mxu0  ;;  %v815_v32 = vrot.slane %v4662_v52, 1  ;;  %v3626_v35 = vld [vmem:[#allocation8 + $0x8] sm:$0xf0] }
  0xfb   :  { %v754_v44 = vadd.f32 %v753_v0, %v735_v22  ;;  %v772_v3 = vpop.f32.mrf.mxu1  ;;  %2229 = vmatpush.bf16.msrb.mxu3 %v3709_v1  ;;  %2210 = vmatpush.bf16.msrb.mxu1 %v3645_v6  ;;  %v4162_v22 = vld [vmem:[#allocation8 + $0x104] sm:$0xf0]  ;;  %v4173_v1 = vld [vmem:[#allocation9 + $0x30] sm:$0xff] }
  0xfc   :  { %v3753_v24 = vor.u32 %v4162_v22, %v3752_v21 }
  0xfd   :  { %v823_v8 = vrot.slane %v754_v44, 1  ;;  %v4163_v44 = vld [vmem:[#allocation8 + $0x114] sm:$0xf] }
  0xfe   :  { %2193 = vmatpush.bf16.msrb.mxu0 %v3753_v24 }
  0xff   :  { %v805_v14 = vpop.f32.mrf.mxu2  ;;  %v4666_v17 = vsel %vm827_vm2, %v820_v39, %v823_v8  ;;  %v4672_v18 = vsel %vm827_vm2, %v823_v8, %v814_v4  ;;  %2230 = vmatpush.bf16.msrb.mxu3 %v3701_v12  ;;  %2211 = vmatpush.bf16.msrb.mxu1 %v3637_v15  ;;  %v3762_v8 = vld [vmem:[#allocation8 + $0x118] sm:$0xf0] }
 0x100   :  { %v806_v19 = vadd.f32 %v805_v14, %v787_v31  ;;  %v3629_v31 = vor.u32 %v4129_v30, %v3626_v35  ;;  %v3765_v7 = vor.u32 %v4163_v44, %v3762_v8  ;;  %v4161_v14 = vld [vmem:[#allocation8 + $0x104] sm:$0xf]  ;;  %v4179_v30 = vld [vmem:[#allocation9 + $0x60] sm:$0xff] }
 0x101   :  { %v791_v23 = vpop.f32.mrf.mxu3 }
 0x102   :  { %v818_v33 = vrot.slane %v806_v19, 1  ;;  %v792_v29 = vadd.f32 %v791_v23, %v772_v3  ;;  %v1159_v9 = vpop.f32.mrf.mxu0  ;;  %v3754_v19 = vld [vmem:[#allocation8 + $0x108] sm:$0xf0] }
 0x103   :  { %v1160_v4 = vadd.f32 %v1159_v9, %v4599_v20  ;;  %v1178_v38 = vpop.f32.mrf.mxu1  ;;  %2231 = vmatpush.bf16.msrb.mxu3 %v3693_v26  ;;  %v3773_v20 = vor.u32 %v4165_v40, %v3770_v41  ;;  %2212 = vmatpush.bf16.msrb.mxu1 %v3629_v31  ;;  %v3757_v21 = vor.u32 %v4161_v14, %v3754_v19  ;;  %v4171_v26 = vld [vmem:[#allocation9 + $0x20] sm:$0xff]  ;;  %v4170_v31 = vld [vmem:[#allocation9 + $0x18] sm:$0xff]  ;;  %v4177_v41 = vld [vmem:[#allocation9 + $0x50] sm:$0xff] }
 0x104   :  { %1835 = vmatmul.bf16.gmra.mxu2 %v4523_v46  ;;  %v4681_v39 = vsel %vm827_vm2, %v815_v32, %v818_v33 }
 0x105   :  { %v1179_v16 = vadd.f32 %v1178_v38, %v1160_v4  ;;  %1849 = vmatmul.bf16.vlgmr.msra.gmra.mxu0 %v4514_v59  ;;  %v2146_v47 = vsel %vm632_vm0, %v3773_v20, 0 }
 0x106   :  { %3620 = vmatmul.msk.bf16.vlgmr.msra.gmra.mxu1 %vm625_vm1, %v4506_v56  ;;  %2156 = vmatmul.bf16.vlgmr.msra.gmra.mxu3 %v4512_v54 }
 0x107   :  { %v808_v43 = vpop.f32.mrf.mxu2  ;;  %2433 = vmatpush.bf16.msra.mxu0 %v4174_v42  ;;  %2452 = vmatpush.bf16.msra.mxu1 %v4182_v34  ;;  %v4169_v34 = vld [vmem:[#allocation9 + $0x10] sm:$0xff] }
 0x108   :  { %v809_v45 = vadd.f32 %v808_v43, %v790_v63  ;;  %2248 = vmatpush.bf16.msra.mxu2 %v2146_v47  ;;  %v2431_v63 = vsel %vm632_vm0, %v3853_v61, 0  ;;  %v4176_v47 = vld [vmem:[#allocation9 + $0x48] sm:$0xff] }
 0x109   :  { %v1197_v58 = vpop.f32.mrf.mxu3  ;;  %2476 = vmatpush.bf16.msra.mxu3 %v2431_v63 }
 0x10a   :  { %v821_v37 = vrot.slane %v809_v45, 1  ;;  %v4688_v62 = vadd.f32 %v1197_v58, %v1179_v16  ;;  %v1161_v0 = vpop.f32.mrf.mxu0  ;;  %v4183_v45 = vld [vmem:[#allocation9 + $0x80] sm:$0xff] }
 0x10b   :  { %v1162_v3 = vadd.f32 %v1161_v0, %v4616_v60  ;;  %v1180_v6 = vpop.f32.mrf.mxu1  ;;  %2434 = vmatpush.bf16.msra.mxu0 %v4173_v1  ;;  %2453 = vmatpush.bf16.msra.mxu1 %v4181_v2  ;;  %v4167_v1 = vld [vmem:[#allocation9] sm:$0xff] }
 0x10c   :  { %v4694_v53 = vsel %vm827_vm2, %v818_v33, %v821_v37  ;;  %2249 = vmatpush.bf16.msra.mxu2 %v3765_v7 }
 0x10d   :  { %v1181_v12 = vadd.f32 %v1180_v6, %v1162_v3  ;;  %2477 = vmatpush.bf16.msra.mxu3 %v4184_v28 }
 0x10f   :  { %v810_v15 = vpop.f32.mrf.mxu2  ;;  %2435 = vmatpush.bf16.msra.mxu0 %v4172_v10  ;;  %2454 = vmatpush.bf16.msra.mxu1 %v4180_v13 }
 0x110   :  { %v811_v60 = vadd.f32 %v810_v15, %v792_v29  ;;  %2250 = vmatpush.bf16.msra.mxu2 %v3757_v21 }
 0x111   :  { %v1199_v22 = vpop.f32.mrf.mxu3  ;;  %2478 = vmatpush.bf16.msra.mxu3 %v4183_v45 }
 0x112   :  { %v824_v23 = vrot.slane %v811_v60, 1  ;;  %v4696_v24 = vadd.f32 %v1199_v22, %v1181_v12  ;;  %v1164_v27 = vpop.f32.mrf.mxu0 }
 0x113   :  { %v1165_v33 = vadd.f32 %v1164_v27, %v4624_v25  ;;  %v1183_v9 = vpop.f32.mrf.mxu1  ;;  %2455 = vmatpush.bf16.msra.mxu1 %v4179_v30  ;;  %v4178_v25 = vld [vmem:[#allocation9 + $0x58] sm:$0xff]  ;;  %2436 = vmatpush.bf16.msra.mxu0 %v4171_v26 }
 0x114   :  { %2175 = vmatmul.bf16.vlgmr.msrb.gmra.mxu2 %v4514_v59  ;;  %v4702_v29 = vsel %vm827_vm2, %v821_v37, %v824_v23  ;;  %v4708_v35 = vsel %vm827_vm2, %v824_v23, %v815_v32  ;;  %v4175_v37 = vld [vmem:[#allocation9 + $0x40] sm:$0xff] }
 0x115   :  { %v1184_v4 = vadd.f32 %v1183_v9, %v1165_v33  ;;  %1854 = vmatmul.bf16.gmra.mxu0 %v4525_v51 }
 0x116   :  { %3621 = vmatmul.msk.bf16.gmra.mxu1 %vm625_vm1, %v4510_v49  ;;  %2161 = vmatmul.bf16.gmra.mxu3 %v4523_v46 }
 0x117   :  { %v1216_v38 = vpop.f32.mrf.mxu2  ;;  %2456 = vmatpush.bf16.msra.mxu1 %v4178_v25  ;;  %2437 = vmatpush.bf16.msra.mxu0 %v4170_v31 }
 0x118   :  { %v1217_v16 = vadd.f32 %v1216_v38, %v4649_v5  ;;  %v4168_v5 = vld [vmem:[#allocation9 + $0x8] sm:$0xff] }
 0x119   :  { %v1202_v52 = vpop.f32.mrf.mxu3 }
 0x11a   :  { %v4715_v40 = vadd.f32 %v1202_v52, %v1184_v4  ;;  %v1166_v32 = vpop.f32.mrf.mxu0 }
 0x11b   :  { %v1167_v20 = vadd.f32 %v1166_v32, %v4630_v11  ;;  %v1185_v42 = vpop.f32.mrf.mxu1  ;;  %2457 = vmatpush.bf16.msra.mxu1 %v4177_v41  ;;  %2438 = vmatpush.bf16.msra.mxu0 %v4169_v34  ;;  %v4193_v34 = vld [vmem:[#allocation12 + $0x38] sm:$0xff] }
 0x11c   :  { %2812 = vmatpush.bf16.msrb.mxu2 %v4193_v34 }
 0x11d   :  { %v1186_v43 = vadd.f32 %v1185_v42, %v1167_v20 }
 0x11f   :  { %v4718_v48 = vpop.f32.mrf.mxu2  ;;  %2458 = vmatpush.bf16.msra.mxu1 %v4176_v47  ;;  %2439 = vmatpush.bf16.msra.mxu0 %v4168_v5  ;;  %v4191_v5 = vld [vmem:[#allocation12 + $0x28] sm:$0xff] }
 0x121   :  { %v1204_v55 = vpop.f32.mrf.mxu3 }
 0x122   :  { %v4720_v58 = vadd.f32 %v1204_v55, %v1186_v43  ;;  %v1235_v61 = vpop.f32.mrf.mxu0 }
 0x123   :  { %v1236_v0 = vadd.f32 %v1235_v61, %v1217_v16  ;;  %v1254_v11 = vpop.f32.mrf.mxu1  ;;  %2459 = vmatpush.bf16.msra.mxu1 %v4175_v37  ;;  %2440 = vmatpush.bf16.msra.mxu0 %v4167_v1 }
 0x124   :  { %2180 = vmatmul.bf16.gmra.mxu2 %v4525_v51 }
 0x125   :  { %v4723_v2 = vadd.f32 %v1254_v11, %v1236_v0  ;;  %3774 = vmatmul.msk.bf16.vlgmr.msrb.gmra.mxu0 %vm625_vm1, %v4506_v56  ;;  %v4190_v0 = vld [vmem:[#allocation12 + $0x20] sm:$0xff] }
 0x126   :  { %2213 = vmatmul.bf16.vlgmr.msrb.gmra.mxu1 %v4512_v54  ;;  %2232 = vmatmul.bf16.vlgmr.msrb.gmra.mxu3 %v4514_v59 }
 0x127   :  { %v1221_v44 = vpop.f32.mrf.mxu2 }
 0x128   :  { %v1222_v3 = vadd.f32 %v1221_v44, %v4666_v17 }
 0x129   :  { %v1273_v6 = vpop.f32.mrf.mxu3 }
 0x12a   :  { %v1274_v63 = vadd.f32 %v1273_v6, %v4681_v39  ;;  %v4731_v8 = vpop.f32.mrf.mxu0 }
 0x12b   :  { %v4733_v7 = vpop.f32.mrf.mxu1 }
 0x12f   :  { %v1223_v12 = vpop.f32.mrf.mxu2 }
 0x130   :  { %v1224_v10 = vadd.f32 %v1223_v12, %v4672_v18 }
 0x131   :  { %v1275_v13 = vpop.f32.mrf.mxu3 }
 0x132   :  { %v1276_v14 = vadd.f32 %v1275_v13, %v4694_v53  ;;  %v1240_v15 = vpop.f32.mrf.mxu0  ;;  %v4188_v13 = vld [vmem:[#allocation12 + $0x10] sm:$0xff] }
 0x133   :  { %v1241_v19 = vadd.f32 %v1240_v15, %v1222_v3  ;;  %v1259_v60 = vpop.f32.mrf.mxu1 }
 0x134   :  { %3776 = vmatmul.msk.bf16.vlgmr.msra.gmra.mxu2 %vm625_vm1, %v4506_v56 }
 0x135   :  { %v4739_v17 = vadd.f32 %v1259_v60, %v1241_v19  ;;  %3775 = vmatmul.msk.bf16.gmra.mxu0 %vm625_vm1, %v4510_v49 }
 0x136   :  { %2218 = vmatmul.bf16.gmra.mxu1 %v4523_v46  ;;  %2237 = vmatmul.bf16.gmra.mxu3 %v4525_v51 }
 0x137   :  { %v1292_v39 = vpop.f32.mrf.mxu2 }
 0x138   :  { %v1293_v18 = vadd.f32 %v1292_v39, %v1274_v63 }
 0x139   :  { %v1278_v21 = vpop.f32.mrf.mxu3 }
 0x13a   :  { %v1279_v53 = vadd.f32 %v1278_v21, %v4702_v29  ;;  %v1242_v22 = vpop.f32.mrf.mxu0  ;;  %v4187_v21 = vld [vmem:[#allocation12 + $0x8] sm:$0xff] }
 0x13b   :  { %v1243_v23 = vadd.f32 %v1242_v22, %v1224_v10  ;;  %v1261_v27 = vpop.f32.mrf.mxu1 }
 0x13d   :  { %v4746_v28 = vadd.f32 %v1261_v27, %v1243_v23 }
 0x13f   :  { %v1294_v30 = vpop.f32.mrf.mxu2 }
 0x140   :  { %v1295_v33 = vadd.f32 %v1294_v30, %v1276_v14 }
 0x141   :  { %v1280_v9 = vpop.f32.mrf.mxu3 }
 0x142   :  { %v1281_v26 = vadd.f32 %v1280_v9, %v4708_v35  ;;  %v1311_v4 = vpop.f32.mrf.mxu0 }
 0x143   :  { %v4749_v25 = vadd.f32 %v1311_v4, %v1293_v18  ;;  %v1717_v38 = vpop.f32.mrf.mxu1 }
 0x144   :  { %3777 = vmatmul.msk.bf16.gmra.mxu2 %vm625_vm1, %v4510_v49 }
 0x145   :  { %2441 = vmatmul.bf16.vlgmr.msra.gmra.mxu0 %v4512_v54 }
 0x146   :  { %2460 = vmatmul.bf16.vlgmr.msra.gmra.mxu1 %v4514_v59  ;;  %3854 = vmatmul.msk.bf16.vlgmr.msra.gmra.mxu3 %vm625_vm1, %v4506_v56  ;;  %v4192_v59 = vld [vmem:[#allocation12 + $0x30] sm:$0xff] }
 0x147   :  { %v1297_v29 = vpop.f32.mrf.mxu2  ;;  %2813 = vmatpush.bf16.msrb.mxu2 %v4192_v59 }
 0x148   :  { %v1298_v31 = vadd.f32 %v1297_v29, %v1279_v53  ;;  %v4186_v29 = vld [vmem:[#allocation12] sm:$0xff] }
 0x149   :  { %v1736_v16 = vpop.f32.mrf.mxu3 }
 0x14a   :  { %v1313_v52 = vpop.f32.mrf.mxu0 }
 0x14b   :  { %v4757_v32 = vadd.f32 %v1313_v52, %v1295_v33  ;;  %v1719_v35 = vpop.f32.mrf.mxu1  ;;  %2814 = vmatpush.bf16.msrb.mxu2 %v4191_v5  ;;  %v2511_v33 = vld [vmem:[#allocation11] sm:$0xff] }
 0x14f   :  { %v1299_v41 = vpop.f32.mrf.mxu2  ;;  %2815 = vmatpush.bf16.msrb.mxu2 %v4190_v0 }
 0x150   :  { %v1300_v20 = vadd.f32 %v1299_v41, %v1281_v26  ;;  %v2514_v26 = vld [vmem:[#allocation11 + $0x18] sm:$0xff] }
 0x151   :  { %v1738_v42 = vpop.f32.mrf.mxu3 }
 0x152   :  { %v1316_v43 = vpop.f32.mrf.mxu0  ;;  %v1739_v11 = vadd.f32 %v1738_v42, %v1719_v35 }
 0x153   :  { %v4759_v45 = vadd.f32 %v1316_v43, %v1298_v31  ;;  %v1722_v54 = vpop.f32.mrf.mxu1 }
 0x155   :  { %2446 = vmatmul.bf16.gmra.mxu0 %v4523_v46  ;;  %v1737_v46 = vadd.f32 %v1736_v16, %v1717_v38 }
 0x156   :  { %2465 = vmatmul.bf16.gmra.mxu1 %v4525_v51  ;;  %3855 = vmatmul.msk.bf16.gmra.mxu3 %vm625_vm1, %v4510_v49  ;;  %v4189_v51 = vld [vmem:[#allocation12 + $0x18] sm:$0xff] }
 0x157   :  { %v1755_v56 = vpop.f32.mrf.mxu2  ;;  %2816 = vmatpush.bf16.msrb.mxu2 %v4189_v51 }
 0x158   :  { %v1756_v6 = vadd.f32 %v1755_v56, %v1737_v46 }
 0x159   :  { %v1741_v47 = vpop.f32.mrf.mxu3 }
 0x15a   :  { %v1318_v55 = vpop.f32.mrf.mxu0  ;;  %v1879_v14 = vrot.slane %v1756_v6, 2  ;;  %v1742_v15 = vadd.f32 %v1741_v47, %v1722_v54 }
 0x15b   :  { %v4765_v61 = vadd.f32 %v1318_v55, %v1300_v20  ;;  %v1724_v37 = vpop.f32.mrf.mxu1  ;;  %2817 = vmatpush.bf16.msrb.mxu2 %v4188_v13 }
 0x15f   :  { %v1757_v1 = vpop.f32.mrf.mxu2  ;;  %2818 = vmatpush.bf16.msrb.mxu2 %v4187_v21 }
 0x160   :  { %v1758_v44 = vadd.f32 %v1757_v1, %v1739_v11  ;;  %v1219_v1 = vadd.f32 %v4718_v48, %v4659_v50 }
 0x161   :  { %v1743_v3 = vpop.f32.mrf.mxu3 }
 0x162   :  { %v1774_v63 = vpop.f32.mrf.mxu0  ;;  %v1882_v12 = vrot.slane %v1758_v44, 2  ;;  %v1744_v31 = vadd.f32 %v1743_v3, %v1724_v37 }
 0x163   :  { %v1793_v49 = vpop.f32.mrf.mxu1  ;;  %2819 = vmatpush.bf16.msrb.mxu2 %v4186_v29 }
 0x164   :  { %v1794_v10 = vadd.f32 %v1793_v49, %v1774_v63  ;;  %v1898_v60 = vsel %vm1891_vm3, %v1879_v14, %v1882_v12  ;;  %v1238_v49 = vadd.f32 %v4731_v8, %v1219_v1 }
 0x165   :  { %v1904_v27 = vadd.f32 %v1898_v60, %v4688_v62 }
 0x166   :  { %v1257_v48 = vadd.f32 %v4733_v7, %v1238_v49 }
 0x167   :  { %v1760_v19 = vpop.f32.mrf.mxu2  ;;  %v2517_v16 = vadd.f32 %v2511_v33, %v1904_v27 }
 0x168   :  { %v1761_v39 = vadd.f32 %v1760_v19, %v1742_v15 }
 0x169   :  { %v1812_v18 = vpop.f32.mrf.mxu3 }
 0x16a   :  { %v1885_v53 = vrot.slane %v1761_v39, 2  ;;  %v4770_v22 = vadd.f32 %v1812_v18, %v1794_v10  ;;  %v1776_v23 = vpop.f32.mrf.mxu0 }
 0x16b   :  { %v1795_v30 = vpop.f32.mrf.mxu1 }
 0x16c   :  { %v1895_v9 = vsel %vm1891_vm3, %v1882_v12, %v1885_v53  ;;  %v1796_v4 = vadd.f32 %v1795_v30, %v1776_v23  ;;  %v1880_v59 = vrot.slane %v4770_v22, 2 }
 0x16d   :  { %v1907_v38 = vadd.f32 %v1895_v9, %v4696_v24 }
 0x16f   :  { %v2520_v52 = vadd.f32 %v2514_v26, %v1907_v38  ;;  %v1762_v35 = vpop.f32.mrf.mxu2 }
 0x170   :  { %v1763_v41 = vadd.f32 %v1762_v35, %v1744_v31 }
 0x171   :  { %v2529_v20 = vmax.f32 %v2517_v16, %v2520_v52  ;;  %v1814_v42 = vpop.f32.mrf.mxu3 }
 0x172   :  { %v1888_v62 = vrot.slane %v1763_v41, 2  ;;  %v1815_v34 = vadd.f32 %v1814_v42, %v1796_v4  ;;  %v1779_v43 = vpop.f32.mrf.mxu0 }
 0x173   :  { %v2530_v54 = vrot.slane %v2529_v20, 4  ;;  %v1798_v56 = vpop.f32.mrf.mxu1 }
 0x174   :  { %v1892_v47 = vsel %vm1891_vm3, %v1885_v53, %v1888_v62  ;;  %v1901_v24 = vsel %vm1891_vm3, %v1888_v62, %v1879_v14  ;;  %v1883_v5 = vrot.slane %v1815_v34, 2  ;;  %v1799_v55 = vadd.f32 %v1798_v56, %v1779_v43 }
 0x175   :  { %v2531_v37 = vmax.f32 %v2529_v20, %v2530_v54  ;;  %v1910_v0 = vadd.f32 %v1892_v47, %v4715_v40  ;;  %v1913_v11 = vadd.f32 %v1901_v24, %v4720_v58 }
 0x176   :  { %v1899_v46 = vsel %vm1891_vm3, %v1880_v59, %v1883_v5 }
 0x177   :  { %v2532_v44 = vrot.slane %v2531_v37, 2  ;;  %v2523_v3 = vadd.f32 %v2511_v33, %v1910_v0  ;;  %v2526_v51 = vadd.f32 %v2514_v26, %v1913_v11  ;;  %v4788_v6 = vadd.f32 %v1899_v46, %v4723_v2  ;;  %v1831_v63 = vpop.f32.mrf.mxu2  ;;  %v4797_v2 = vld [vmem:[%s4897_s4] sm:$0x7] }
 0x178   :  { %v2573_v7 = vperm.slane %v4797_v2, 0 }
 0x179   :  { %v2533_v12 = vmax.f32 %v2531_v37, %v2532_v44  ;;  %v2550_v10 = vmax.f32 %v2523_v3, %v2526_v51  ;;  %v1817_v40 = vpop.f32.mrf.mxu3 }
 0x17a   :  { %v1818_v13 = vadd.f32 %v1817_v40, %v1799_v55  ;;  %v1781_v58 = vpop.f32.mrf.mxu0 }
 0x17b   :  { %v2551_v14 = vrot.slane %v2550_v10, 4  ;;  %v1800_v15 = vpop.f32.mrf.mxu1  ;;  %v2534_v19 = vrot.slane %v2533_v12, 1 }
 0x17c   :  { %v1886_v50 = vrot.slane %v1818_v13, 2  ;;  %v1801_v53 = vadd.f32 %v1800_v15, %v1781_v58 }
 0x17d   :  { %v2552_v60 = vmax.f32 %v2550_v10, %v2551_v14  ;;  %v2535_v22 = vmax.f32 %v2533_v12, %v2534_v19 }
 0x17e   :  { %v1896_v39 = vsel %vm1891_vm3, %v1883_v5, %v1886_v50 }
 0x17f   :  { %v2553_v8 = vrot.slane %v2552_v60, 2  ;;  %v4799_v18 = vadd.f32 %v1896_v39, %v1257_v48  ;;  %v1833_v21 = vpop.f32.mrf.mxu2  ;;  %v2579_v16 = vadd.f32 %v2573_v7, %v2535_v22 }
 0x181   :  { %v2554_v23 = vmax.f32 %v2552_v60, %v2553_v8  ;;  %v1819_v27 = vpop.f32.mrf.mxu3  ;;  %v2585_v43 = vpack.c.bf16 %v2579_v16, %v2579_v16  ;;  %v4197_v16 = vld [vmem:[#allocation12 + $0x58] sm:$0xff] }
 0x182   :  { %v1820_v30 = vadd.f32 %v1819_v27, %v1801_v53  ;;  %v1850_v33 = vpop.f32.mrf.mxu0  ;;  %v4200_v27 = vld [vmem:[#allocation12 + $0x70] sm:$0xff] }
 0x183   :  { %v2555_v9 = vrot.slane %v2554_v23, 1  ;;  %v1851_v26 = vadd.f32 %v1850_v33, %v1831_v63  ;;  %v1869_v4 = vpop.f32.mrf.mxu1  ;;  %v2649_v37 = vunpack.c.l.b16 %v2585_v43 }
 0x184   :  { %v1889_v38 = vrot.slane %v1820_v30, 2  ;;  %v4199_v30 = vld [vmem:[#allocation12 + $0x68] sm:$0xff] }
 0x185   :  { %v2556_v29 = vmax.f32 %v2554_v23, %v2555_v9  ;;  %v1870_v31 = vadd.f32 %v1869_v4, %v1851_v26 }
 0x186   :  { %v1893_v52 = vsel %vm1891_vm3, %v1886_v50, %v1889_v38  ;;  %v1902_v35 = vsel %vm1891_vm3, %v1889_v38, %v1880_v59  ;;  %v4198_v38 = vld [vmem:[#allocation12 + $0x60] sm:$0xff] }
 0x187   :  { %v4807_v41 = vadd.f32 %v1893_v52, %v4739_v17  ;;  %v4810_v20 = vadd.f32 %v1902_v35, %v4746_v28  ;;  %v1836_v42 = vpop.f32.mrf.mxu2  ;;  %v2582_v62 = vadd.f32 %v2573_v7, %v2556_v29  ;;  %v1881_v59 = vrot.slane %v1870_v31, 2 }
 0x189   :  { %v2157_v34 = vpop.f32.mrf.mxu3  ;;  %v2588_v54 = vpack.c.bf16 %v2582_v62, %v2582_v62 }
 0x18a   :  { %v1852_v56 = vpop.f32.mrf.mxu0 }
 0x18b   :  { %v1853_v47 = vadd.f32 %v1852_v56, %v1833_v21  ;;  %v1871_v24 = vpop.f32.mrf.mxu1  ;;  %v2652_v5 = vunpack.c.l.b16 %v2588_v54  ;;  %v4196_v56 = vld [vmem:[#allocation12 + $0x50] sm:$0xff] }
 0x18d   :  { %v1872_v55 = vadd.f32 %v1871_v24, %v1853_v47  ;;  %v2655_v0 = vrot.slane %v2652_v5, 7 }
 0x18f   :  { %v1884_v11 = vrot.slane %v1872_v55, 2  ;;  %v1838_v17 = vpop.f32.mrf.mxu2  ;;  %v2657_v1 = vsel %vm2656_vm4, %v2655_v0, %v2649_v37  ;;  %v4195_v37 = vld [vmem:[#allocation12 + $0x48] sm:$0xff]  ;;  %v2512_v0 = vld [vmem:[#allocation11 + $0x8] sm:$0xff] }
 0x190   :  { %v2662_v28 = vpack.c.b16 %v2657_v1, %v2657_v1 }
 0x191   :  { %v1900_v46 = vsel %vm1891_vm3, %v1881_v59, %v1884_v11  ;;  %v2159_v44 = vpop.f32.mrf.mxu3 }
 0x192   :  { %v4816_v3 = vadd.f32 %v1900_v46, %v4749_v25  ;;  %2820 = vmatmul.bf16.vlgmr.msrb.gmra.mxu2 %v2662_v28  ;;  %v1855_v51 = vpop.f32.mrf.mxu0  ;;  %v4201_v25 = vld [vmem:[#allocation12 + $0x78] sm:$0xff] }
 0x193   :  { %v1856_v63 = vadd.f32 %v1855_v51, %v1836_v42  ;;  %v1874_v49 = vpop.f32.mrf.mxu1  ;;  %2825 = vmatpush.bf16.msrb.mxu0 %v4201_v25 }
 0x195   :  { %v1875_v12 = vadd.f32 %v1874_v49, %v1856_v63  ;;  %v4194_v49 = vld [vmem:[#allocation12 + $0x40] sm:$0xff] }
 0x197   :  { %v1887_v10 = vrot.slane %v1875_v12, 2  ;;  %v2176_v40 = vpop.f32.mrf.mxu2  ;;  %2826 = vmatpush.bf16.msrb.mxu0 %v4200_v27  ;;  %v4209_v27 = vld [vmem:[#allocation12 + $0xb8] sm:$0xff] }
 0x198   :  { %v2177_v29 = vadd.f32 %v2176_v40, %v2157_v34  ;;  %2838 = vmatpush.bf16.msrb.mxu1 %v4209_v27 }
 0x199   :  { %v1897_v13 = vsel %vm1891_vm3, %v1884_v11, %v1887_v10  ;;  %v2162_v58 = vpop.f32.mrf.mxu3  ;;  %v2515_v11 = vld [vmem:[#allocation11 + $0x20] sm:$0xff] }
 0x19a   :  { %v4821_v14 = vadd.f32 %v1897_v13, %v4757_v32  ;;  %v1857_v15 = vpop.f32.mrf.mxu0 }
 0x19b   :  { %v1858_v50 = vadd.f32 %v1857_v15, %v1838_v17  ;;  %v1876_v48 = vpop.f32.mrf.mxu1  ;;  %2827 = vmatpush.bf16.msrb.mxu0 %v4199_v30 }
 0x19d   :  { %v1877_v19 = vadd.f32 %v1876_v48, %v1858_v50 }
 0x19f   :  { %v1890_v60 = vrot.slane %v1877_v19, 2  ;;  %v2178_v39 = vpop.f32.mrf.mxu2  ;;  %2828 = vmatpush.bf16.msrb.mxu0 %v4198_v38 }
 0x1a0   :  { %v2179_v9 = vadd.f32 %v2178_v39, %v2159_v44 }
 0x1a1   :  { %v1894_v8 = vsel %vm1891_vm3, %v1887_v10, %v1890_v60  ;;  %v1903_v21 = vsel %vm1891_vm3, %v1890_v60, %v1881_v59  ;;  %v2164_v53 = vpop.f32.mrf.mxu3 }
 0x1a2   :  { %v4828_v22 = vadd.f32 %v1894_v8, %v4759_v45  ;;  %v4831_v32 = vadd.f32 %v1903_v21, %v4765_v61  ;;  %v2195_v23 = vpop.f32.mrf.mxu0 }
 0x1a3   :  { %v4833_v7 = vpop.f32.mrf.mxu1  ;;  %v2196_v61 = vadd.f32 %v2195_v23, %v2177_v29  ;;  %2829 = vmatpush.bf16.msrb.mxu0 %v4197_v16  ;;  %v4207_v16 = vld [vmem:[#allocation12 + $0xa8] sm:$0xff] }
 0x1a5   :  { %v2262_v42 = vrot.slane %v2196_v61, 3 }
 0x1a7   :  { %v2181_v33 = vpop.f32.mrf.mxu2  ;;  %2830 = vmatpush.bf16.msrb.mxu0 %v4196_v56 }
 0x1a8   :  { %v2182_v62 = vadd.f32 %v2181_v33, %v2162_v58 }
 0x1a9   :  { %v4835_v26 = vpop.f32.mrf.mxu3 }
 0x1aa   :  { %v2197_v4 = vpop.f32.mrf.mxu0  ;;  %v2234_v56 = vadd.f32 %v4835_v26, %v4833_v7 }
 0x1ab   :  { %v2198_v31 = vadd.f32 %v2197_v4, %v2179_v9  ;;  %v4837_v45 = vpop.f32.mrf.mxu1  ;;  %2831 = vmatpush.bf16.msrb.mxu0 %v4195_v37  ;;  %v4208_v4 = vld [vmem:[#allocation12 + $0xb0] sm:$0xff] }
 0x1ac   :  { %2839 = vmatpush.bf16.msrb.mxu1 %v4208_v4 }
 0x1ad   :  { %v2264_v52 = vrot.slane %v2198_v31, 3 }
 0x1af   :  { %v2183_v35 = vpop.f32.mrf.mxu2  ;;  %v2275_v47 = vsel %vm2270_vm5, %v2262_v42, %v2264_v52  ;;  %2832 = vmatpush.bf16.msrb.mxu0 %v4194_v49 }
 0x1b0   :  { %v2499_v55 = vadd.f32 %v2275_v47, %v4788_v6  ;;  %v2184_v1 = vadd.f32 %v2183_v35, %v2164_v53  ;;  %2840 = vmatpush.bf16.msrb.mxu1 %v4207_v16 }
 0x1b1   :  { %v2235_v43 = vpop.f32.mrf.mxu3 }
 0x1b2   :  { %v2200_v54 = vpop.f32.mrf.mxu0  ;;  %v2518_v44 = vadd.f32 %v2512_v0, %v2499_v55 }
 0x1b3   :  { %v2201_v34 = vadd.f32 %v2200_v54, %v2182_v62  ;;  %v2219_v24 = vpop.f32.mrf.mxu1  ;;  %v2236_v62 = vadd.f32 %v2235_v43, %v4837_v45 }
 0x1b5   :  { %v2266_v5 = vrot.slane %v2201_v34, 3 }
 0x1b7   :  { %v2273_v59 = vsel %vm2270_vm5, %v2264_v52, %v2266_v5  ;;  %v2252_v28 = vpop.f32.mrf.mxu2 }
 0x1b8   :  { %v2500_v17 = vadd.f32 %v2273_v59, %v4799_v18 }
 0x1b9   :  { %v2238_v46 = vpop.f32.mrf.mxu3 }
 0x1ba   :  { %v2521_v51 = vadd.f32 %v2515_v11, %v2500_v17  ;;  %v2202_v63 = vpop.f32.mrf.mxu0  ;;  %v2239_v47 = vadd.f32 %v2238_v46, %v2219_v24  ;;  %v2253_v17 = vadd.f32 %v2252_v28, %v2234_v56 }
 0x1bb   :  { %v2203_v12 = vadd.f32 %v2202_v63, %v2184_v1  ;;  %v4846_v10 = vpop.f32.mrf.mxu1 }
 0x1bc   :  { %v2536_v6 = vmax.f32 %v2518_v44, %v2521_v51  ;;  %v2263_v26 = vrot.slane %v2253_v17, 3 }
 0x1bd   :  { %v2268_v40 = vrot.slane %v2203_v12, 3  ;;  %v4205_v12 = vld [vmem:[#allocation12 + $0x98] sm:$0xff] }
 0x1be   :  { %v2537_v13 = vrot.slane %v2536_v6, 4 }
 0x1bf   :  { %v2271_v58 = vsel %vm2270_vm5, %v2266_v5, %v2268_v40  ;;  %v2277_v18 = vsel %vm2270_vm5, %v2268_v40, %v2262_v42  ;;  %v2254_v21 = vpop.f32.mrf.mxu2  ;;  %v2574_v42 = vperm.slane %v4797_v2, 1 }
 0x1c0   :  { %v2538_v15 = vmax.f32 %v2536_v6, %v2537_v13  ;;  %v2501_v50 = vadd.f32 %v2271_v58, %v4807_v41  ;;  %v2502_v48 = vadd.f32 %v2277_v18, %v4810_v20  ;;  %v2255_v5 = vadd.f32 %v2254_v21, %v2236_v62  ;;  %v4204_v58 = vld [vmem:[#allocation12 + $0x90] sm:$0xff] }
 0x1c1   :  { %v2240_v19 = vpop.f32.mrf.mxu3 }
 0x1c2   :  { %v2539_v25 = vrot.slane %v2538_v15, 2  ;;  %v2524_v60 = vadd.f32 %v2512_v0, %v2501_v50  ;;  %v2527_v39 = vadd.f32 %v2515_v11, %v2502_v48  ;;  %v2442_v8 = vpop.f32.mrf.mxu0  ;;  %v4206_v0 = vld [vmem:[#allocation12 + $0xa0] sm:$0xff]  ;;  %v2265_v43 = vrot.slane %v2255_v5, 3 }
 0x1c3   :  { %v2461_v53 = vpop.f32.mrf.mxu1  ;;  %2841 = vmatpush.bf16.msrb.mxu1 %v4206_v0 }
 0x1c4   :  { %v2557_v23 = vmax.f32 %v2524_v60, %v2527_v39  ;;  %v2540_v30 = vmax.f32 %v2538_v15, %v2539_v25  ;;  %v2462_v55 = vadd.f32 %v2461_v53, %v2442_v8  ;;  %v2276_v18 = vsel %vm2270_vm5, %v2263_v26, %v2265_v43 }
 0x1c5   :  { %v2241_v15 = vadd.f32 %v2240_v19, %v4846_v10  ;;  %v2503_v27 = vadd.f32 %v2276_v18, %v4816_v3 }
 0x1c6   :  { %v2558_v33 = vrot.slane %v2557_v23, 4  ;;  %v2541_v38 = vrot.slane %v2540_v30, 1 }
 0x1c7   :  { %v2257_v35 = vpop.f32.mrf.mxu2  ;;  %2842 = vmatpush.bf16.msrb.mxu1 %v4205_v12 }
 0x1c8   :  { %v2559_v9 = vmax.f32 %v2557_v23, %v2558_v33  ;;  %v2542_v52 = vmax.f32 %v2540_v30, %v2541_v38  ;;  %v2258_v1 = vadd.f32 %v2257_v35, %v2239_v47  ;;  %v4203_v23 = vld [vmem:[#allocation12 + $0x88] sm:$0xff] }
 0x1c9   :  { %v2480_v29 = vpop.f32.mrf.mxu3 }
 0x1ca   :  { %v2560_v31 = vrot.slane %v2559_v9, 2  ;;  %v2444_v41 = vpop.f32.mrf.mxu0  ;;  %v2580_v11 = vadd.f32 %v2574_v42, %v2542_v52  ;;  %v2481_v49 = vadd.f32 %v2480_v29, %v2462_v55  ;;  %v2267_v24 = vrot.slane %v2258_v1, 3 }
 0x1cb   :  { %v2463_v20 = vpop.f32.mrf.mxu1  ;;  %2843 = vmatpush.bf16.msrb.mxu1 %v4204_v58 }
 0x1cc   :  { %v2561_v61 = vmax.f32 %v2559_v9, %v2560_v31  ;;  %v2464_v37 = vadd.f32 %v2463_v20, %v2444_v41  ;;  %v2586_v6 = vpack.c.bf16 %v2580_v11, %v2580_v11  ;;  %v2490_v50 = vrot.slane %v2481_v49, 4  ;;  %v2513_v31 = vld [vmem:[#allocation11 + $0x10] sm:$0xff]  ;;  %v2516_v20 = vld [vmem:[#allocation11 + $0x28] sm:$0xff] }
 0x1cd   :  { %v2274_v39 = vsel %vm2270_vm5, %v2265_v43, %v2267_v24 }
 0x1ce   :  { %v2562_v54 = vrot.slane %v2561_v61, 1  ;;  %v2650_v25 = vunpack.c.l.b16 %v2586_v6  ;;  %v2504_v19 = vadd.f32 %v2274_v39, %v4821_v14  ;;  %v4421_v39 = vmov 0  }
 0x1cf   :  { %v2259_v13 = vpop.f32.mrf.mxu2  ;;  %2844 = vmatpush.bf16.msrb.mxu1 %v4203_v23  ;;  %4226 = vset.pattern.permute.xlu0 %v4421_v39 }
 0x1d0   :  { %v2563_v34 = vmax.f32 %v2561_v61, %v2562_v54  ;;  %v2260_v8 = vadd.f32 %v2259_v13, %v2241_v15  ;;  %v4202_v61 = vld [vmem:[#allocation12 + $0x80] sm:$0xff] }
 0x1d1   :  { %v2482_v59 = vpop.f32.mrf.mxu3 }
 0x1d2   :  { %v2483_v44 = vadd.f32 %v2482_v59, %v2464_v37  ;;  %v2583_v51 = vadd.f32 %v2574_v42, %v2563_v34  ;;  %v2447_v63 = vpop.f32.mrf.mxu0  ;;  %v2269_v29 = vrot.slane %v2260_v8, 3 }
 0x1d3   :  { %v2466_v45 = vpop.f32.mrf.mxu1  ;;  %2845 = vmatpush.bf16.msrb.mxu1 %v4202_v61 }
 0x1d4   :  { %v2589_v7 = vpack.c.bf16 %v2583_v51, %v2583_v51  ;;  %v2491_v46 = vrot.slane %v2483_v44, 4  ;;  %v2467_v40 = vadd.f32 %v2466_v45, %v2447_v63  ;;  %v2272_v14 = vsel %vm2270_vm5, %v2267_v24, %v2269_v29 }
 0x1d5   :  { %v2278_v62 = vsel %vm2270_vm5, %v2269_v29, %v2263_v26  ;;  %v2505_v34 = vadd.f32 %v2272_v14, %v4828_v22 }
 0x1d6   :  { %v2653_v28 = vunpack.c.l.b16 %v2589_v7  ;;  %v2497_v21 = vsel %vm2494_vm6, %v2490_v50, %v2491_v46  ;;  %v2506_v5 = vadd.f32 %v2278_v62, %v4831_v32  ;;  %v2575_v7 = vperm.slane %v4797_v2, 2 }
 0x1d7   :  { %v2507_v9 = vadd.f32 %v2503_v27, %v2497_v21  ;;  %v4227_v21 = vld [vmem:[%s4900_s7] ss:$0 sm:$0xff]  ;;  %s4422_s7 = smov [#allocation14]  }
 0x1d8   :  { %v2658_v60 = vrot.slane %v2653_v28, 7  ;;  %s2881_s29 = sshll.u32 %s4422_s7, 4  ;;  %s2882_s29 = int_to_ptr.vmem [resolvable:$true] %s2881_s29 }
 0x1d9   :  { %v2485_v48 = vpop.f32.mrf.mxu3  ;;  %v2519_v52 = vadd.f32 %v2513_v31, %v2507_v9 }
 0x1da   :  { %v2486_v53 = vadd.f32 %v2485_v48, %v2467_v40  ;;  %v2659_v30 = vsel %vm2656_vm4, %v2658_v60, %v2650_v25  ;;  %v2449_v4 = vpop.f32.mrf.mxu0  ;;  %v2861_v60 = vld [vmem:[#allocation2] sm:$0x1] }
 0x1db   :  { %v2663_v10 = vpack.c.b16 %v2659_v30, %v2659_v30  ;;  %v2468_v38 = vpop.f32.mrf.mxu1  ;;  %2864 = vperm.xlu0 %4226, %v2861_v60  }
 0x1dc   :  { %v2492_v33 = vrot.slane %v2486_v53, 4  ;;  %v2469_v3 = vadd.f32 %v2468_v38, %v2449_v4 }
 0x1dd   :  { %2833 = vmatmul.bf16.vlgmr.msrb.gmra.mxu0 %v2663_v10 }
 0x1de   :  { %v2496_v41 = vsel %vm2494_vm6, %v2491_v46, %v2492_v33 }
 0x1df   :  { %v2508_v16 = vadd.f32 %v2504_v19, %v2496_v41 }
 0x1e1   :  { %v2522_v35 = vadd.f32 %v2516_v20, %v2508_v16  ;;  %v2487_v42 = vpop.f32.mrf.mxu3 }
 0x1e2   :  { %v2488_v54 = vadd.f32 %v2487_v42, %v2469_v3 }
 0x1e3   :  { %v2543_v56 = vmax.f32 %v2519_v52, %v2522_v35 }
 0x1e4   :  { %v2493_v47 = vrot.slane %v2488_v54, 4 }
 0x1e5   :  { %v2544_v55 = vrot.slane %v2543_v56, 4 }
 0x1e6   :  { %v2495_v37 = vsel %vm2494_vm6, %v2492_v33, %v2493_v47  ;;  %v2498_v0 = vsel %vm2494_vm6, %v2493_v47, %v2490_v50  ;;  %v4228_v33 = vld [vmem:[%s4901_s8] ss:$0 sm:$0xff] }
 0x1e7   :  { %v2545_v59 = vmax.f32 %v2543_v56, %v2544_v55  ;;  %v2509_v11 = vadd.f32 %v2505_v34, %v2495_v37  ;;  %v2510_v17 = vadd.f32 %v2506_v5, %v2498_v0 }
 0x1e9   :  { %v2546_v1 = vrot.slane %v2545_v59, 2  ;;  %v2525_v44 = vadd.f32 %v2513_v31, %v2509_v11  ;;  %v2528_v51 = vadd.f32 %v2516_v20, %v2510_v17  ;;  %v2871_v31 = vand.u32 127, %v825_v36 }
 0x1eb   :  { %v2547_v63 = vmax.f32 %v2545_v59, %v2546_v1  ;;  %v2564_v45 = vmax.f32 %v2525_v44, %v2528_v51 }
 0x1ed   :  { %v2565_v43 = vrot.slane %v2564_v45, 4  ;;  %v2548_v49 = vrot.slane %v2547_v63, 1 }
 0x1ef   :  { %v2566_v22 = vmax.f32 %v2564_v45, %v2565_v43  ;;  %v2549_v32 = vmax.f32 %v2547_v63, %v2548_v49 }
 0x1f1   :  { %v2567_v12 = vrot.slane %v2566_v22, 2  ;;  %v2581_v57 = vadd.f32 %v2575_v7, %v2549_v32 }
 0x1f3   :  { %v2568_v6 = vmax.f32 %v2566_v22, %v2567_v12  ;;  %v2587_v40 = vpack.c.bf16 %v2581_v57, %v2581_v57 }
 0x1f5   :  { %v2569_v26 = vrot.slane %v2568_v6, 1  ;;  %v2651_v58 = vunpack.c.l.b16 %v2587_v40 }
 0x1f7   :  { %v2570_v24 = vmax.f32 %v2568_v6, %v2569_v26 }
 0x1f9   :  { %v2584_v46 = vadd.f32 %v2575_v7, %v2570_v24 }
 0x1fb   :  { %v2590_v13 = vpack.c.bf16 %v2584_v46, %v2584_v46 }
 0x1fd   :  { %v2654_v28 = vunpack.c.l.b16 %v2590_v13 }
 0x1ff   :  { %v2660_v18 = vrot.slane %v2654_v28, 7 }
 0x201   :  { %v2661_v15 = vsel %vm2656_vm4, %v2660_v18, %v2651_v58 }
 0x202   :  { %v2664_v50 = vpack.c.b16 %v2661_v15, %v2661_v15 }
 0x204   :  { %2846 = vmatmul.bf16.vlgmr.msrb.gmra.mxu1 %v2664_v50 }
 0x215   :  { %v2821_v48 = vpop.f32.mrf.mxu2 }
 0x216   :  { %v2822_v53 = vadd.f32 %v4227_v21, %v2821_v48 }
 0x21d   :  { %v2823_v25 = vpop.f32.mrf.mxu2 }
 0x24d   :  { %v2865_v38 = vpop.permute.xlu0 %2864 }
 0x24e   :  { %v2867_v29 = vperm.slane %v2865_v38, 0 }
 0x25a   :  { %v2834_v2 = vpop.f32.mrf.mxu0 }
 0x25b   :  { %v2835_v23 = vadd.f32 %v2834_v2, %v2822_v53 }
 0x262   :  { %v2836_v8 = vpop.f32.mrf.mxu0 }
 0x281   :  { %v2847_v27 = vpop.f32.mrf.mxu1 }
 0x282   :  { %v2848_v30 = vadd.f32 %v2847_v27, %v2835_v23 }
 0x284   :  { %v2851_v10 = vmax.f32 %v2848_v30, 0.0 }
 0x286   :  { %v2856_v19 = vmul.f32 %v4228_v33, %v2851_v10 }
 0x288   :  { %v2858_v9 = vsel %vm2857_vm7, %v2856_v19, 0.0 }
 0x289   :  { %v2849_v4 = vpop.f32.mrf.mxu1  ;;  %2859 = vadd.xlane.f32.xlu0 %v2858_v9 }
 0x2fc   :  { %v2860_v41 = vpop.xlane.xlu0 %2859 }
 0x2fd   :  { %v2868_v20 = vadd.f32 %v2867_v29, %v2860_v41 }
 0x2ff   :  { %v2872_v61 = vperm.slane %v2868_v20, %v2871_v31 }
 0x301   :  { %2875 = vst.msk [vmem:[#allocation14] sm:$0x1] %vm2874_vm8, %v2872_v61 }
 0x302   :  { %2886 = dma.vmem_to_hbm [thread:$0]  %s2882_s29, 16, %s2884_s11, [#allocation5]  }
 0x303   :  { %4405 = dma.done.wait [#allocation5], 16  }
 0x304   :  { %4406 = vsyncadd [#allocation5], 4294967280 }
 0x305   :  { %2891 = vsyncpa [#allocation4], 1 }
 0x306   :  { %2892 = vsyncpa [#allocation7], 1 }
 0x307   :  { %2893 = vsyncpa [#allocation10], 1 }
 0x308   :  { %2894 = vsyncpa [#allocation13], 1 }
 0x309   :  { %2895 = vsyncpa [#allocation5], 1 }

// kernel: tpu_custom_call.1
= control target key start
LH: loop header
LB: loop body
LE: loop exit
PB: predicated region body
PF: predicated region fallthrough
CT: control target
= control target key end

     0   :  { %s4916_s0 = inlined_call_operand.hbm [shape: bf16[2,16,300], index: 0, kind: input, shape index: {}]   ;;  %s4917_s1 = inlined_call_operand.hbm [shape: bf16[3,300,384], index: 1, kind: input, shape index: {}]   ;;  %s4918_s2 = inlined_call_operand.hbm [shape: bf16[300,256], index: 2, kind: input, shape index: {}]   ;;  %s4919_s3 = inlined_call_operand.hbm [shape: bf16[300,128], index: 3, kind: input, shape index: {}]   ;;  %s4920_s4 = inlined_call_operand.vmem [shape: f32[1,384], index: 4, kind: input, shape index: {}]   ;;  %s4921_s5 = inlined_call_operand.hbm [shape: f32[16,384], index: 5, kind: input, shape index: {}]   ;;  %s4922_s6 = inlined_call_operand.hbm [shape: bf16[384,128], index: 6, kind: input, shape index: {}]   ;;  %s4923_s7 = inlined_call_operand.vmem [shape: f32[1,128], index: 7, kind: input, shape index: {}]   ;;  %s4924_s8 = inlined_call_operand.vmem [shape: f32[1,128], index: 8, kind: input, shape index: {}]   ;;  %s4925_s9 = inlined_call_operand.<no memory space> [shape: f32[1,1], index: 9, kind: input, shape index: {}]   ;;  %s4926_s10 = inlined_call_operand.hbm [shape: f32[1,1,2], index: 10, kind: output, shape index: {}]  }
   0x1   :  { %v15_v0 = vstv %s4925_s9 }
   0x2   :  { %16 = vst [vmem:[#allocation2] sm:$0x1] %v15_v0 }
   0x3   :  { %17 = vsyncpa [#allocation4], 0 }
   0x4   :  { %18 = vsyncpa [#allocation7], 0 }
   0x5   :  { %19 = vsyncpa [#allocation10], 0 }
   0x6   :  { %20 = vsyncpa [#allocation13], 0 }
   0x7   :  { %21 = vsyncpa [#allocation5], 0  ;;  %s39_s17 = sshll.u32 %s4917_s1, 4  ;;  %s4476_s18 = smov [#allocation6]   ;;  %s40_s17 = int_to_ptr.hbm [resolvable:$true] %s39_s17 }
   0x8   :  { %s41_s19 = sshll.u32 %s4476_s18, 4  ;;  %s65_s22 = sshll.u32 %s4919_s3, 4  ;;  %s42_s19 = int_to_ptr.vmem [resolvable:$true] %s41_s19  ;;  %s66_s22 = int_to_ptr.hbm [resolvable:$true] %s65_s22 }
   0x9   :  { %s4477_s23 = smov 192   ;;  %s4478_s9 = smov 12  }
   0xa   :  { %47 = dma.hbm_to_vmem [thread:$0]  %s40_s17, 21888, %s42_s19, [#allocation7], %s4477_s23, %s4477_s23, %s4478_s9  }
   0xb   :  { %s4479_s24 = smov [#allocation9]   ;;  %s4480_s26 = smov 64  }
   0xc   :  { %s67_s25 = sshll.u32 %s4479_s24, 4  ;;  %s4481_s27 = smov 4   ;;  %s68_s25 = int_to_ptr.vmem [resolvable:$true] %s67_s25 }
   0xd   :  { %73 = dma.hbm_to_vmem [thread:$0]  %s66_s22, 2432, %s68_s25, [#allocation10], %s4480_s26, %s4480_s26, %s4481_s27  }
   0xe   :  { %s26_s29 = sshll.u32 %s4916_s0, 4  ;;  %s4482_s30 = smov [#allocation3]   ;;  %s27_s29 = int_to_ptr.hbm [resolvable:$true] %s26_s29 }
   0xf   :  { %s28_s3 = sshll.u32 %s4482_s30, 4  ;;  %s52_s13 = sshll.u32 %s4918_s2, 4  ;;  %s29_s3 = int_to_ptr.vmem [resolvable:$true] %s28_s3  ;;  %s53_s13 = int_to_ptr.hbm [resolvable:$true] %s52_s13 }
  0x10   :  { %34 = dma.hbm_to_vmem [thread:$0]  %s27_s29, 768, %s29_s3, [#allocation4], %s4477_s23, %s4477_s23, %s4478_s9  }
  0x11   :  { %s4483_s14 = smov [#allocation8]   ;;  %s4484_s16 = smov 128  }
  0x12   :  { %s54_s15 = sshll.u32 %s4483_s14, 4  ;;  %s4485_s17 = smov 8   ;;  %s55_s15 = int_to_ptr.vmem [resolvable:$true] %s54_s15 }
  0x13   :  { %60 = dma.hbm_to_vmem [thread:$0]  %s53_s13, 4864, %s55_s15, [#allocation7], %s4484_s16, %s4484_s16, %s4485_s17  }
  0x14   :  { %s80_s0 = sshll.u32 %s4921_s5, 4  ;;  %s4486_s20 = smov [#allocation11]   ;;  %s81_s0 = int_to_ptr.hbm [resolvable:$true] %s80_s0 }
  0x15   :  { %s82_s21 = sshll.u32 %s4486_s20, 4  ;;  %s93_s2 = sshll.u32 %s4922_s6, 4  ;;  %s83_s21 = int_to_ptr.vmem [resolvable:$true] %s82_s21  ;;  %s94_s2 = int_to_ptr.hbm [resolvable:$true] %s93_s2 }
  0x16   :  { %s4487_s23 = smov 384   ;;  %s4488_s9 = smov 24  }
  0x17   :  { %88 = dma.hbm_to_vmem [thread:$0]  %s81_s0, 768, %s83_s21, [#allocation10], %s4487_s23, %s4487_s23, %s4488_s9  }
  0x18   :  { %s4489_s25 = smov [#allocation12]  }
  0x19   :  { %s95_s1 = sshll.u32 %s4489_s25, 4  ;;  %s96_s1 = int_to_ptr.vmem [resolvable:$true] %s95_s1 }
  0x1a   :  { %101 = dma.hbm_to_vmem [thread:$0]  %s94_s2, 3072, %s96_s1, [#allocation13], %s4480_s26, %s4480_s26, %s4481_s27  }
  0x1b   :  { %4466 = dma.done.wait [#allocation4], 768  }
  0x1c   :  { %4467 = vsyncadd [#allocation4], 4294966528 }
  0x1d   :  { %4468 = dma.done.wait [#allocation7], 26752  }
  0x1e   :  { %4469 = vsyncadd [#allocation7], 4294940544 }
  0x1f   :  { %4470 = dma.done.wait [#allocation10], 3200  }
  0x20   :  { %4471 = vsyncadd [#allocation10], 4294964096 }
  0x21   :  { %4472 = dma.done.wait [#allocation13], 3072  }
  0x22   :  { %4473 = vsyncadd [#allocation13], 4294964224  ;;  %vm632_vm0 = vcmask 1045504   ;;  %v3075_v1 = vld [vmem:[#allocation6 + $0x270] sm:$0xf]  ;;  %vm625_vm1 = vcmask 359424  }
  0x23   :  { %v4106_v2 = vld [vmem:[#allocation6 + $0x278] sm:$0xf0]  ;;  %v3171_v3 = vld [vmem:[#allocation6 + $0x330] sm:$0xf]  ;;  %v4105_v6 = vld [vmem:[#allocation6 + $0x274] sm:$0xf] }
  0x24   :  { %v3076_v4 = vor.u32 %v4106_v2, %v3075_v1  ;;  %v4130_v5 = vld [vmem:[#allocation6 + $0x338] sm:$0xf0]  ;;  %v3077_v7 = vld [vmem:[#allocation6 + $0x27c] sm:$0xf0]  ;;  %v3207_v10 = vld [vmem:[#allocation6 + $0x378] sm:$0xf] }
  0x25   :  { %v3172_v8 = vor.u32 %v4130_v5, %v3171_v3  ;;  %v3080_v9 = vor.u32 %v4105_v6, %v3077_v7  ;;  %v4139_v11 = vld [vmem:[#allocation6 + $0x380] sm:$0x30]  ;;  %v3063_v12 = vld [vmem:[#allocation6 + $0x258] sm:$0xf]  ;;  %v4102_v19 = vld [vmem:[#allocation6 + $0x25c] sm:$0xf] }
  0x26   :  { %642 = vmatpush.bf16.msra.mxu0 %v3076_v4  ;;  %v3208_v13 = vor.u32 %v4139_v11, %v3207_v10  ;;  %v4103_v14 = vld [vmem:[#allocation6 + $0x260] sm:$0xf0]  ;;  %v3159_v15 = vld [vmem:[#allocation6 + $0x318] sm:$0xf]  ;;  %v3065_v20 = vld [vmem:[#allocation6 + $0x264] sm:$0xf0] }
  0x27   :  { %v4127_v16 = vld [vmem:[#allocation6 + $0x320] sm:$0xf0]  ;;  %661 = vmatpush.bf16.msra.mxu1 %v3172_v8  ;;  %699 = vmatpush.bf16.msra.mxu3 %v3080_v9  ;;  %v3064_v17 = vor.u32 %v4103_v14, %v3063_v12  ;;  %v3195_v21 = vld [vmem:[#allocation6 + $0x360] sm:$0xf]  ;;  %v3068_v23 = vor.u32 %v4102_v19, %v3065_v20  ;;  %v4136_v24 = vld [vmem:[#allocation6 + $0x368] sm:$0xf0] }
  0x28   :  { %v3160_v18 = vor.u32 %v4127_v16, %v3159_v15  ;;  %v634_v22 = vsel %vm632_vm0, %v3208_v13, 0  ;;  %v3051_v25 = vld [vmem:[#allocation6 + $0x240] sm:$0xf]  ;;  %v3196_v26 = vor.u32 %v4136_v24, %v3195_v21  ;;  %v4100_v27 = vld [vmem:[#allocation6 + $0x248] sm:$0xf0]  ;;  %vm825_vm2 = vcmask 1046528  }
  0x29   :  { %685 = vmatpush.bf16.msra.mxu2 %v634_v22  ;;  %v3147_v28 = vld [vmem:[#allocation6 + $0x300] sm:$0xf]  ;;  %v4124_v29 = vld [vmem:[#allocation6 + $0x308] sm:$0xf0]  ;;  %v3052_v30 = vor.u32 %v4100_v27, %v3051_v25  ;;  %v4099_v31 = vld [vmem:[#allocation6 + $0x244] sm:$0xf] }
  0x2a   :  { %643 = vmatpush.bf16.msra.mxu0 %v3064_v17  ;;  %v3053_v32 = vld [vmem:[#allocation6 + $0x24c] sm:$0xf0]  ;;  %v3183_v33 = vld [vmem:[#allocation6 + $0x348] sm:$0xf]  ;;  %v3148_v34 = vor.u32 %v4124_v29, %v3147_v28  ;;  %v4133_v36 = vld [vmem:[#allocation6 + $0x350] sm:$0xf0] }
  0x2b   :  { %662 = vmatpush.bf16.msra.mxu1 %v3160_v18  ;;  %700 = vmatpush.bf16.msra.mxu3 %v3068_v23  ;;  %v3056_v35 = vor.u32 %v4099_v31, %v3053_v32  ;;  %v3039_v37 = vld [vmem:[#allocation6 + $0x228] sm:$0xf]  ;;  %v4097_v38 = vld [vmem:[#allocation6 + $0x230] sm:$0xf0]  ;;  %v2975_v41 = vld [vmem:[#allocation3 + $0x8] sm:$0xf]  ;;  %v3184_v42 = vor.u32 %v4133_v36, %v3183_v33 }
  0x2c   :  { %v3135_v39 = vld [vmem:[#allocation6 + $0x2e8] sm:$0xf]  ;;  %v4121_v40 = vld [vmem:[#allocation6 + $0x2f0] sm:$0xf0]  ;;  %v4023_v43 = vld [vmem:[#allocation3 + $0x10] sm:$0xf0]  ;;  %v3040_v46 = vor.u32 %v4097_v38, %v3039_v37 }
  0x2d   :  { %686 = vmatpush.bf16.msra.mxu2 %v3196_v26  ;;  %v4096_v44 = vld [vmem:[#allocation6 + $0x22c] sm:$0xf]  ;;  %v3041_v45 = vld [vmem:[#allocation6 + $0x234] sm:$0xf0]  ;;  %v4129_v47 = vld [vmem:[#allocation6 + $0x334] sm:$0xf]  ;;  %v3136_v50 = vor.u32 %v4121_v40, %v3135_v39  ;;  %v4575_v56 = vor.u32 %v4023_v43, %v2975_v41 }
  0x2e   :  { %644 = vmatpush.bf16.msra.mxu0 %v3052_v30  ;;  %v3173_v48 = vld [vmem:[#allocation6 + $0x33c] sm:$0xf0]  ;;  %v3027_v49 = vld [vmem:[#allocation6 + $0x210] sm:$0xf]  ;;  %v3044_v51 = vor.u32 %v4096_v44, %v3041_v45  ;;  %v4094_v53 = vld [vmem:[#allocation6 + $0x218] sm:$0xf0] }
  0x2f   :  { %663 = vmatpush.bf16.msra.mxu1 %v3148_v34  ;;  %701 = vmatpush.bf16.msra.mxu3 %v3056_v35  ;;  %v3176_v52 = vor.u32 %v4129_v47, %v3173_v48  ;;  %v3123_v54 = vld [vmem:[#allocation6 + $0x2d0] sm:$0xf]  ;;  %v4118_v55 = vld [vmem:[#allocation6 + $0x2d8] sm:$0xf0]  ;;  %v4093_v57 = vld [vmem:[#allocation6 + $0x214] sm:$0xf]  ;;  %v3028_v61 = vor.u32 %v4094_v53, %v3027_v49 }
  0x30   :  { %v3029_v58 = vld [vmem:[#allocation6 + $0x21c] sm:$0xf0]  ;;  %v4126_v59 = vld [vmem:[#allocation6 + $0x31c] sm:$0xf]  ;;  %v3161_v60 = vld [vmem:[#allocation6 + $0x324] sm:$0xf0]  ;;  %v3124_v1 = vor.u32 %v4118_v55, %v3123_v54 }
  0x31   :  { %687 = vmatpush.bf16.msra.mxu2 %v3184_v42  ;;  %v3164_v62 = vor.u32 %v4126_v59, %v3161_v60  ;;  %v3015_v63 = vld [vmem:[#allocation6 + $0x1f8] sm:$0xf]  ;;  %v4091_v0 = vld [vmem:[#allocation6 + $0x200] sm:$0xf0]  ;;  %v3032_v2 = vor.u32 %v4093_v57, %v3029_v58  ;;  %v3149_v5 = vld [vmem:[#allocation6 + $0x30c] sm:$0xf0] }
  0x32   :  { %645 = vmatpush.bf16.msra.mxu0 %v3040_v46  ;;  %v3111_v3 = vld [vmem:[#allocation6 + $0x2b8] sm:$0xf]  ;;  %v4123_v4 = vld [vmem:[#allocation6 + $0x304] sm:$0xf]  ;;  %v4090_v7 = vld [vmem:[#allocation6 + $0x1fc] sm:$0xf]  ;;  %v3016_v9 = vor.u32 %v4091_v0, %v3015_v63 }
  0x33   :  { %664 = vmatpush.bf16.msra.mxu1 %v3136_v50  ;;  %702 = vmatpush.bf16.msra.mxu3 %v3044_v51  ;;  %v4115_v6 = vld [vmem:[#allocation6 + $0x2c0] sm:$0xf0]  ;;  %v3017_v8 = vld [vmem:[#allocation6 + $0x204] sm:$0xf0]  ;;  %v3152_v10 = vor.u32 %v4123_v4, %v3149_v5  ;;  %v3003_v11 = vld [vmem:[#allocation6 + $0x1e0] sm:$0xf] }
  0x34   :  { %3217 = vmatmul.msk.bf16.vlgmr.msra.gmra.mxu2 %vm625_vm1, %v4575_v56  ;;  %v4088_v12 = vld [vmem:[#allocation6 + $0x1e8] sm:$0xf0]  ;;  %v3112_v13 = vor.u32 %v4115_v6, %v3111_v3  ;;  %v3020_v14 = vor.u32 %v4090_v7, %v3017_v8  ;;  %v3099_v15 = vld [vmem:[#allocation6 + $0x2a0] sm:$0xf]  ;;  %v3137_v17 = vld [vmem:[#allocation6 + $0x2f4] sm:$0xf0] }
  0x35   :  { %718 = vmatpush.bf16.msrb.mxu2 %v3176_v52  ;;  %v4120_v16 = vld [vmem:[#allocation6 + $0x2ec] sm:$0xf]  ;;  %v4087_v19 = vld [vmem:[#allocation6 + $0x1e4] sm:$0xf]  ;;  %v3005_v20 = vld [vmem:[#allocation6 + $0x1ec] sm:$0xf0]  ;;  %v3004_v22 = vor.u32 %v4088_v12, %v3003_v11 }
  0x36   :  { %646 = vmatpush.bf16.msra.mxu0 %v3028_v61  ;;  %v4112_v18 = vld [vmem:[#allocation6 + $0x2a8] sm:$0xf0]  ;;  %v2991_v21 = vld [vmem:[#allocation6 + $0x1c8] sm:$0xf]  ;;  %v3140_v23 = vor.u32 %v4120_v16, %v3137_v17  ;;  %v4085_v24 = vld [vmem:[#allocation6 + $0x1d0] sm:$0xf0]  ;;  %v3008_v28 = vor.u32 %v4087_v19, %v3005_v20 }
  0x37   :  { %665 = vmatpush.bf16.msra.mxu1 %v3124_v1  ;;  %703 = vmatpush.bf16.msra.mxu3 %v3032_v2  ;;  %v3087_v25 = vld [vmem:[#allocation6 + $0x288] sm:$0xf]  ;;  %v4109_v26 = vld [vmem:[#allocation6 + $0x290] sm:$0xf0]  ;;  %v3100_v27 = vor.u32 %v4112_v18, %v3099_v15  ;;  %v2987_v29 = vld [vmem:[#allocation3 + $0x20] sm:$0xf]  ;;  %v2992_v40 = vor.u32 %v4085_v24, %v2991_v21 }
  0x38   :  { %v4026_v30 = vld [vmem:[#allocation3 + $0x28] sm:$0xf0]  ;;  %v4084_v31 = vld [vmem:[#allocation6 + $0x1cc] sm:$0xf]  ;;  %v4117_v32 = vld [vmem:[#allocation6 + $0x2d4] sm:$0xf]  ;;  %v3088_v45 = vor.u32 %v4109_v26, %v3087_v25 }
  0x39   :  { %719 = vmatpush.bf16.msrb.mxu2 %v3164_v62  ;;  %v3125_v33 = vld [vmem:[#allocation6 + $0x2dc] sm:$0xf0]  ;;  %v2993_v34 = vld [vmem:[#allocation6 + $0x1d4] sm:$0xf0]  ;;  %v2967_v35 = vld [vmem:[#allocation3] sm:$0xf]  ;;  %v4579_v49 = vor.u32 %v4026_v30, %v2987_v29 }
  0x3a   :  { %647 = vmatpush.bf16.msra.mxu0 %v3016_v9  ;;  %v3179_v36 = vld [vmem:[#allocation6 + $0x338] sm:$0xf]  ;;  %v4131_v37 = vld [vmem:[#allocation6 + $0x340] sm:$0xf0]  ;;  %v4138_v38 = vld [vmem:[#allocation6 + $0x37c] sm:$0xf]  ;;  %v3128_v41 = vor.u32 %v4117_v32, %v3125_v33  ;;  %v2996_v46 = vor.u32 %v4084_v31, %v2993_v34 }
  0x3b   :  { %666 = vmatpush.bf16.msra.mxu1 %v3112_v13  ;;  %704 = vmatpush.bf16.msra.mxu3 %v3020_v14  ;;  %v3209_v39 = vld [vmem:[#allocation6 + $0x384] sm:$0x30]  ;;  %v4022_v42 = vld [vmem:[#allocation3 + $0x8] sm:$0xf0]  ;;  %v3083_v43 = vld [vmem:[#allocation6 + $0x278] sm:$0xf]  ;;  %v3180_v50 = vor.u32 %v4131_v37, %v3179_v36 }
  0x3c   :  { %v4107_v44 = vld [vmem:[#allocation6 + $0x280] sm:$0xf0]  ;;  %v4021_v47 = vld [vmem:[#allocation3 + $0x4] sm:$0xf]  ;;  %v2969_v48 = vld [vmem:[#allocation3 + $0xc] sm:$0xf0]  ;;  %v3212_v53 = vor.u32 %v4138_v38, %v3209_v39  ;;  %v4581_v54 = vor.u32 %v4022_v42, %v2967_v35 }
  0x3d   :  { %720 = vmatpush.bf16.msrb.mxu2 %v3152_v10  ;;  %v4114_v51 = vld [vmem:[#allocation6 + $0x2bc] sm:$0xf]  ;;  %v3113_v52 = vld [vmem:[#allocation6 + $0x2c4] sm:$0xf0]  ;;  %v3084_v55 = vor.u32 %v4107_v44, %v3083_v43  ;;  %v3167_v57 = vld [vmem:[#allocation6 + $0x320] sm:$0xf]  ;;  %v4583_v59 = vor.u32 %v4021_v47, %v2969_v48 }
  0x3e   :  { %648 = vmatpush.bf16.msra.mxu0 %v3004_v22  ;;  %v4128_v58 = vld [vmem:[#allocation6 + $0x328] sm:$0xf0]  ;;  %v3071_v60 = vld [vmem:[#allocation6 + $0x260] sm:$0xf]  ;;  %v3116_v62 = vor.u32 %v4114_v51, %v3113_v52  ;;  %v4111_v63 = vld [vmem:[#allocation6 + $0x2a4] sm:$0xf] }
  0x3f   :  { %667 = vmatpush.bf16.msra.mxu1 %v3100_v27  ;;  %705 = vmatpush.bf16.msra.mxu3 %v3008_v28  ;;  %v4104_v61 = vld [vmem:[#allocation6 + $0x268] sm:$0xf0]  ;;  %v3101_v0 = vld [vmem:[#allocation6 + $0x2ac] sm:$0xf0]  ;;  %v637_v1 = vsel %vm632_vm0, %v3212_v53, 0  ;;  %v3168_v2 = vor.u32 %v4128_v58, %v3167_v57  ;;  %vm2725_vm3 = vcmask 1041409  }
  0x40   :  { %v4135_v3 = vld [vmem:[#allocation6 + $0x364] sm:$0xf]  ;;  %v3197_v4 = vld [vmem:[#allocation6 + $0x36c] sm:$0xf0]  ;;  %v3072_v5 = vor.u32 %v4104_v61, %v3071_v60  ;;  %v3155_v6 = vld [vmem:[#allocation6 + $0x308] sm:$0xf]  ;;  %v3104_v10 = vor.u32 %v4111_v63, %v3101_v0 }
  0x41   :  { %721 = vmatpush.bf16.msrb.mxu2 %v3140_v23  ;;  %v4125_v7 = vld [vmem:[#allocation6 + $0x310] sm:$0xf0]  ;;  %v3059_v8 = vld [vmem:[#allocation6 + $0x248] sm:$0xf]  ;;  %v3200_v11 = vor.u32 %v4135_v3, %v3197_v4  ;;  %v4108_v13 = vld [vmem:[#allocation6 + $0x28c] sm:$0xf] }
  0x42   :  { %649 = vmatpush.bf16.msra.mxu0 %v2992_v40  ;;  %v4101_v9 = vld [vmem:[#allocation6 + $0x250] sm:$0xf0]  ;;  %v3156_v12 = vor.u32 %v4125_v7, %v3155_v6  ;;  %v3089_v14 = vld [vmem:[#allocation6 + $0x294] sm:$0xf0]  ;;  %v3143_v16 = vld [vmem:[#allocation6 + $0x2f0] sm:$0xf] }
  0x43   :  { %668 = vmatpush.bf16.msra.mxu1 %v3088_v45  ;;  %706 = vmatpush.bf16.msra.mxu3 %v2996_v46  ;;  %v3060_v15 = vor.u32 %v4101_v9, %v3059_v8  ;;  %v4122_v17 = vld [vmem:[#allocation6 + $0x2f8] sm:$0xf0]  ;;  %v4132_v18 = vld [vmem:[#allocation6 + $0x34c] sm:$0xf]  ;;  %v3047_v19 = vld [vmem:[#allocation6 + $0x230] sm:$0xf]  ;;  %v3092_v22 = vor.u32 %v4108_v13, %v3089_v14 }
  0x44   :  { %3218 = vmatmul.msk.bf16.gmra.mxu2 %vm625_vm1, %v4579_v49  ;;  %v4098_v20 = vld [vmem:[#allocation6 + $0x238] sm:$0xf0]  ;;  %v3185_v21 = vld [vmem:[#allocation6 + $0x354] sm:$0xf0]  ;;  %v3215_v24 = vld [vmem:[#allocation6 + $0x380] sm:$0xf]  ;;  %v3144_v25 = vor.u32 %v4122_v17, %v3143_v16 }
  0x45   :  { %722 = vmatpush.bf16.msrb.mxu2 %v3128_v41  ;;  %650 = vmatmul.bf16.vlgmr.msra.gmra.mxu0 %v4581_v54  ;;  %v3188_v23 = vor.u32 %v4132_v18, %v3185_v21  ;;  %v2979_v26 = vld [vmem:[#allocation3 + $0x18] sm:$0xf]  ;;  %v4025_v27 = vld [vmem:[#allocation3 + $0x20] sm:$0xf0]  ;;  %v3131_v28 = vld [vmem:[#allocation6 + $0x2d8] sm:$0xf]  ;;  %v3048_v30 = vor.u32 %v4098_v20, %v3047_v19 }
  0x46   :  { %669 = vmatmul.bf16.vlgmr.msra.gmra.mxu1 %v4583_v59  ;;  %707 = vmatmul.bf16.vlgmr.msra.gmra.mxu3 %v4581_v54  ;;  %v4140_v29 = vld [vmem:[#allocation6 + $0x388] sm:$0x30]  ;;  %v4119_v31 = vld [vmem:[#allocation6 + $0x2e0] sm:$0xf0]  ;;  %v3309_v33 = vld [vmem:[#allocation6 + $0xa8] sm:$0xf]  ;;  %v4592_v46 = vor.u32 %v4025_v27, %v2979_v26 }
  0x47   :  { %775 = vmatpush.bf16.msrb.mxu3 %v3180_v50  ;;  %756 = vmatpush.bf16.msrb.mxu1 %v3084_v55  ;;  %v3216_v32 = vor.u32 %v4140_v29, %v3215_v24  ;;  %v4049_v34 = vld [vmem:[#allocation6 + $0xb0] sm:$0xf0]  ;;  %v4024_v35 = vld [vmem:[#allocation3 + $0x1c] sm:$0xf]  ;;  %v3035_v36 = vld [vmem:[#allocation6 + $0x218] sm:$0xf]  ;;  %v3132_v42 = vor.u32 %v4119_v31, %v3131_v28 }
  0x48   :  { %742 = vmatpush.bf16.msrb.mxu0 %v637_v1  ;;  %v4095_v37 = vld [vmem:[#allocation6 + $0x220] sm:$0xf0]  ;;  %v3310_v38 = vor.u32 %v4049_v34, %v3309_v33  ;;  %v2981_v39 = vld [vmem:[#allocation3 + $0x24] sm:$0xf0]  ;;  %v3297_v41 = vld [vmem:[#allocation6 + $0x90] sm:$0xf] }
  0x49   :  { %723 = vmatpush.bf16.msrb.mxu2 %v3116_v62  ;;  %v640_v40 = vsel %vm632_vm0, %v3216_v32, 0  ;;  %v4046_v43 = vld [vmem:[#allocation6 + $0x98] sm:$0xf0]  ;;  %v3203_v44 = vld [vmem:[#allocation6 + $0x368] sm:$0xf]  ;;  %v3036_v47 = vor.u32 %v4095_v37, %v3035_v36  ;;  %v4594_v51 = vor.u32 %v4024_v35, %v2981_v39  ;;  %vm2315_vm4 = vcmask 1044480  }
  0x4a   :  { %v4137_v45 = vld [vmem:[#allocation6 + $0x370] sm:$0xf0]  ;;  %v3119_v48 = vld [vmem:[#allocation6 + $0x2c0] sm:$0xf]  ;;  %v4116_v50 = vld [vmem:[#allocation6 + $0x2c8] sm:$0xf0]  ;;  %v3298_v57 = vor.u32 %v4046_v43, %v3297_v41 }
  0x4b   :  { %776 = vmatpush.bf16.msrb.mxu3 %v3168_v2  ;;  %757 = vmatpush.bf16.msrb.mxu1 %v3072_v5  ;;  %v3023_v52 = vld [vmem:[#allocation6 + $0x200] sm:$0xf]  ;;  %v4092_v53 = vld [vmem:[#allocation6 + $0x208] sm:$0xf0]  ;;  %v3107_v55 = vld [vmem:[#allocation6 + $0x2a8] sm:$0xf]  ;;  %v3204_v58 = vor.u32 %v4137_v45, %v3203_v44  ;;  %v3120_v61 = vor.u32 %v4116_v50, %v3119_v48 }
  0x4c   :  { %743 = vmatpush.bf16.msrb.mxu0 %v3200_v11  ;;  %v3285_v60 = vld [vmem:[#allocation6 + $0x78] sm:$0xf]  ;;  %v4043_v62 = vld [vmem:[#allocation6 + $0x80] sm:$0xf0]  ;;  %v3191_v63 = vld [vmem:[#allocation6 + $0x350] sm:$0xf]  ;;  %v3024_v1 = vor.u32 %v4092_v53, %v3023_v52 }
  0x4d   :  { %724 = vmatpush.bf16.msrb.mxu2 %v3104_v10  ;;  %v4134_v0 = vld [vmem:[#allocation6 + $0x358] sm:$0xf0]  ;;  %v4113_v2 = vld [vmem:[#allocation6 + $0x2b0] sm:$0xf0]  ;;  %v4048_v3 = vld [vmem:[#allocation6 + $0xac] sm:$0xf]  ;;  %v3286_v9 = vor.u32 %v4043_v62, %v3285_v60 }
  0x4e   :  { %v3311_v4 = vld [vmem:[#allocation6 + $0xb4] sm:$0xf0]  ;;  %v3011_v5 = vld [vmem:[#allocation6 + $0x1e8] sm:$0xf]  ;;  %v4089_v6 = vld [vmem:[#allocation6 + $0x1f0] sm:$0xf0]  ;;  %v3192_v10 = vor.u32 %v4134_v0, %v3191_v63  ;;  %v3108_v11 = vor.u32 %v4113_v2, %v3107_v55 }
  0x4f   :  { %777 = vmatpush.bf16.msrb.mxu3 %v3156_v12  ;;  %758 = vmatpush.bf16.msrb.mxu1 %v3060_v15  ;;  %v3441_v7 = vld [vmem:[#allocation6 + $0x1b0] sm:$0xf]  ;;  %v4082_v8 = vld [vmem:[#allocation6 + $0x1b8] sm:$0x30]  ;;  %v3273_v13 = vld [vmem:[#allocation6 + $0x60] sm:$0xf]  ;;  %v3314_v15 = vor.u32 %v4048_v3, %v3311_v4  ;;  %v3012_v16 = vor.u32 %v4089_v6, %v3011_v5 }
  0x50   :  { %744 = vmatpush.bf16.msrb.mxu0 %v3188_v23  ;;  %v3095_v12 = vld [vmem:[#allocation6 + $0x290] sm:$0xf]  ;;  %v4040_v14 = vld [vmem:[#allocation6 + $0x68] sm:$0xf0]  ;;  %v4110_v17 = vld [vmem:[#allocation6 + $0x298] sm:$0xf0] }
  0x51   :  { %725 = vmatpush.bf16.msrb.mxu2 %v3092_v22  ;;  %v4045_v18 = vld [vmem:[#allocation6 + $0x94] sm:$0xf]  ;;  %v3299_v19 = vld [vmem:[#allocation6 + $0x9c] sm:$0xf0]  ;;  %v2999_v20 = vld [vmem:[#allocation6 + $0x1d0] sm:$0xf]  ;;  %v3442_v22 = vor.u32 %v4082_v8, %v3441_v7  ;;  %v3096_v27 = vor.u32 %v4110_v17, %v3095_v12 }
  0x52   :  { %v4086_v21 = vld [vmem:[#allocation6 + $0x1d8] sm:$0xf0]  ;;  %v3405_v23 = vld [vmem:[#allocation6 + $0x168] sm:$0xf]  ;;  %v4073_v24 = vld [vmem:[#allocation6 + $0x170] sm:$0xf0]  ;;  %v3302_v29 = vor.u32 %v4045_v18, %v3299_v19 }
  0x53   :  { %778 = vmatpush.bf16.msrb.mxu3 %v3144_v25  ;;  %759 = vmatpush.bf16.msrb.mxu1 %v3048_v30  ;;  %v3274_v25 = vor.u32 %v4040_v14, %v3273_v13  ;;  %v3261_v26 = vld [vmem:[#allocation6 + $0x48] sm:$0xf]  ;;  %v4037_v28 = vld [vmem:[#allocation6 + $0x50] sm:$0xf0]  ;;  %v3000_v30 = vor.u32 %v4086_v21, %v2999_v20  ;;  %v1164_v31 = vsel %vm632_vm0, %v3442_v22, 0  ;;  %v3406_v32 = vor.u32 %v4073_v24, %v3405_v23  ;;  %s2952_s11 = sshll.u32 %s4926_s10, 4  ;;  %s2953_s11 = int_to_ptr.hbm [resolvable:$true] %s2952_s11 }
  0x54   :  { %1172 = vmatpush.bf16.msra.mxu0 %v3310_v38  ;;  %726 = vmatmul.bf16.vlgmr.msrb.gmra.mxu2 %v4583_v59  ;;  %v3429_v33 = vld [vmem:[#allocation6 + $0x198] sm:$0xf]  ;;  %v4079_v34 = vld [vmem:[#allocation6 + $0x1a0] sm:$0xf0]  ;;  %v3393_v35 = vld [vmem:[#allocation6 + $0x150] sm:$0xf]  ;;  %v3262_v36 = vor.u32 %v4037_v28, %v3261_v26 }
  0x55   :  { %799 = vmatpush.bf16.msra.mxu2 %v640_v40  ;;  %655 = vmatmul.bf16.gmra.mxu0 %v4592_v46  ;;  %v4070_v37 = vld [vmem:[#allocation6 + $0x158] sm:$0xf0]  ;;  %v3249_v38 = vld [vmem:[#allocation6 + $0x30] sm:$0xf]  ;;  %v3430_v40 = vor.u32 %v4079_v34, %v3429_v33  ;;  %v3417_v43 = vld [vmem:[#allocation6 + $0x180] sm:$0xf] }
  0x56   :  { %674 = vmatmul.bf16.gmra.mxu1 %v4594_v51  ;;  %712 = vmatmul.bf16.gmra.mxu3 %v4592_v46  ;;  %v4034_v39 = vld [vmem:[#allocation6 + $0x38] sm:$0xf0]  ;;  %v4076_v44 = vld [vmem:[#allocation6 + $0x188] sm:$0xf0]  ;;  %v3394_v45 = vor.u32 %v4070_v37, %v3393_v35  ;;  %v4067_v48 = vld [vmem:[#allocation6 + $0x140] sm:$0xf0] }
  0x57   :  { %779 = vmatpush.bf16.msrb.mxu3 %v3132_v42  ;;  %760 = vmatpush.bf16.msrb.mxu1 %v3036_v47  ;;  %v4042_v41 = vld [vmem:[#allocation6 + $0x7c] sm:$0xf]  ;;  %v3287_v42 = vld [vmem:[#allocation6 + $0x84] sm:$0xf0]  ;;  %v3381_v47 = vld [vmem:[#allocation6 + $0x138] sm:$0xf]  ;;  %v3250_v50 = vor.u32 %v4034_v39, %v3249_v38 }
  0x58   :  { %1173 = vmatpush.bf16.msra.mxu0 %v3298_v57  ;;  %v3290_v52 = vor.u32 %v4042_v41, %v3287_v42  ;;  %v3237_v53 = vld [vmem:[#allocation6 + $0x18] sm:$0xf]  ;;  %v4031_v55 = vld [vmem:[#allocation6 + $0x20] sm:$0xf0]  ;;  %v3275_v60 = vld [vmem:[#allocation6 + $0x6c] sm:$0xf0] }
  0x59   :  { %800 = vmatpush.bf16.msra.mxu2 %v3204_v58  ;;  %v4039_v57 = vld [vmem:[#allocation6 + $0x64] sm:$0xf]  ;;  %v3418_v58 = vor.u32 %v4076_v44, %v3417_v43  ;;  %v4050_v62 = vld [vmem:[#allocation6 + $0xb8] sm:$0xf0]  ;;  %v3369_v63 = vld [vmem:[#allocation6 + $0x120] sm:$0xf]  ;;  %v3238_v3 = vor.u32 %v4031_v55, %v3237_v53 }
  0x5a   :  { %v4064_v2 = vld [vmem:[#allocation6 + $0x128] sm:$0xf0]  ;;  %v3225_v4 = vld [vmem:[#allocation6] sm:$0xf]  ;;  %v3305_v5 = vld [vmem:[#allocation6 + $0x98] sm:$0xf]  ;;  %v3278_v6 = vor.u32 %v4039_v57, %v3275_v60 }
  0x5b   :  { %780 = vmatpush.bf16.msrb.mxu3 %v3120_v61  ;;  %761 = vmatpush.bf16.msrb.mxu1 %v3024_v1  ;;  %v3317_v61 = vld [vmem:[#allocation6 + $0xb0] sm:$0xf]  ;;  %v3382_v1 = vor.u32 %v4067_v48, %v3381_v47  ;;  %v4028_v7 = vld [vmem:[#allocation6 + $0x8] sm:$0xf0]  ;;  %v3407_v12 = vld [vmem:[#allocation6 + $0x174] sm:$0xf0]  ;;  %v3370_v14 = vor.u32 %v4064_v2, %v3369_v63 }
  0x5c   :  { %1174 = vmatpush.bf16.msra.mxu0 %v3286_v9  ;;  %v3318_v0 = vor.u32 %v4050_v62, %v3317_v61  ;;  %v4036_v8 = vld [vmem:[#allocation6 + $0x4c] sm:$0xf]  ;;  %v4047_v9 = vld [vmem:[#allocation6 + $0xa0] sm:$0xf0]  ;;  %v3357_v18 = vld [vmem:[#allocation6 + $0x108] sm:$0xf] }
  0x5d   :  { %801 = vmatpush.bf16.msra.mxu2 %v3192_v10  ;;  %v3263_v10 = vld [vmem:[#allocation6 + $0x54] sm:$0xf0]  ;;  %v3306_v13 = vor.u32 %v4047_v9, %v3305_v5  ;;  %v4044_v17 = vld [vmem:[#allocation6 + $0x88] sm:$0xf0]  ;;  %v4061_v19 = vld [vmem:[#allocation6 + $0x110] sm:$0xf0] }
  0x5e   :  { %v3266_v20 = vor.u32 %v4036_v8, %v3263_v10  ;;  %v4069_v22 = vld [vmem:[#allocation6 + $0x154] sm:$0xf]  ;;  %v3395_v23 = vld [vmem:[#allocation6 + $0x15c] sm:$0xf0]  ;;  %v3345_v28 = vld [vmem:[#allocation6 + $0xf0] sm:$0xf] }
  0x5f   :  { %781 = vmatpush.bf16.msrb.mxu3 %v3108_v11  ;;  %762 = vmatpush.bf16.msrb.mxu1 %v3012_v16  ;;  %v4072_v11 = vld [vmem:[#allocation6 + $0x16c] sm:$0xf]  ;;  %v3293_v16 = vld [vmem:[#allocation6 + $0x80] sm:$0xf]  ;;  %v4033_v24 = vld [vmem:[#allocation6 + $0x34] sm:$0xf] }
  0x60   :  { %1175 = vmatpush.bf16.msra.mxu0 %v3274_v25  ;;  %v3410_v21 = vor.u32 %v4072_v11, %v3407_v12  ;;  %v3251_v25 = vld [vmem:[#allocation6 + $0x3c] sm:$0xf0]  ;;  %v3294_v26 = vor.u32 %v4044_v17, %v3293_v16  ;;  %v4066_v34 = vld [vmem:[#allocation6 + $0x13c] sm:$0xf]  ;;  %v3383_v35 = vld [vmem:[#allocation6 + $0x144] sm:$0xf0] }
  0x61   :  { %1229 = vmatpush.bf16.msrb.mxu2 %v3314_v15  ;;  %v3226_v15 = vor.u32 %v4028_v7, %v3225_v4  ;;  %v3254_v33 = vor.u32 %v4033_v24, %v3251_v25  ;;  %v3239_v37 = vld [vmem:[#allocation6 + $0x24] sm:$0xf0]  ;;  %v3333_v39 = vld [vmem:[#allocation6 + $0xd8] sm:$0xf]  ;;  %v4055_v41 = vld [vmem:[#allocation6 + $0xe0] sm:$0xf0]  ;;  %v3386_v43 = vor.u32 %v4066_v34, %v3383_v35 }
  0x62   :  { %v4081_v42 = vld [vmem:[#allocation6 + $0x1b4] sm:$0xf]  ;;  %v4063_v44 = vld [vmem:[#allocation6 + $0x124] sm:$0xf]  ;;  %v3371_v47 = vld [vmem:[#allocation6 + $0x12c] sm:$0xf0]  ;;  %v3334_v57 = vor.u32 %v4055_v41, %v3333_v39 }
  0x63   :  { %782 = vmatpush.bf16.msrb.mxu3 %v3096_v27  ;;  %763 = vmatpush.bf16.msrb.mxu1 %v3000_v30  ;;  %v3358_v27 = vor.u32 %v4061_v19, %v3357_v18  ;;  %v3398_v30 = vor.u32 %v4069_v22, %v3395_v23  ;;  %v3269_v48 = vld [vmem:[#allocation6 + $0x50] sm:$0xf]  ;;  %v4027_v53 = vld [vmem:[#allocation6 + $0x4] sm:$0xf]  ;;  %v4074_v61 = vld [vmem:[#allocation6 + $0x178] sm:$0xf0] }
  0x64   :  { %1176 = vmatpush.bf16.msra.mxu0 %v3262_v36  ;;  %731 = vmatmul.bf16.gmra.mxu2 %v4594_v51  ;;  %v4030_v36 = vld [vmem:[#allocation6 + $0x1c] sm:$0xf]  ;;  %v3227_v55 = vld [vmem:[#allocation6 + $0xc] sm:$0xf0]  ;;  %v4052_v63 = vld [vmem:[#allocation6 + $0xc8] sm:$0xf0] }
  0x65   :  { %1230 = vmatpush.bf16.msrb.mxu2 %v3302_v29  ;;  %3219 = vmatmul.msk.bf16.vlgmr.msrb.gmra.mxu0 %vm625_vm1, %v4575_v56  ;;  %v4058_v29 = vld [vmem:[#allocation6 + $0xf8] sm:$0xf0]  ;;  %v3413_v60 = vld [vmem:[#allocation6 + $0x170] sm:$0xf]  ;;  %v4035_v2 = vld [vmem:[#allocation6 + $0x40] sm:$0xf0]  ;;  %v3230_v4 = vor.u32 %v4027_v53, %v3227_v55 }
  0x66   :  { %764 = vmatmul.bf16.vlgmr.msrb.gmra.mxu1 %v4581_v54  ;;  %783 = vmatmul.bf16.vlgmr.msrb.gmra.mxu3 %v4583_v59  ;;  %v3346_v38 = vor.u32 %v4058_v29, %v3345_v28  ;;  %v4060_v5 = vld [vmem:[#allocation6 + $0x10c] sm:$0xf]  ;;  %v3414_v7 = vor.u32 %v4074_v61, %v3413_v60  ;;  %v3401_v9 = vld [vmem:[#allocation6 + $0x158] sm:$0xf]  ;;  %v4071_v10 = vld [vmem:[#allocation6 + $0x160] sm:$0xf0] }
  0x67   :  { %1215 = vmatpush.bf16.msra.mxu3 %v1164_v31  ;;  %1191 = vmatpush.bf16.msra.mxu1 %v3406_v32  ;;  %v3281_v31 = vld [vmem:[#allocation6 + $0x68] sm:$0xf]  ;;  %v4041_v32 = vld [vmem:[#allocation6 + $0x70] sm:$0xf0]  ;;  %v4078_v16 = vld [vmem:[#allocation6 + $0x19c] sm:$0xf]  ;;  %v3402_v18 = vor.u32 %v4071_v10, %v3401_v9 }
  0x68   :  { %1177 = vmatpush.bf16.msra.mxu0 %v3250_v50  ;;  %v4038_v50 = vld [vmem:[#allocation6 + $0x58] sm:$0xf0]  ;;  %v3431_v17 = vld [vmem:[#allocation6 + $0x1a4] sm:$0xf0]  ;;  %v4057_v19 = vld [vmem:[#allocation6 + $0xf4] sm:$0xf] }
  0x69   :  { %1231 = vmatpush.bf16.msrb.mxu2 %v3290_v52  ;;  %v3443_v52 = vld [vmem:[#allocation6 + $0x1bc] sm:$0x30]  ;;  %v3270_v62 = vor.u32 %v4038_v50, %v3269_v48  ;;  %v3434_v22 = vor.u32 %v4078_v16, %v3431_v17  ;;  %v4068_v24 = vld [vmem:[#allocation6 + $0x148] sm:$0xf0]  ;;  %v4075_v25 = vld [vmem:[#allocation6 + $0x184] sm:$0xf] }
  0x6a   :  { %v3389_v23 = vld [vmem:[#allocation6 + $0x140] sm:$0xf]  ;;  %v4029_v28 = vld [vmem:[#allocation6 + $0x10] sm:$0xf0]  ;;  %v3377_v34 = vld [vmem:[#allocation6 + $0x128] sm:$0xf] }
  0x6b   :  { %1216 = vmatpush.bf16.msra.mxu3 %v3430_v40  ;;  %1192 = vmatpush.bf16.msra.mxu1 %v3394_v45  ;;  %v3282_v40 = vor.u32 %v4041_v32, %v3281_v31  ;;  %v3242_v45 = vor.u32 %v4030_v36, %v3239_v37  ;;  %v4054_v31 = vld [vmem:[#allocation6 + $0xdc] sm:$0xf]  ;;  %v3335_v32 = vld [vmem:[#allocation6 + $0xe4] sm:$0xf0]  ;;  %v4065_v35 = vld [vmem:[#allocation6 + $0x130] sm:$0xf0] }
  0x6c   :  { %1178 = vmatpush.bf16.msra.mxu0 %v3238_v3  ;;  %v3446_v3 = vor.u32 %v4081_v42, %v3443_v52  ;;  %v3639_v37 = vld [vmem:[#allocation6 + $0x4f8] sm:$0xf]  ;;  %v3323_v41 = vld [vmem:[#allocation6 + $0xcc] sm:$0xf0]  ;;  %v3378_v48 = vor.u32 %v4065_v35, %v3377_v34  ;;  %v4083_v53 = vld [vmem:[#allocation6 + $0x1c0] sm:$0x30] }
  0x6d   :  { %1232 = vmatpush.bf16.msrb.mxu2 %v3278_v6  ;;  %v3359_v6 = vld [vmem:[#allocation6 + $0x114] sm:$0xf0]  ;;  %v3365_v42 = vld [vmem:[#allocation6 + $0x110] sm:$0xf]  ;;  %v3627_v55 = vld [vmem:[#allocation6 + $0x4e0] sm:$0xf] }
  0x6e   :  { %v3362_v12 = vor.u32 %v4060_v5, %v3359_v6  ;;  %v3543_v39 = vld [vmem:[#allocation6 + $0x438] sm:$0xf]  ;;  %v4160_v60 = vld [vmem:[#allocation6 + $0x428] sm:$0xf0]  ;;  %v4157_v5 = vld [vmem:[#allocation6 + $0x410] sm:$0xf0] }
  0x6f   :  { %1217 = vmatpush.bf16.msra.mxu3 %v3418_v58  ;;  %1193 = vmatpush.bf16.msra.mxu1 %v3382_v1  ;;  %v3321_v58 = vld [vmem:[#allocation6 + $0xc0] sm:$0xf]  ;;  %v3257_v1 = vld [vmem:[#allocation6 + $0x38] sm:$0xf]  ;;  %v3507_v17 = vld [vmem:[#allocation6 + $0x3f0] sm:$0xf] }
  0x70   :  { %1179 = vmatpush.bf16.msra.mxu0 %v3226_v15  ;;  %v3322_v8 = vor.u32 %v4052_v63, %v3321_v58  ;;  %v3258_v11 = vor.u32 %v4035_v2, %v3257_v1  ;;  %v1167_v15 = vsel %vm632_vm0, %v3446_v3, 0  ;;  %v3449_v52 = vld [vmem:[#allocation6 + $0x1b8] sm:$0xf]  ;;  %v3531_v58 = vld [vmem:[#allocation6 + $0x420] sm:$0xf]  ;;  %vm2555_vm5 = vcmask 1043456  }
  0x71   :  { %1233 = vmatpush.bf16.msrb.mxu2 %v3266_v20  ;;  %v3347_v20 = vld [vmem:[#allocation6 + $0xfc] sm:$0xf0]  ;;  %v3450_v61 = vor.u32 %v4083_v53, %v3449_v52  ;;  %v3532_v63 = vor.u32 %v4160_v60, %v3531_v58  ;;  %v4181_v1 = vld [vmem:[#allocation6 + $0x4d0] sm:$0xf0]  ;;  %v3519_v2 = vld [vmem:[#allocation6 + $0x408] sm:$0xf] }
  0x72   :  { %v3350_v29 = vor.u32 %v4057_v19, %v3347_v20  ;;  %v3353_v6 = vld [vmem:[#allocation6 + $0xf8] sm:$0xf]  ;;  %v3520_v10 = vor.u32 %v4157_v5, %v3519_v2  ;;  %v3329_v20 = vld [vmem:[#allocation6 + $0xc8] sm:$0xf]  ;;  %v4172_v34 = vld [vmem:[#allocation6 + $0x488] sm:$0xf0] }
  0x73   :  { %1286 = vmatpush.bf16.msrb.mxu3 %v3318_v0  ;;  %1194 = vmatpush.bf16.msra.mxu1 %v3370_v14  ;;  %v3374_v0 = vor.u32 %v4063_v44, %v3371_v47  ;;  %v4032_v14 = vld [vmem:[#allocation6 + $0x28] sm:$0xf0]  ;;  %v3338_v47 = vor.u32 %v4054_v31, %v3335_v32  ;;  %v3483_v35 = vld [vmem:[#allocation6 + $0x3c0] sm:$0xf]  ;;  %v4166_v52 = vld [vmem:[#allocation6 + $0x458] sm:$0xf0] }
  0x74   :  { %1248 = vmatpush.bf16.msrb.mxu0 %v3410_v21  ;;  %3221 = vmatmul.msk.bf16.vlgmr.msra.gmra.mxu2 %vm625_vm1, %v4575_v56  ;;  %v3675_v60 = vld [vmem:[#allocation6 + $0x540] sm:$0xf]  ;;  %v3641_v2 = vld [vmem:[#allocation6 + $0x504] sm:$0xf0]  ;;  %vm2926_vm6 = vcmask 1041408   ;;  %vm2943_vm7 = vcmask 8192  }
  0x75   :  { %3220 = vmatmul.msk.bf16.gmra.mxu0 %vm625_vm1, %v4579_v49  ;;  %1234 = vmatpush.bf16.msrb.mxu2 %v3254_v33 }
  0x76   :  { %769 = vmatmul.bf16.gmra.mxu1 %v4592_v46  ;;  %788 = vmatmul.bf16.gmra.mxu3 %v4594_v51 }
  0x77   :  { %1287 = vmatpush.bf16.msrb.mxu3 %v3306_v13  ;;  %1195 = vmatpush.bf16.msra.mxu1 %v3358_v27  ;;  %v3245_v13 = vld [vmem:[#allocation6 + $0x20] sm:$0xf]  ;;  %v3233_v27 = vld [vmem:[#allocation6 + $0x8] sm:$0xf] }
  0x78   :  { %1249 = vmatpush.bf16.msrb.mxu0 %v3398_v30  ;;  %v3246_v21 = vor.u32 %v4032_v14, %v3245_v13  ;;  %v3390_v30 = vor.u32 %v4068_v24, %v3389_v23  ;;  %v3234_v36 = vor.u32 %v4029_v28, %v3233_v27  ;;  %v3341_v14 = vld [vmem:[#allocation6 + $0xe0] sm:$0xf]  ;;  %v4080_v24 = vld [vmem:[#allocation6 + $0x1a8] sm:$0xf0]  ;;  %v4175_v27 = vld [vmem:[#allocation6 + $0x4a0] sm:$0xf0] }
  0x79   :  { %1235 = vmatpush.bf16.msrb.mxu2 %v3242_v45  ;;  %v4163_v45 = vld [vmem:[#allocation6 + $0x440] sm:$0xf0]  ;;  %v3437_v23 = vld [vmem:[#allocation6 + $0x1a0] sm:$0xf]  ;;  %v3495_v28 = vld [vmem:[#allocation6 + $0x3d8] sm:$0xf] }
  0x7a   :  { %v3544_v50 = vor.u32 %v4163_v45, %v3543_v39  ;;  %v3567_v39 = vld [vmem:[#allocation6 + $0x468] sm:$0xf] }
  0x7b   :  { %1288 = vmatpush.bf16.msrb.mxu3 %v3294_v26  ;;  %1196 = vmatpush.bf16.msra.mxu1 %v3346_v38  ;;  %v3419_v26 = vld [vmem:[#allocation6 + $0x18c] sm:$0xf0]  ;;  %v4187_v38 = vld [vmem:[#allocation6 + $0x500] sm:$0xf0]  ;;  %v3425_v45 = vld [vmem:[#allocation6 + $0x188] sm:$0xf] }
  0x7c   :  { %1250 = vmatpush.bf16.msrb.mxu0 %v3386_v43  ;;  %v3422_v33 = vor.u32 %v4075_v25, %v3419_v26  ;;  %v4062_v43 = vld [vmem:[#allocation6 + $0x118] sm:$0xf0]  ;;  %v3640_v44 = vor.u32 %v4187_v38, %v3639_v37  ;;  %v3438_v25 = vor.u32 %v4080_v24, %v3437_v23  ;;  %v3591_v26 = vld [vmem:[#allocation6 + $0x498] sm:$0xf]  ;;  %v3651_v24 = vld [vmem:[#allocation6 + $0x510] sm:$0xf] }
  0x7d   :  { %1236 = vmatpush.bf16.msrb.mxu2 %v3230_v4  ;;  %v3366_v4 = vor.u32 %v4062_v43, %v3365_v42  ;;  %v4145_v43 = vld [vmem:[#allocation6 + $0x3b0] sm:$0xf0]  ;;  %v3617_v23 = vld [vmem:[#allocation6 + $0x4d4] sm:$0xf0] }
  0x7f   :  { %1289 = vmatpush.bf16.msrb.mxu3 %v3282_v40  ;;  %1197 = vmatpush.bf16.msra.mxu1 %v3334_v57  ;;  %v4051_v40 = vld [vmem:[#allocation6 + $0xc4] sm:$0xf]  ;;  %v4184_v57 = vld [vmem:[#allocation6 + $0x4e8] sm:$0xf0] }
  0x80   :  { %1251 = vmatpush.bf16.msrb.mxu0 %v3374_v0  ;;  %v3615_v0 = vld [vmem:[#allocation6 + $0x4c8] sm:$0xf]  ;;  %v3326_v3 = vor.u32 %v4051_v40, %v3323_v41  ;;  %v4169_v40 = vld [vmem:[#allocation6 + $0x470] sm:$0xf0] }
  0x81   :  { %1305 = vmatpush.bf16.msra.mxu2 %v3414_v7  ;;  %v4059_v7 = vld [vmem:[#allocation6 + $0x100] sm:$0xf0]  ;;  %v3616_v9 = vor.u32 %v4181_v1, %v3615_v0  ;;  %v3471_v41 = vld [vmem:[#allocation6 + $0x3a8] sm:$0xf]  ;;  %v3568_v42 = vor.u32 %v4169_v40, %v3567_v39  ;;  %v4186_v1 = vld [vmem:[#allocation6 + $0x4fc] sm:$0xf] }
  0x82   :  { %v3354_v13 = vor.u32 %v4059_v7, %v3353_v6  ;;  %v3545_v0 = vld [vmem:[#allocation6 + $0x444] sm:$0xf0]  ;;  %v4195_v6 = vld [vmem:[#allocation6 + $0x544] sm:$0xf]  ;;  %v3677_v7 = vld [vmem:[#allocation6 + $0x54c] sm:$0x30] }
  0x83   :  { %1290 = vmatpush.bf16.msrb.mxu3 %v3270_v62  ;;  %1198 = vmatpush.bf16.msra.mxu1 %v3322_v8  ;;  %v3628_v62 = vor.u32 %v4184_v57, %v3627_v55  ;;  %v1170_v8 = vsel %vm632_vm0, %v3450_v61, 0  ;;  %v3459_v55 = vld [vmem:[#allocation6 + $0x390] sm:$0xf]  ;;  %v4142_v57 = vld [vmem:[#allocation6 + $0x398] sm:$0xf0] }
  0x84   :  { %1252 = vmatpush.bf16.msrb.mxu0 %v3362_v12  ;;  %3222 = vmatmul.msk.bf16.gmra.mxu2 %vm625_vm1, %v4579_v49  ;;  %v4178_v12 = vld [vmem:[#allocation6 + $0x4b8] sm:$0xf0]  ;;  %v3460_v58 = vor.u32 %v4142_v57, %v3459_v55  ;;  %v4196_v61 = vld [vmem:[#allocation6 + $0x548] sm:$0x30]  ;;  %v3485_v55 = vld [vmem:[#allocation6 + $0x3cc] sm:$0xf0] }
  0x85   :  { %1306 = vmatpush.bf16.msra.mxu2 %v3402_v18  ;;  %1180 = vmatmul.bf16.vlgmr.msra.gmra.mxu0 %v4581_v54  ;;  %v4154_v18 = vld [vmem:[#allocation6 + $0x3f8] sm:$0xf0]  ;;  %v4171_v57 = vld [vmem:[#allocation6 + $0x484] sm:$0xf] }
  0x86   :  { %1199 = vmatmul.bf16.vlgmr.msra.gmra.mxu1 %v4583_v59  ;;  %3451 = vmatmul.msk.bf16.vlgmr.msra.gmra.mxu3 %vm625_vm1, %v4575_v56  ;;  %v4150_v40 = vld [vmem:[#allocation6 + $0x3dc] sm:$0xf] }
  0x87   :  { %1291 = vmatpush.bf16.msrb.mxu3 %v3258_v11  ;;  %1272 = vmatpush.bf16.msrb.mxu1 %v1167_v15  ;;  %v3603_v11 = vld [vmem:[#allocation6 + $0x4b0] sm:$0xf]  ;;  %v4056_v15 = vld [vmem:[#allocation6 + $0xe8] sm:$0xf0] }
  0x88   :  { %1253 = vmatpush.bf16.msrb.mxu0 %v3350_v29  ;;  %v3604_v16 = vor.u32 %v4178_v12, %v3603_v11  ;;  %v3342_v19 = vor.u32 %v4056_v15, %v3341_v14  ;;  %v3592_v29 = vor.u32 %v4175_v27, %v3591_v26  ;;  %v4183_v11 = vld [vmem:[#allocation6 + $0x4e4] sm:$0xf]  ;;  %v3663_v14 = vld [vmem:[#allocation6 + $0x528] sm:$0xf]  ;;  %v4193_v15 = vld [vmem:[#allocation6 + $0x530] sm:$0xf0] }
  0x89   :  { %1307 = vmatpush.bf16.msra.mxu2 %v3390_v30  ;;  %v4151_v30 = vld [vmem:[#allocation6 + $0x3e0] sm:$0xf0] }
  0x8a   :  { %v3496_v32 = vor.u32 %v4151_v30, %v3495_v28  ;;  %v4192_v28 = vld [vmem:[#allocation6 + $0x52c] sm:$0xf]  ;;  %v4153_v30 = vld [vmem:[#allocation6 + $0x3f4] sm:$0xf] }
  0x8b   :  { %1292 = vmatpush.bf16.msrb.mxu3 %v3246_v21  ;;  %1273 = vmatpush.bf16.msrb.mxu1 %v3434_v22  ;;  %v3508_v21 = vor.u32 %v4154_v18, %v3507_v17  ;;  %v4053_v22 = vld [vmem:[#allocation6 + $0xd0] sm:$0xf0]  ;;  %v3664_v18 = vor.u32 %v4193_v15, %v3663_v14  ;;  %v3461_v15 = vld [vmem:[#allocation6 + $0x39c] sm:$0xf0] }
  0x8c   :  { %1254 = vmatpush.bf16.msrb.mxu0 %v3338_v47  ;;  %v3330_v31 = vor.u32 %v4053_v22, %v3329_v20  ;;  %v4077_v47 = vld [vmem:[#allocation6 + $0x190] sm:$0xf0]  ;;  %v3521_v20 = vld [vmem:[#allocation6 + $0x414] sm:$0xf0] }
  0x8d   :  { %1308 = vmatpush.bf16.msra.mxu2 %v3378_v48  ;;  %v3555_v48 = vld [vmem:[#allocation6 + $0x450] sm:$0xf]  ;;  %v4141_v14 = vld [vmem:[#allocation6 + $0x394] sm:$0xf] }
  0x8e   :  { %v3556_v53 = vor.u32 %v4166_v52, %v3555_v48 }
  0x8f   :  { %1274 = vmatpush.bf16.msrb.mxu1 %v3422_v33  ;;  %1293 = vmatpush.bf16.msrb.mxu3 %v3234_v36  ;;  %v3579_v33 = vld [vmem:[#allocation6 + $0x480] sm:$0xf]  ;;  %v4148_v36 = vld [vmem:[#allocation6 + $0x3c8] sm:$0xf0] }
  0x90   :  { %1255 = vmatpush.bf16.msrb.mxu0 %v3326_v3  ;;  %v3580_v37 = vor.u32 %v4172_v34, %v3579_v33  ;;  %v3484_v38 = vor.u32 %v4148_v36, %v3483_v35  ;;  %v4177_v33 = vld [vmem:[#allocation6 + $0x4b4] sm:$0xf]  ;;  %v3605_v34 = vld [vmem:[#allocation6 + $0x4bc] sm:$0xf0] }
  0x91   :  { %1309 = vmatpush.bf16.msra.mxu2 %v3366_v4  ;;  %v3644_v4 = vor.u32 %v4186_v1, %v3641_v2  ;;  %v3608_v36 = vor.u32 %v4177_v33, %v3605_v34  ;;  %v4144_v1 = vld [vmem:[#allocation6 + $0x3ac] sm:$0xf]  ;;  %v3473_v2 = vld [vmem:[#allocation6 + $0x3b4] sm:$0xf0]  ;;  %v4149_v33 = vld [vmem:[#allocation6 + $0x3d0] sm:$0xf0] }
  0x93   :  { %1749 = vmatpush.bf16.msra.mxu3 %v3640_v44  ;;  %1730 = vmatpush.bf16.msra.mxu1 %v3544_v50  ;;  %v3472_v44 = vor.u32 %v4145_v43, %v3471_v41  ;;  %v3426_v50 = vor.u32 %v4077_v47, %v3425_v45  ;;  %v3497_v41 = vld [vmem:[#allocation6 + $0x3e4] sm:$0xf0]  ;;  %v4161_v45 = vld [vmem:[#allocation6 + $0x430] sm:$0xf0] }
  0x94   :  { %1329 = vmatpush.bf16.msra.mxu0 %v1170_v8  ;;  %1237 = vmatmul.bf16.vlgmr.msrb.gmra.mxu2 %v4581_v54  ;;  %v3680_v8 = vor.u32 %v4195_v6, %v3677_v7  ;;  %v3593_v43 = vld [vmem:[#allocation6 + $0x4a4] sm:$0xf0]  ;;  %v3500_v48 = vor.u32 %v4150_v40, %v3497_v41  ;;  %v4155_v6 = vld [vmem:[#allocation6 + $0x400] sm:$0xf0] }
  0x95   :  { %1310 = vmatpush.bf16.msra.mxu2 %v3354_v13  ;;  %1185 = vmatmul.bf16.gmra.mxu0 %v4592_v46  ;;  %v3629_v13 = vld [vmem:[#allocation6 + $0x4ec] sm:$0xf0]  ;;  %v3635_v40 = vld [vmem:[#allocation6 + $0x4e8] sm:$0xf] }
  0x96   :  { %1204 = vmatmul.bf16.gmra.mxu1 %v4594_v51  ;;  %3452 = vmatmul.msk.bf16.gmra.mxu3 %vm625_vm1, %v4579_v49  ;;  %v3632_v17 = vor.u32 %v4183_v11, %v3629_v13 }
  0x97   :  { %1750 = vmatpush.bf16.msra.mxu3 %v3628_v62  ;;  %1731 = vmatpush.bf16.msra.mxu1 %v3532_v63  ;;  %v4162_v62 = vld [vmem:[#allocation6 + $0x43c] sm:$0xf]  ;;  %v3676_v63 = vor.u32 %v4196_v61, %v3675_v60  ;;  %v3527_v60 = vld [vmem:[#allocation6 + $0x410] sm:$0xf] }
  0x98   :  { %1330 = vmatpush.bf16.msra.mxu0 %v3438_v25  ;;  %v3548_v3 = vor.u32 %v4162_v62, %v3545_v0  ;;  %v4190_v25 = vld [vmem:[#allocation6 + $0x518] sm:$0xf0] }
  0x99   :  { %1311 = vmatpush.bf16.msra.mxu2 %v3342_v19  ;;  %v1722_v5 = vsel %vm632_vm0, %v3676_v63, 0  ;;  %v4156_v19 = vld [vmem:[#allocation6 + $0x40c] sm:$0xf]  ;;  %v3652_v27 = vor.u32 %v4190_v25, %v3651_v24  ;;  %v4158_v61 = vld [vmem:[#allocation6 + $0x418] sm:$0xf0] }
  0x9a   :  { %v3524_v22 = vor.u32 %v4156_v19, %v3521_v20  ;;  %v3528_v0 = vor.u32 %v4158_v61, %v3527_v60  ;;  %v3503_v19 = vld [vmem:[#allocation6 + $0x3e0] sm:$0xf]  ;;  %v4152_v20 = vld [vmem:[#allocation6 + $0x3e8] sm:$0xf0]  ;;  %v3733_v60 = vld [vmem:[#allocation8 + $0x50] sm:$0xf] }
  0x9b   :  { %1751 = vmatpush.bf16.msra.mxu3 %v3616_v9  ;;  %1732 = vmatpush.bf16.msra.mxu1 %v3520_v10  ;;  %v4159_v9 = vld [vmem:[#allocation6 + $0x424] sm:$0xf]  ;;  %v3533_v10 = vld [vmem:[#allocation6 + $0x42c] sm:$0xf0]  ;;  %v3504_v25 = vor.u32 %v4152_v20, %v3503_v19 }
  0x9c   :  { %1331 = vmatpush.bf16.msra.mxu0 %v3426_v50  ;;  %v3536_v12 = vor.u32 %v4159_v9, %v3533_v10  ;;  %v4189_v9 = vld [vmem:[#allocation6 + $0x514] sm:$0xf]  ;;  %v3653_v10 = vld [vmem:[#allocation6 + $0x51c] sm:$0xf0]  ;;  %v4209_v61 = vld [vmem:[#allocation8 + $0x54] sm:$0xf0] }
  0x9d   :  { %1312 = vmatpush.bf16.msra.mxu2 %v3330_v31 }
  0x9f   :  { %1752 = vmatpush.bf16.msra.mxu3 %v3604_v16  ;;  %1733 = vmatpush.bf16.msra.mxu1 %v3508_v21  ;;  %v1725_v16 = vsel %vm632_vm0, %v3680_v8, 0  ;;  %v4180_v21 = vld [vmem:[#allocation6 + $0x4cc] sm:$0xf]  ;;  %v3476_v8 = vor.u32 %v4144_v1, %v3473_v2  ;;  %v4182_v1 = vld [vmem:[#allocation6 + $0x4d8] sm:$0xf0] }
  0xa0   :  { %v3620_v26 = vor.u32 %v4180_v21, %v3617_v23  ;;  %v3467_v2 = vld [vmem:[#allocation6 + $0x398] sm:$0xf] }
  0xa1   :  { %1773 = vmatpush.bf16.msrb.mxu2 %v1722_v5  ;;  %v3515_v5 = vld [vmem:[#allocation6 + $0x3f8] sm:$0xf] }
  0xa2   :  { %v3516_v13 = vor.u32 %v4155_v6, %v3515_v5  ;;  %v4143_v5 = vld [vmem:[#allocation6 + $0x3a0] sm:$0xf0] }
  0xa3   :  { %1753 = vmatpush.bf16.msra.mxu3 %v3592_v29  ;;  %1734 = vmatpush.bf16.msra.mxu1 %v3496_v32  ;;  %v3665_v29 = vld [vmem:[#allocation6 + $0x534] sm:$0xf0]  ;;  %v3509_v32 = vld [vmem:[#allocation6 + $0x3fc] sm:$0xf0] }
  0xa4   :  { %1242 = vmatmul.bf16.gmra.mxu2 %v4592_v46  ;;  %v3668_v31 = vor.u32 %v4192_v28, %v3665_v29  ;;  %v3512_v35 = vor.u32 %v4153_v30, %v3509_v32  ;;  %v3647_v28 = vld [vmem:[#allocation6 + $0x500] sm:$0xf]  ;;  %v3491_v32 = vld [vmem:[#allocation6 + $0x3c8] sm:$0xf] }
  0xa5   :  { %1256 = vmatmul.bf16.vlgmr.msrb.gmra.mxu0 %v4583_v59  ;;  %1774 = vmatpush.bf16.msrb.mxu2 %v3664_v18  ;;  %v3557_v18 = vld [vmem:[#allocation6 + $0x45c] sm:$0xf0] }
  0xa6   :  { %3453 = vmatmul.msk.bf16.vlgmr.msrb.gmra.mxu1 %vm625_vm1, %v4575_v56  ;;  %1294 = vmatmul.bf16.vlgmr.msrb.gmra.mxu3 %v4581_v54 }
  0xa7   :  { %1754 = vmatpush.bf16.msra.mxu3 %v3580_v37  ;;  %1735 = vmatpush.bf16.msra.mxu1 %v3484_v38  ;;  %v3551_v37 = vld [vmem:[#allocation6 + $0x440] sm:$0xf]  ;;  %v4164_v38 = vld [vmem:[#allocation6 + $0x448] sm:$0xf0] }
  0xa8   :  { %1787 = vmatpush.bf16.msrb.mxu0 %v3548_v3  ;;  %v3552_v39 = vor.u32 %v4164_v38, %v3551_v37  ;;  %v4168_v3 = vld [vmem:[#allocation6 + $0x46c] sm:$0xf]  ;;  %v3492_v37 = vor.u32 %v4149_v33, %v3491_v32  ;;  %v3741_v38 = vld [vmem:[#allocation8 + $0x60] sm:$0xf] }
  0xa9   :  { %1775 = vmatpush.bf16.msrb.mxu2 %v3652_v27  ;;  %v4213_v27 = vld [vmem:[#allocation8 + $0x74] sm:$0xf0] }
  0xab   :  { %1755 = vmatpush.bf16.msra.mxu3 %v3568_v42  ;;  %1736 = vmatpush.bf16.msra.mxu1 %v3472_v44  ;;  %v4174_v42 = vld [vmem:[#allocation6 + $0x49c] sm:$0xf]  ;;  %v3539_v44 = vld [vmem:[#allocation6 + $0x428] sm:$0xf] }
  0xac   :  { %1788 = vmatpush.bf16.msrb.mxu0 %v3536_v12  ;;  %v3596_v50 = vor.u32 %v4174_v42, %v3593_v43  ;;  %v3540_v52 = vor.u32 %v4161_v45, %v3539_v44  ;;  %v3656_v12 = vor.u32 %v4189_v9, %v3653_v10  ;;  %v3683_v42 = vld [vmem:[#allocation6 + $0x548] sm:$0xf]  ;;  %v4197_v43 = vld [vmem:[#allocation6 + $0x550] sm:$0x30]  ;;  %v3725_v10 = vld [vmem:[#allocation8 + $0x40] sm:$0xf] }
  0xad   :  { %v4185_v45 = vld [vmem:[#allocation6 + $0x4f0] sm:$0xf0] }
  0xaf   :  { %1756 = vmatpush.bf16.msra.mxu3 %v3556_v53  ;;  %1737 = vmatpush.bf16.msra.mxu1 %v3460_v58  ;;  %v4147_v53 = vld [vmem:[#allocation6 + $0x3c4] sm:$0xf]  ;;  %v3581_v58 = vld [vmem:[#allocation6 + $0x48c] sm:$0xf0] }
  0xb0   :  { %1789 = vmatpush.bf16.msrb.mxu0 %v3524_v22  ;;  %v3488_v62 = vor.u32 %v4147_v53, %v3485_v55  ;;  %v3584_v63 = vor.u32 %v4171_v57, %v3581_v58  ;;  %v3464_v22 = vor.u32 %v4141_v14, %v3461_v15  ;;  %v4146_v53 = vld [vmem:[#allocation6 + $0x3b8] sm:$0xf0]  ;;  %v4179_v15 = vld [vmem:[#allocation6 + $0x4c0] sm:$0xf0] }
  0xb3   :  { %1806 = vmatpush.bf16.msrb.mxu1 %v3644_v4  ;;  %1830 = vmatpush.bf16.msrb.mxu3 %v1725_v16  ;;  %v3569_v4 = vld [vmem:[#allocation6 + $0x474] sm:$0xf0]  ;;  %v4165_v16 = vld [vmem:[#allocation6 + $0x454] sm:$0xf] }
  0xb4   :  { %1313 = vmatmul.bf16.vlgmr.msra.gmra.mxu2 %v4583_v59  ;;  %1790 = vmatpush.bf16.msrb.mxu0 %v3512_v35  ;;  %v3572_v11 = vor.u32 %v4168_v3, %v3569_v4  ;;  %v3560_v24 = vor.u32 %v4165_v16, %v3557_v18  ;;  %v3813_v16 = vld [vmem:[#allocation8 + $0xf0] sm:$0xf] }
  0xb5   :  { %1261 = vmatmul.bf16.gmra.mxu0 %v4594_v51  ;;  %1844 = vmatpush.bf16.msra.mxu2 %v3552_v39  ;;  %v4211_v39 = vld [vmem:[#allocation8 + $0x64] sm:$0xf0] }
  0xb6   :  { %3454 = vmatmul.msk.bf16.gmra.mxu1 %vm625_vm1, %v4579_v49  ;;  %1299 = vmatmul.bf16.gmra.mxu3 %v4592_v46  ;;  %v3742_v44 = vor.u32 %v4211_v39, %v3741_v38 }
  0xb7   :  { %1807 = vmatpush.bf16.msrb.mxu1 %v3632_v17  ;;  %1831 = vmatpush.bf16.msrb.mxu3 %v3668_v31  ;;  %v689_v47 = vpop.f32.mrf.mxu2  ;;  %v4188_v31 = vld [vmem:[#allocation6 + $0x508] sm:$0xf0] }
  0xb8   :  { %1791 = vmatpush.bf16.msrb.mxu0 %v3500_v48  ;;  %v3648_v35 = vor.u32 %v4188_v31, %v3647_v28  ;;  %v3684_v48 = vor.u32 %v4197_v43, %v3683_v42  ;;  %v4205_v28 = vld [vmem:[#allocation8 + $0x34] sm:$0xf0]  ;;  %v4203_v42 = vld [vmem:[#allocation8 + $0x24] sm:$0xf0]  ;;  %v3587_v43 = vld [vmem:[#allocation6 + $0x488] sm:$0xf] }
  0xb9   :  { %1845 = vmatpush.bf16.msra.mxu2 %v3540_v52  ;;  %v3479_v52 = vld [vmem:[#allocation6 + $0x3b0] sm:$0xf] }
  0xba   :  { %v1728_v57 = vsel %vm632_vm0, %v3684_v48, 0  ;;  %v3480_v58 = vor.u32 %v4146_v53, %v3479_v52  ;;  %v3797_v48 = vld [vmem:[#allocation8 + $0xd0] sm:$0xf] }
  0xbb   :  { %1808 = vmatpush.bf16.msrb.mxu1 %v3620_v26  ;;  %1832 = vmatpush.bf16.msrb.mxu3 %v3656_v12  ;;  %v3749_v26 = vld [vmem:[#allocation8 + $0x70] sm:$0xf]  ;;  %v3611_v12 = vld [vmem:[#allocation6 + $0x4b8] sm:$0xf] }
  0xbc   :  { %1792 = vmatpush.bf16.msrb.mxu0 %v3488_v62  ;;  %v3750_v30 = vor.u32 %v4213_v27, %v3749_v26  ;;  %v3612_v20 = vor.u32 %v4179_v15, %v3611_v12  ;;  %v4191_v12 = vld [vmem:[#allocation6 + $0x520] sm:$0xf0]  ;;  %v4199_v15 = vld [vmem:[#allocation8 + $0x4] sm:$0xf0] }
  0xbd   :  { %1846 = vmatpush.bf16.msra.mxu2 %v3528_v0  ;;  %v3623_v0 = vld [vmem:[#allocation6 + $0x4d0] sm:$0xf] }
  0xbe   :  { %v3624_v4 = vor.u32 %v4182_v1, %v3623_v0  ;;  %v4170_v0 = vld [vmem:[#allocation6 + $0x478] sm:$0xf0]  ;;  %v3789_v1 = vld [vmem:[#allocation8 + $0xc0] sm:$0xf] }
  0xbf   :  { %1809 = vmatpush.bf16.msrb.mxu1 %v3608_v36  ;;  %v4637_v7 = vpop.f32.mrf.mxu2 }
  0xc0   :  { %1793 = vmatpush.bf16.msrb.mxu0 %v3476_v8 }
  0xc1   :  { %1847 = vmatpush.bf16.msra.mxu2 %v3516_v13 }
  0xc2   :  { %v651_v17 = vpop.f32.mrf.mxu0 }
  0xc3   :  { %1810 = vmatpush.bf16.msrb.mxu1 %v3596_v50  ;;  %v670_v21 = vpop.f32.mrf.mxu1  ;;  %v3636_v50 = vor.u32 %v4185_v45, %v3635_v40 }
  0xc4   :  { %v671_v23 = vadd.f32 %v670_v21, %v651_v17  ;;  %1318 = vmatmul.bf16.gmra.mxu2 %v4594_v51  ;;  %1794 = vmatpush.bf16.msrb.mxu0 %v3464_v22  ;;  %v4229_v17 = vld [vmem:[#allocation8 + $0xf4] sm:$0xf0] }
  0xc5   :  { %3455 = vmatmul.msk.bf16.vlgmr.msra.gmra.mxu0 %vm625_vm1, %v4575_v56  ;;  %1848 = vmatpush.bf16.msra.mxu2 %v3504_v25  ;;  %v3814_v21 = vor.u32 %v4229_v17, %v3813_v16  ;;  %v3717_v25 = vld [vmem:[#allocation8 + $0x30] sm:$0xf]  ;;  %v3563_v16 = vld [vmem:[#allocation6 + $0x458] sm:$0xf]  ;;  %v4167_v17 = vld [vmem:[#allocation6 + $0x460] sm:$0xf0] }
  0xc6   :  { %v4642_v29 = vadd.f32 %v689_v47, %v671_v23  ;;  %1738 = vmatmul.bf16.vlgmr.msra.gmra.mxu1 %v4581_v54  ;;  %1757 = vmatmul.bf16.vlgmr.msra.gmra.mxu3 %v4583_v59  ;;  %v3671_v23 = vld [vmem:[#allocation6 + $0x530] sm:$0xf]  ;;  %v3718_v32 = vor.u32 %v4205_v28, %v3717_v25 }
  0xc7   :  { %1811 = vmatpush.bf16.msrb.mxu1 %v3584_v63  ;;  %v4646_v34 = vpop.f32.mrf.mxu2  ;;  %2193 = vmatpush.bf16.msra.mxu3 %v3750_v30  ;;  %v3734_v63 = vor.u32 %v4209_v61, %v3733_v60  ;;  %v4176_v30 = vld [vmem:[#allocation6 + $0x4a8] sm:$0xf0]  ;;  %v4201_v60 = vld [vmem:[#allocation8 + $0x14] sm:$0xf0] }
  0xc8   :  { %1863 = vmatpush.bf16.msra.mxu0 %v3648_v35  ;;  %v826_v6 = vrot.slane %v4642_v29, 1  ;;  %v3599_v29 = vld [vmem:[#allocation6 + $0x4a0] sm:$0xf]  ;;  %v3805_v35 = vld [vmem:[#allocation8 + $0xe0] sm:$0xf] }
  0xc9   :  { %v4648_v36 = vpop.f32.mrf.mxu3  ;;  %1849 = vmatpush.bf16.msra.mxu2 %v3492_v37  ;;  %v3600_v33 = vor.u32 %v4176_v30, %v3599_v29  ;;  %v4227_v37 = vld [vmem:[#allocation8 + $0xe4] sm:$0xf0]  ;;  %v3575_v61 = vld [vmem:[#allocation6 + $0x470] sm:$0xf]  ;;  %v4212_v29 = vld [vmem:[#allocation8 + $0x74] sm:$0xf] }
  0xca   :  { %v653_v41 = vpop.f32.mrf.mxu0  ;;  %v3806_v39 = vor.u32 %v4227_v37, %v3805_v35  ;;  %v3751_v30 = vld [vmem:[#allocation8 + $0x78] sm:$0xf0]  ;;  %v4219_v35 = vld [vmem:[#allocation8 + $0xa4] sm:$0xf0] }
  0xcb   :  { %1812 = vmatpush.bf16.msrb.mxu1 %v3572_v11  ;;  %v672_v47 = vpop.f32.mrf.mxu1  ;;  %2194 = vmatpush.bf16.msra.mxu3 %v3742_v44  ;;  %v4207_v11 = vld [vmem:[#allocation8 + $0x44] sm:$0xf0] }
  0xcc   :  { %v673_v55 = vadd.f32 %v672_v47, %v653_v41  ;;  %1864 = vmatpush.bf16.msra.mxu0 %v3636_v50  ;;  %v3726_v14 = vor.u32 %v4207_v11, %v3725_v10  ;;  %v3709_v41 = vld [vmem:[#allocation8 + $0x20] sm:$0xf]  ;;  %v4173_v47 = vld [vmem:[#allocation6 + $0x490] sm:$0xf0]  ;;  %v4225_v50 = vld [vmem:[#allocation8 + $0xd4] sm:$0xf0] }
  0xcd   :  { %1850 = vmatpush.bf16.msra.mxu2 %v3480_v58  ;;  %v3710_v45 = vor.u32 %v4203_v42, %v3709_v41  ;;  %v3701_v58 = vld [vmem:[#allocation8 + $0x10] sm:$0xf]  ;;  %v3659_v11 = vld [vmem:[#allocation6 + $0x518] sm:$0xf]  ;;  %v3807_v41 = vld [vmem:[#allocation8 + $0xe8] sm:$0xf0] }
  0xce   :  { %v4652_v62 = vadd.f32 %v4637_v7, %v673_v55  ;;  %v3468_v7 = vor.u32 %v4143_v5, %v3467_v2  ;;  %v3798_v55 = vor.u32 %v4225_v50, %v3797_v48  ;;  %v4223_v2 = vld [vmem:[#allocation8 + $0xc4] sm:$0xf0]  ;;  %v3576_v5 = vor.u32 %v4170_v0, %v3575_v61  ;;  %v4210_v42 = vld [vmem:[#allocation8 + $0x64] sm:$0xf]  ;;  %v3743_v50 = vld [vmem:[#allocation8 + $0x68] sm:$0xf0] }
  0xcf   :  { %1813 = vmatpush.bf16.msrb.mxu1 %v3560_v24  ;;  %v4654_v3 = vpop.f32.mrf.mxu2  ;;  %2195 = vmatpush.bf16.msra.mxu3 %v3734_v63  ;;  %v4194_v24 = vld [vmem:[#allocation6 + $0x538] sm:$0xf0]  ;;  %v3702_v63 = vor.u32 %v4201_v60, %v3701_v58  ;;  %v4217_v58 = vld [vmem:[#allocation8 + $0x94] sm:$0xf0] }
  0xd0   :  { %v827_v8 = vrot.slane %v4652_v62, 1  ;;  %1865 = vmatpush.bf16.msra.mxu0 %v3624_v4  ;;  %v3672_v27 = vor.u32 %v4194_v24, %v3671_v23  ;;  %v3781_v23 = vld [vmem:[#allocation8 + $0xb0] sm:$0xf]  ;;  %v4221_v24 = vld [vmem:[#allocation8 + $0xb4] sm:$0xf0] }
  0xd1   :  { %v4658_v9 = vpop.f32.mrf.mxu3  ;;  %1851 = vmatpush.bf16.msra.mxu2 %v3468_v7  ;;  %v3782_v25 = vor.u32 %v4221_v24, %v3781_v23  ;;  %v3727_v24 = vld [vmem:[#allocation8 + $0x48] sm:$0xf0] }
  0xd2   :  { %v656_v13 = vpop.f32.mrf.mxu0  ;;  %v4661_v18 = vsel %vm825_vm2, %v826_v6, %v827_v8  ;;  %v3790_v6 = vor.u32 %v4223_v2, %v3789_v1  ;;  %v4224_v1 = vld [vmem:[#allocation8 + $0xd4] sm:$0xf]  ;;  %v3799_v2 = vld [vmem:[#allocation8 + $0xd8] sm:$0xf0] }
  0xd3   :  { %1887 = vmatpush.bf16.msra.mxu1 %v1728_v57  ;;  %v675_v19 = vpop.f32.mrf.mxu1  ;;  %2196 = vmatpush.bf16.msra.mxu3 %v3726_v14  ;;  %v3660_v14 = vor.u32 %v4191_v12, %v3659_v11 }
  0xd4   :  { %v676_v22 = vadd.f32 %v675_v19, %v656_v13  ;;  %3685 = vmatmul.msk.bf16.vlgmr.msrb.gmra.mxu2 %vm625_vm1, %v4575_v56  ;;  %1866 = vmatpush.bf16.msra.mxu0 %v3612_v20 }
  0xd5   :  { %3456 = vmatmul.msk.bf16.gmra.mxu0 %vm625_vm1, %v4579_v49  ;;  %2212 = vmatpush.bf16.msrb.mxu2 %v3814_v21 }
  0xd6   :  { %v4668_v26 = vadd.f32 %v4646_v34, %v676_v22  ;;  %1743 = vmatmul.bf16.gmra.mxu1 %v4592_v46  ;;  %1762 = vmatmul.bf16.gmra.mxu3 %v4594_v51  ;;  %v3564_v22 = vor.u32 %v4167_v17, %v3563_v16  ;;  %v4222_v17 = vld [vmem:[#allocation8 + $0xc4] sm:$0xf] }
  0xd7   :  { %v727_v31 = vpop.f32.mrf.mxu2  ;;  %1888 = vmatpush.bf16.msra.mxu1 %v3672_v27  ;;  %2197 = vmatpush.bf16.msra.mxu3 %v3718_v32  ;;  %v3815_v27 = vld [vmem:[#allocation8 + $0xf8] sm:$0xf0] }
  0xd8   :  { %v835_v38 = vrot.slane %v4668_v26, 1  ;;  %v728_v34 = vadd.f32 %v727_v31, %v4648_v36  ;;  %1867 = vmatpush.bf16.msra.mxu0 %v3600_v33  ;;  %v3588_v36 = vor.u32 %v4173_v47, %v3587_v43  ;;  %v4228_v26 = vld [vmem:[#allocation8 + $0xf4] sm:$0xf]  ;;  %v3773_v31 = vld [vmem:[#allocation8 + $0xa0] sm:$0xf]  ;;  %v3754_v33 = vor.u32 %v4212_v29, %v3751_v30 }
  0xd9   :  { %v4674_v40 = vpop.f32.mrf.mxu3  ;;  %2213 = vmatpush.bf16.msrb.mxu2 %v3806_v39  ;;  %v3818_v28 = vor.u32 %v4228_v26, %v3815_v27  ;;  %v4226_v39 = vld [vmem:[#allocation8 + $0xe4] sm:$0xf]  ;;  %v4235_v47 = vld [vmem:[#allocation8 + $0x124] sm:$0x30]  ;;  %v4233_v29 = vld [vmem:[#allocation8 + $0x114] sm:$0xf0] }
  0xda   :  { %v658_v44 = vpop.f32.mrf.mxu0  ;;  %v4677_v52 = vsel %vm825_vm2, %v827_v8, %v835_v38  ;;  %v3810_v48 = vor.u32 %v4226_v39, %v3807_v41 }
  0xdb   :  { %v677_v53 = vpop.f32.mrf.mxu1  ;;  %2198 = vmatpush.bf16.msra.mxu3 %v3710_v45  ;;  %1889 = vmatpush.bf16.msra.mxu1 %v3660_v14  ;;  %v3837_v45 = vld [vmem:[#allocation8 + $0x120] sm:$0xf] }
  0xdc   :  { %v678_v57 = vadd.f32 %v677_v53, %v658_v44  ;;  %1868 = vmatpush.bf16.msra.mxu0 %v3588_v36 }
  0xdd   :  { %2214 = vmatpush.bf16.msrb.mxu2 %v3798_v55  ;;  %v3838_v55 = vor.u32 %v4235_v47, %v3837_v45  ;;  %v3775_v45 = vld [vmem:[#allocation8 + $0xa8] sm:$0xf0]  ;;  %v4202_v47 = vld [vmem:[#allocation8 + $0x24] sm:$0xf] }
  0xde   :  { %v4680_v62 = vadd.f32 %v4654_v3, %v678_v57  ;;  %v3693_v3 = vld [vmem:[#allocation8] sm:$0xf]  ;;  %v3746_v57 = vor.u32 %v4210_v42, %v3743_v50 }
  0xdf   :  { %v729_v4 = vpop.f32.mrf.mxu2  ;;  %2199 = vmatpush.bf16.msra.mxu3 %v3702_v63  ;;  %v2188_v0 = vsel %vm632_vm0, %v3838_v55, 0 }
  0xe0   :  { %v841_v8 = vrot.slane %v4680_v62, 1  ;;  %v730_v7 = vadd.f32 %v729_v4, %v4658_v9  ;;  %1869 = vmatpush.bf16.msra.mxu0 %v3576_v5  ;;  %v3694_v9 = vor.u32 %v4199_v15, %v3693_v3  ;;  %v3802_v4 = vor.u32 %v4224_v1, %v3799_v2  ;;  %v4208_v5 = vld [vmem:[#allocation8 + $0x54] sm:$0xf]  ;;  %v4215_v3 = vld [vmem:[#allocation8 + $0x84] sm:$0xf0] }
  0xe1   :  { %v4684_v10 = vpop.f32.mrf.mxu3  ;;  %2215 = vmatpush.bf16.msrb.mxu2 %v3790_v6  ;;  %v3735_v6 = vld [vmem:[#allocation8 + $0x58] sm:$0xf0] }
  0xe2   :  { %v746_v13 = vpop.f32.mrf.mxu0  ;;  %v4689_v19 = vsel %vm825_vm2, %v835_v38, %v841_v8  ;;  %v3774_v38 = vor.u32 %v4219_v35, %v3773_v31  ;;  %v3738_v12 = vor.u32 %v4208_v5, %v3735_v6  ;;  %v4220_v31 = vld [vmem:[#allocation8 + $0xb4] sm:$0xf]  ;;  %v3821_v6 = vld [vmem:[#allocation8 + $0x100] sm:$0xf] }
  0xe3   :  { %v4691_v20 = vadd.f32 %v746_v13, %v728_v34  ;;  %v765_v21 = vpop.f32.mrf.mxu1  ;;  %2200 = vmatpush.bf16.msra.mxu3 %v3694_v9 }
  0xe4   :  { %3686 = vmatmul.msk.bf16.gmra.mxu2 %vm625_vm1, %v4579_v49  ;;  %1870 = vmatpush.bf16.msra.mxu0 %v3564_v22 }
  0xe5   :  { %1795 = vmatmul.bf16.vlgmr.msrb.gmra.mxu0 %v4581_v54  ;;  %2216 = vmatpush.bf16.msrb.mxu2 %v3782_v25  ;;  %v829_v60 = vrot.slane %v4691_v20, 1  ;;  %v3791_v20 = vld [vmem:[#allocation8 + $0xc8] sm:$0xf0] }
  0xe6   :  { %1814 = vmatmul.bf16.vlgmr.msrb.gmra.mxu1 %v4583_v59  ;;  %3687 = vmatmul.msk.bf16.vlgmr.msrb.gmra.mxu3 %vm625_vm1, %v4575_v56  ;;  %v3794_v23 = vor.u32 %v4222_v17, %v3791_v20 }
  0xe7   :  { %v732_v32 = vpop.f32.mrf.mxu2  ;;  %2269 = vmatpush.bf16.msrb.mxu3 %v3818_v28  ;;  %2250 = vmatpush.bf16.msrb.mxu1 %v3754_v33  ;;  %v4204_v33 = vld [vmem:[#allocation8 + $0x34] sm:$0xf] }
  0xe8   :  { %v733_v37 = vadd.f32 %v732_v32, %v4674_v40  ;;  %v3765_v40 = vld [vmem:[#allocation8 + $0x90] sm:$0xf]  ;;  %2236 = vmatpush.bf16.msrb.mxu0 %v2188_v0  ;;  %v3783_v32 = vld [vmem:[#allocation8 + $0xb8] sm:$0xf0] }
  0xe9   :  { %v784_v34 = vpop.f32.mrf.mxu3  ;;  %2217 = vmatpush.bf16.msrb.mxu2 %v3774_v38  ;;  %v3766_v61 = vor.u32 %v4217_v58, %v3765_v40  ;;  %v3719_v38 = vld [vmem:[#allocation8 + $0x38] sm:$0xf0] }
  0xea   :  { %v4700_v43 = vadd.f32 %v784_v34, %v765_v21  ;;  %v748_v44 = vpop.f32.mrf.mxu0  ;;  %v4206_v21 = vld [vmem:[#allocation8 + $0x44] sm:$0xf]  ;;  %v3722_v41 = vor.u32 %v4204_v33, %v3719_v38  ;;  %v3703_v0 = vld [vmem:[#allocation8 + $0x18] sm:$0xf0] }
  0xeb   :  { %v749_v53 = vadd.f32 %v748_v44, %v730_v7  ;;  %v767_v36 = vpop.f32.mrf.mxu1  ;;  %2270 = vmatpush.bf16.msrb.mxu3 %v3810_v48  ;;  %2251 = vmatpush.bf16.msrb.mxu1 %v3746_v57  ;;  %v3757_v7 = vld [vmem:[#allocation8 + $0x80] sm:$0xf]  ;;  %v3730_v27 = vor.u32 %v4206_v21, %v3727_v24  ;;  %v4218_v44 = vld [vmem:[#allocation8 + $0xa4] sm:$0xf] }
  0xec   :  { %v3758_v15 = vor.u32 %v4215_v3, %v3757_v7  ;;  %v4231_v7 = vld [vmem:[#allocation8 + $0x104] sm:$0xf0]  ;;  %v4214_v3 = vld [vmem:[#allocation8 + $0x84] sm:$0xf] }
  0xed   :  { %v830_v63 = vrot.slane %v749_v53, 1  ;;  %2218 = vmatpush.bf16.msrb.mxu2 %v3766_v61  ;;  %v3778_v53 = vor.u32 %v4218_v44, %v3775_v45  ;;  %v4242_v45 = vld [vmem:[#allocation9 + $0x30] sm:$0xff] }
  0xef   :  { %v734_v11 = vpop.f32.mrf.mxu2  ;;  %v4705_v13 = vsel %vm825_vm2, %v829_v60, %v830_v63  ;;  %2271 = vmatpush.bf16.msrb.mxu3 %v3802_v4  ;;  %2252 = vmatpush.bf16.msrb.mxu1 %v3738_v12  ;;  %v3767_v60 = vld [vmem:[#allocation8 + $0x98] sm:$0xf0]  ;;  %v3822_v12 = vor.u32 %v4231_v7, %v3821_v6 }
  0xf0   :  { %v735_v14 = vadd.f32 %v734_v11, %v4684_v10  ;;  %v3829_v10 = vld [vmem:[#allocation8 + $0x110] sm:$0xf] }
  0xf1   :  { %v786_v16 = vpop.f32.mrf.mxu3  ;;  %2219 = vmatpush.bf16.msrb.mxu2 %v3758_v15  ;;  %v3830_v30 = vor.u32 %v4233_v29, %v3829_v10  ;;  %v4198_v15 = vld [vmem:[#allocation8 + $0x4] sm:$0xf]  ;;  %v3839_v10 = vld [vmem:[#allocation8 + $0x128] sm:$0x30] }
  0xf2   :  { %v787_v9 = vadd.f32 %v786_v16, %v767_v36  ;;  %v751_v22 = vpop.f32.mrf.mxu0  ;;  %v3711_v36 = vld [vmem:[#allocation8 + $0x28] sm:$0xf0] }
  0xf3   :  { %v752_v25 = vadd.f32 %v751_v22, %v733_v37  ;;  %v770_v26 = vpop.f32.mrf.mxu1  ;;  %2272 = vmatpush.bf16.msrb.mxu3 %v3794_v23  ;;  %2253 = vmatpush.bf16.msrb.mxu1 %v3730_v27  ;;  %v3786_v37 = vor.u32 %v4220_v31, %v3783_v32  ;;  %v3714_v40 = vor.u32 %v4202_v47, %v3711_v36  ;;  %v3695_v23 = vld [vmem:[#allocation8 + $0x8] sm:$0xf0]  ;;  %v4250_v47 = vld [vmem:[#allocation9 + $0x70] sm:$0xff] }
  0xf4   :  { %1852 = vmatmul.bf16.vlgmr.msra.gmra.mxu2 %v4581_v54  ;;  %2237 = vmatpush.bf16.msrb.mxu0 %v3830_v30  ;;  %v4243_v29 = vld [vmem:[#allocation9 + $0x38] sm:$0xff] }
  0xf5   :  { %v837_v28 = vrot.slane %v752_v25, 1  ;;  %1800 = vmatmul.bf16.gmra.mxu0 %v4592_v46  ;;  %v4251_v30 = vld [vmem:[#allocation9 + $0x78] sm:$0xff] }
  0xf6   :  { %1819 = vmatmul.bf16.gmra.mxu1 %v4594_v51  ;;  %3688 = vmatmul.msk.bf16.gmra.mxu3 %vm625_vm1, %v4579_v49 }
  0xf7   :  { %v803_v35 = vpop.f32.mrf.mxu2  ;;  %v4714_v34 = vsel %vm825_vm2, %v830_v63, %v837_v28  ;;  %2273 = vmatpush.bf16.msrb.mxu3 %v3786_v37  ;;  %2254 = vmatpush.bf16.msrb.mxu1 %v3722_v41  ;;  %v4200_v63 = vld [vmem:[#allocation8 + $0x14] sm:$0xf]  ;;  %v4254_v37 = vld [vmem:[#allocation9 + $0x90] sm:$0x30] }
  0xf8   :  { %v804_v39 = vadd.f32 %v803_v35, %v4700_v43  ;;  %v4216_v43 = vld [vmem:[#allocation8 + $0x94] sm:$0xf]  ;;  %v3706_v2 = vor.u32 %v4200_v63, %v3703_v0  ;;  %2238 = vmatpush.bf16.msrb.mxu0 %v3822_v12  ;;  %v3921_v35 = vld [vmem:[#allocation9 + $0x90] sm:$0xf]  ;;  %v4249_v63 = vld [vmem:[#allocation9 + $0x68] sm:$0xff] }
  0xf9   :  { %v789_v42 = vpop.f32.mrf.mxu3  ;;  %v3770_v61 = vor.u32 %v4216_v43, %v3767_v60  ;;  %v4230_v0 = vld [vmem:[#allocation8 + $0x104] sm:$0xf] }
  0xfa   :  { %v790_v48 = vadd.f32 %v789_v42, %v770_v26  ;;  %v753_v50 = vpop.f32.mrf.mxu0  ;;  %v832_v16 = vrot.slane %v804_v39, 1  ;;  %v3922_v39 = vor.u32 %v4254_v37, %v3921_v35 }
  0xfb   :  { %v4717_v55 = vadd.f32 %v753_v50, %v735_v14  ;;  %v772_v57 = vpop.f32.mrf.mxu1  ;;  %2274 = vmatpush.bf16.msrb.mxu3 %v3778_v53  ;;  %2255 = vmatpush.bf16.msrb.mxu1 %v3714_v40  ;;  %v3759_v14 = vld [vmem:[#allocation8 + $0x88] sm:$0xf0]  ;;  %v4232_v50 = vld [vmem:[#allocation8 + $0x114] sm:$0xf] }
  0xfc   :  { %v3762_v22 = vor.u32 %v4214_v3, %v3759_v14  ;;  %v4253_v3 = vld [vmem:[#allocation9 + $0x88] sm:$0xff]  ;;  %v4248_v14 = vld [vmem:[#allocation9 + $0x60] sm:$0xff] }
  0xfd   :  { %v843_v58 = vrot.slane %v4717_v55, 1 }
  0xff   :  { %v805_v1 = vpop.f32.mrf.mxu2  ;;  %v4723_v4 = vsel %vm825_vm2, %v837_v28, %v843_v58  ;;  %2275 = vmatpush.bf16.msrb.mxu3 %v3770_v61  ;;  %2256 = vmatpush.bf16.msrb.mxu1 %v3706_v2  ;;  %v4234_v28 = vld [vmem:[#allocation8 + $0x124] sm:$0xf]  ;;  %v4241_v61 = vld [vmem:[#allocation9 + $0x28] sm:$0xff]  ;;  %v3823_v2 = vld [vmem:[#allocation8 + $0x108] sm:$0xf0] }
 0x100   :  { %v806_v5 = vadd.f32 %v805_v1, %v787_v9  ;;  %v3698_v9 = vor.u32 %v4198_v15, %v3695_v23  ;;  %v4239_v23 = vld [vmem:[#allocation9 + $0x18] sm:$0xff] }
 0x101   :  { %v791_v11 = vpop.f32.mrf.mxu3 }
 0x102   :  { %v833_v17 = vrot.slane %v806_v5, 1  ;;  %v792_v20 = vadd.f32 %v791_v11, %v772_v57  ;;  %v1181_v21 = vpop.f32.mrf.mxu0  ;;  %v3831_v57 = vld [vmem:[#allocation8 + $0x118] sm:$0xf0] }
 0x103   :  { %v1182_v24 = vadd.f32 %v1181_v21, %v4661_v18  ;;  %v1200_v25 = vpop.f32.mrf.mxu1  ;;  %2276 = vmatpush.bf16.msrb.mxu3 %v3762_v22  ;;  %v3842_v18 = vor.u32 %v4234_v28, %v3839_v10  ;;  %2257 = vmatpush.bf16.msrb.mxu1 %v3698_v9  ;;  %v3834_v40 = vor.u32 %v4232_v50, %v3831_v57  ;;  %v4246_v10 = vld [vmem:[#allocation9 + $0x50] sm:$0xff] }
 0x104   :  { %1857 = vmatmul.bf16.gmra.mxu2 %v4592_v46  ;;  %v4728_v26 = vsel %vm825_vm2, %v832_v16, %v833_v17 }
 0x105   :  { %v1201_v27 = vadd.f32 %v1200_v25, %v1182_v24  ;;  %1871 = vmatmul.bf16.vlgmr.msra.gmra.mxu0 %v4583_v59  ;;  %v2191_v33 = vsel %vm632_vm0, %v3842_v18, 0 }
 0x106   :  { %3689 = vmatmul.msk.bf16.vlgmr.msra.gmra.mxu1 %vm625_vm1, %v4575_v56  ;;  %2201 = vmatmul.bf16.vlgmr.msra.gmra.mxu3 %v4581_v54 }
 0x107   :  { %v808_v31 = vpop.f32.mrf.mxu2  ;;  %2494 = vmatpush.bf16.msra.mxu0 %v4243_v29  ;;  %2513 = vmatpush.bf16.msra.mxu1 %v4251_v30  ;;  %v4238_v30 = vld [vmem:[#allocation9 + $0x10] sm:$0xff] }
 0x108   :  { %v809_v32 = vadd.f32 %v808_v31, %v790_v48  ;;  %2293 = vmatpush.bf16.msra.mxu2 %v2191_v33  ;;  %v2492_v48 = vsel %vm632_vm0, %v3922_v39, 0  ;;  %v4245_v33 = vld [vmem:[#allocation9 + $0x48] sm:$0xff] }
 0x109   :  { %v1219_v38 = vpop.f32.mrf.mxu3  ;;  %2537 = vmatpush.bf16.msra.mxu3 %v2492_v48 }
 0x10a   :  { %v839_v41 = vrot.slane %v809_v32, 1  ;;  %v4735_v42 = vadd.f32 %v1219_v38, %v1201_v27  ;;  %v1183_v44 = vpop.f32.mrf.mxu0  ;;  %v859_v27 = vsel %vm825_vm2, %v841_v8, 0.0  ;;  %v4252_v32 = vld [vmem:[#allocation9 + $0x80] sm:$0xff] }
 0x10b   :  { %v1184_v53 = vadd.f32 %v1183_v44, %v4677_v52  ;;  %v1202_v36 = vpop.f32.mrf.mxu1  ;;  %2495 = vmatpush.bf16.msra.mxu0 %v4242_v45  ;;  %2514 = vmatpush.bf16.msra.mxu1 %v4250_v47  ;;  %v3826_v52 = vor.u32 %v4230_v0, %v3823_v2  ;;  %v4244_v38 = vld [vmem:[#allocation9 + $0x40] sm:$0xff] }
 0x10c   :  { %v4740_v43 = vsel %vm825_vm2, %v833_v17, %v839_v41  ;;  %2294 = vmatpush.bf16.msra.mxu2 %v3834_v40  ;;  %v4240_v17 = vld [vmem:[#allocation9 + $0x20] sm:$0xff]  ;;  %v860_v40 = vsel %vm825_vm2, %v843_v58, 0.0 }
 0x10d   :  { %v1203_v60 = vadd.f32 %v1202_v36, %v1184_v53  ;;  %2538 = vmatpush.bf16.msra.mxu3 %v4253_v3  ;;  %v4236_v44 = vld [vmem:[#allocation9] sm:$0xff] }
 0x10f   :  { %v810_v1 = vpop.f32.mrf.mxu2  ;;  %2496 = vmatpush.bf16.msra.mxu0 %v4241_v61  ;;  %2515 = vmatpush.bf16.msra.mxu1 %v4249_v63 }
 0x110   :  { %v4742_v5 = vadd.f32 %v810_v1, %v792_v20  ;;  %2295 = vmatpush.bf16.msra.mxu2 %v3826_v52 }
 0x111   :  { %v1221_v6 = vpop.f32.mrf.mxu3  ;;  %2539 = vmatpush.bf16.msra.mxu3 %v4252_v32 }
 0x112   :  { %v845_v7 = vrot.slane %v4742_v5, 1  ;;  %v4745_v11 = vadd.f32 %v1221_v6, %v1203_v60  ;;  %v1186_v12 = vpop.f32.mrf.mxu0 }
 0x113   :  { %v1187_v15 = vadd.f32 %v1186_v12, %v4689_v19  ;;  %v1205_v16 = vpop.f32.mrf.mxu1  ;;  %2516 = vmatpush.bf16.msra.mxu1 %v4248_v14  ;;  %v4247_v19 = vld [vmem:[#allocation9 + $0x58] sm:$0xff]  ;;  %2497 = vmatpush.bf16.msra.mxu0 %v4240_v17 }
 0x114   :  { %2220 = vmatmul.bf16.vlgmr.msrb.gmra.mxu2 %v4583_v59  ;;  %v4752_v20 = vsel %vm825_vm2, %v839_v41, %v845_v7  ;;  %v861_v17 = vsel %vm825_vm2, %v845_v7, 0.0 }
 0x115   :  { %v1206_v21 = vadd.f32 %v1205_v16, %v1187_v15  ;;  %1876 = vmatmul.bf16.gmra.mxu0 %v4594_v51 }
 0x116   :  { %3690 = vmatmul.msk.bf16.gmra.mxu1 %vm625_vm1, %v4579_v49  ;;  %2206 = vmatmul.bf16.gmra.mxu3 %v4592_v46 }
 0x117   :  { %v1238_v22 = vpop.f32.mrf.mxu2  ;;  %2517 = vmatpush.bf16.msra.mxu1 %v4247_v19  ;;  %2498 = vmatpush.bf16.msra.mxu0 %v4239_v23 }
 0x118   :  { %v1239_v24 = vadd.f32 %v1238_v22, %v4705_v13  ;;  %v4237_v13 = vld [vmem:[#allocation9 + $0x8] sm:$0xff] }
 0x119   :  { %v1224_v25 = vpop.f32.mrf.mxu3 }
 0x11a   :  { %v4759_v9 = vadd.f32 %v1224_v25, %v1206_v21  ;;  %v1188_v28 = vpop.f32.mrf.mxu0 }
 0x11b   :  { %v1189_v18 = vadd.f32 %v1188_v28, %v859_v27  ;;  %v1207_v29 = vpop.f32.mrf.mxu1  ;;  %2518 = vmatpush.bf16.msra.mxu1 %v4246_v10  ;;  %2499 = vmatpush.bf16.msra.mxu0 %v4238_v30  ;;  %v4262_v30 = vld [vmem:[#allocation12 + $0x38] sm:$0xff] }
 0x11c   :  { %2881 = vmatpush.bf16.msrb.mxu2 %v4262_v30 }
 0x11d   :  { %v1208_v31 = vadd.f32 %v1207_v29, %v1189_v18 }
 0x11f   :  { %v4764_v35 = vpop.f32.mrf.mxu2  ;;  %2519 = vmatpush.bf16.msra.mxu1 %v4245_v33  ;;  %2500 = vmatpush.bf16.msra.mxu0 %v4237_v13  ;;  %v4260_v13 = vld [vmem:[#allocation12 + $0x28] sm:$0xff] }
 0x121   :  { %v1226_v37 = vpop.f32.mrf.mxu3 }
 0x122   :  { %v4766_v62 = vadd.f32 %v1226_v37, %v1208_v31  ;;  %v1257_v8 = vpop.f32.mrf.mxu0 }
 0x123   :  { %v1258_v39 = vadd.f32 %v1257_v8, %v1239_v24  ;;  %v1276_v41 = vpop.f32.mrf.mxu1  ;;  %2520 = vmatpush.bf16.msra.mxu1 %v4244_v38  ;;  %2501 = vmatpush.bf16.msra.mxu0 %v4236_v44 }
 0x124   :  { %2225 = vmatmul.bf16.gmra.mxu2 %v4594_v51 }
 0x125   :  { %v4769_v45 = vadd.f32 %v1276_v41, %v1258_v39  ;;  %3843 = vmatmul.msk.bf16.vlgmr.msrb.gmra.mxu0 %vm625_vm1, %v4575_v56  ;;  %v4259_v39 = vld [vmem:[#allocation12 + $0x20] sm:$0xff] }
 0x126   :  { %2258 = vmatmul.bf16.vlgmr.msrb.gmra.mxu1 %v4581_v54  ;;  %2277 = vmatmul.bf16.vlgmr.msrb.gmra.mxu3 %v4583_v59 }
 0x127   :  { %v1243_v47 = vpop.f32.mrf.mxu2 }
 0x128   :  { %v1244_v50 = vadd.f32 %v1243_v47, %v4723_v4 }
 0x129   :  { %v1295_v53 = vpop.f32.mrf.mxu3 }
 0x12a   :  { %v1296_v36 = vadd.f32 %v1295_v53, %v4728_v26  ;;  %v4777_v48 = vpop.f32.mrf.mxu0 }
 0x12b   :  { %v4779_v57 = vpop.f32.mrf.mxu1 }
 0x12f   :  { %v1245_v60 = vpop.f32.mrf.mxu2 }
 0x130   :  { %v1246_v61 = vadd.f32 %v1245_v60, %v860_v40 }
 0x131   :  { %v1297_v63 = vpop.f32.mrf.mxu3 }
 0x132   :  { %v1298_v0 = vadd.f32 %v1297_v63, %v4740_v43  ;;  %v1262_v1 = vpop.f32.mrf.mxu0 }
 0x133   :  { %v1263_v2 = vadd.f32 %v1262_v1, %v1244_v50  ;;  %v1281_v52 = vpop.f32.mrf.mxu1 }
 0x134   :  { %3845 = vmatmul.msk.bf16.vlgmr.msra.gmra.mxu2 %vm625_vm1, %v4575_v56 }
 0x135   :  { %v4787_v4 = vadd.f32 %v1281_v52, %v1263_v2  ;;  %3844 = vmatmul.msk.bf16.gmra.mxu0 %vm625_vm1, %v4579_v49 }
 0x136   :  { %2263 = vmatmul.bf16.gmra.mxu1 %v4592_v46  ;;  %2282 = vmatmul.bf16.gmra.mxu3 %v4594_v51 }
 0x137   :  { %v1314_v55 = vpop.f32.mrf.mxu2 }
 0x138   :  { %v1315_v58 = vadd.f32 %v1314_v55, %v1296_v36 }
 0x139   :  { %v1300_v26 = vpop.f32.mrf.mxu3 }
 0x13a   :  { %v1301_v43 = vadd.f32 %v1300_v26, %v4752_v20  ;;  %v1264_v6 = vpop.f32.mrf.mxu0 }
 0x13b   :  { %v1265_v12 = vadd.f32 %v1264_v6, %v1246_v61  ;;  %v1283_v3 = vpop.f32.mrf.mxu1  ;;  %v4257_v61 = vld [vmem:[#allocation12 + $0x10] sm:$0xff] }
 0x13d   :  { %v4794_v14 = vadd.f32 %v1283_v3, %v1265_v12 }
 0x13f   :  { %v1316_v15 = vpop.f32.mrf.mxu2 }
 0x140   :  { %v1317_v16 = vadd.f32 %v1316_v15, %v1298_v0  ;;  %v2580_v15 = vld [vmem:[#allocation11] sm:$0xff] }
 0x141   :  { %v1302_v21 = vpop.f32.mrf.mxu3 }
 0x142   :  { %v1303_v19 = vadd.f32 %v1302_v21, %v861_v17  ;;  %v1333_v22 = vpop.f32.mrf.mxu0  ;;  %v2583_v21 = vld [vmem:[#allocation11 + $0x18] sm:$0xff] }
 0x143   :  { %v4799_v23 = vadd.f32 %v1333_v22, %v1315_v58  ;;  %v1739_v24 = vpop.f32.mrf.mxu1  ;;  %v4256_v58 = vld [vmem:[#allocation12 + $0x8] sm:$0xff]  ;;  %v4255_v22 = vld [vmem:[#allocation12] sm:$0xff] }
 0x144   :  { %3846 = vmatmul.msk.bf16.gmra.mxu2 %vm625_vm1, %v4579_v49 }
 0x145   :  { %2502 = vmatmul.bf16.vlgmr.msra.gmra.mxu0 %v4581_v54 }
 0x146   :  { %2521 = vmatmul.bf16.vlgmr.msra.gmra.mxu1 %v4583_v59  ;;  %3923 = vmatmul.msk.bf16.vlgmr.msra.gmra.mxu3 %vm625_vm1, %v4575_v56  ;;  %v4261_v59 = vld [vmem:[#allocation12 + $0x30] sm:$0xff] }
 0x147   :  { %v1319_v20 = vpop.f32.mrf.mxu2  ;;  %2882 = vmatpush.bf16.msrb.mxu2 %v4261_v59 }
 0x148   :  { %v1320_v5 = vadd.f32 %v1319_v20, %v1301_v43 }
 0x149   :  { %v1758_v25 = vpop.f32.mrf.mxu3 }
 0x14a   :  { %v1335_v7 = vpop.f32.mrf.mxu0 }
 0x14b   :  { %v4807_v27 = vadd.f32 %v1335_v7, %v1317_v16  ;;  %v1741_v28 = vpop.f32.mrf.mxu1  ;;  %2883 = vmatpush.bf16.msrb.mxu2 %v4260_v13 }
 0x14f   :  { %v1321_v10 = vpop.f32.mrf.mxu2  ;;  %2884 = vmatpush.bf16.msrb.mxu2 %v4259_v39 }
 0x150   :  { %v1322_v18 = vadd.f32 %v1321_v10, %v1303_v19 }
 0x151   :  { %v1760_v29 = vpop.f32.mrf.mxu3 }
 0x152   :  { %v1338_v31 = vpop.f32.mrf.mxu0  ;;  %v1761_v41 = vadd.f32 %v1760_v29, %v1741_v28 }
 0x153   :  { %v4809_v32 = vadd.f32 %v1338_v31, %v1320_v5  ;;  %v1744_v54 = vpop.f32.mrf.mxu1 }
 0x155   :  { %2507 = vmatmul.bf16.gmra.mxu0 %v4592_v46  ;;  %v1759_v46 = vadd.f32 %v1758_v25, %v1739_v24 }
 0x156   :  { %2526 = vmatmul.bf16.gmra.mxu1 %v4594_v51  ;;  %3924 = vmatmul.msk.bf16.gmra.mxu3 %vm625_vm1, %v4579_v49  ;;  %v4258_v51 = vld [vmem:[#allocation12 + $0x18] sm:$0xff] }
 0x157   :  { %v1777_v56 = vpop.f32.mrf.mxu2  ;;  %2885 = vmatpush.bf16.msrb.mxu2 %v4258_v51 }
 0x158   :  { %v1778_v53 = vadd.f32 %v1777_v56, %v1759_v46 }
 0x159   :  { %v1763_v33 = vpop.f32.mrf.mxu3 }
 0x15a   :  { %v1340_v37 = vpop.f32.mrf.mxu0  ;;  %v1913_v63 = vrot.slane %v1778_v53, 2  ;;  %v1764_v0 = vadd.f32 %v1763_v33, %v1744_v54 }
 0x15b   :  { %v4815_v8 = vadd.f32 %v1340_v37, %v1322_v18  ;;  %v1746_v38 = vpop.f32.mrf.mxu1  ;;  %2886 = vmatpush.bf16.msrb.mxu2 %v4257_v61 }
 0x15f   :  { %v1779_v44 = vpop.f32.mrf.mxu2  ;;  %2887 = vmatpush.bf16.msrb.mxu2 %v4256_v58 }
 0x160   :  { %v1780_v47 = vadd.f32 %v1779_v44, %v1761_v41 }
 0x161   :  { %v1765_v50 = vpop.f32.mrf.mxu3 }
 0x162   :  { %v1796_v36 = vpop.f32.mrf.mxu0  ;;  %v1914_v40 = vrot.slane %v1780_v47, 2  ;;  %v1766_v24 = vadd.f32 %v1765_v50, %v1746_v38  ;;  %v1241_v38 = vadd.f32 %v4764_v35, %v4714_v34 }
 0x163   :  { %v1815_v49 = vpop.f32.mrf.mxu1  ;;  %2888 = vmatpush.bf16.msrb.mxu2 %v4255_v22 }
 0x164   :  { %v1816_v60 = vadd.f32 %v1815_v49, %v1796_v36  ;;  %v1915_v2 = vsel %vm632_vm0, %v1913_v63, %v1914_v40  ;;  %v1260_v53 = vadd.f32 %v4777_v48, %v1241_v38 }
 0x165   :  { %v1949_v12 = vadd.f32 %v1915_v2, %v4735_v42 }
 0x166   :  { %v1279_v35 = vadd.f32 %v4779_v57, %v1260_v53 }
 0x167   :  { %v1782_v1 = vpop.f32.mrf.mxu2  ;;  %v2586_v20 = vadd.f32 %v2580_v15, %v1949_v12 }
 0x168   :  { %v1783_v52 = vadd.f32 %v1782_v1, %v1764_v0 }
 0x169   :  { %v1834_v55 = vpop.f32.mrf.mxu3 }
 0x16a   :  { %v1922_v26 = vrot.slane %v1783_v52, 2  ;;  %v1835_v43 = vadd.f32 %v1834_v55, %v1816_v60  ;;  %v1798_v6 = vpop.f32.mrf.mxu0 }
 0x16b   :  { %v1817_v3 = vpop.f32.mrf.mxu1 }
 0x16c   :  { %v1923_v16 = vsel %vm632_vm0, %v1914_v40, %v1922_v26  ;;  %v1818_v17 = vadd.f32 %v1817_v3, %v1798_v6  ;;  %v1916_v54 = vrot.slane %v1835_v43, 2 }
 0x16d   :  { %v1952_v19 = vadd.f32 %v1923_v16, %v4745_v11 }
 0x16f   :  { %v1784_v5 = vpop.f32.mrf.mxu2  ;;  %v2589_v25 = vadd.f32 %v2583_v21, %v1952_v19 }
 0x170   :  { %v1785_v7 = vadd.f32 %v1784_v5, %v1766_v24 }
 0x171   :  { %v2598_v28 = vmax.f32 %v2586_v20, %v2589_v25  ;;  %v1836_v10 = vpop.f32.mrf.mxu3 }
 0x172   :  { %v1928_v18 = vrot.slane %v1785_v7, 2  ;;  %v1837_v42 = vadd.f32 %v1836_v10, %v1818_v17  ;;  %v1801_v29 = vpop.f32.mrf.mxu0 }
 0x173   :  { %v2599_v30 = vrot.slane %v2598_v28, 4  ;;  %v1820_v31 = vpop.f32.mrf.mxu1 }
 0x174   :  { %v1929_v59 = vsel %vm632_vm0, %v1922_v26, %v1928_v18  ;;  %v1946_v56 = vsel %vm632_vm0, %v1928_v18, 0.0  ;;  %v1917_v11 = vrot.slane %v1837_v42, 2  ;;  %v1821_v41 = vadd.f32 %v1820_v31, %v1801_v29 }
 0x175   :  { %v1955_v33 = vadd.f32 %v1929_v59, %v4759_v9  ;;  %v1958_v13 = vadd.f32 %v1946_v56, %v4766_v62  ;;  %v2600_v37 = vmax.f32 %v2598_v28, %v2599_v30 }
 0x176   :  { %v1918_v39 = vsel %vm632_vm0, %v1916_v54, %v1917_v11 }
 0x177   :  { %v2592_v44 = vadd.f32 %v2580_v15, %v1955_v33  ;;  %v2595_v46 = vadd.f32 %v2583_v21, %v1958_v13  ;;  %v2601_v47 = vrot.slane %v2600_v37, 2  ;;  %v4829_v50 = vadd.f32 %v1918_v39, %v4769_v45  ;;  %v1853_v51 = vpop.f32.mrf.mxu2  ;;  %v4836_v45 = vld [vmem:[%s4920_s4] sm:$0x7] }
 0x178   :  { %v2642_v43 = vperm.slane %v4836_v45, 0 }
 0x179   :  { %v2602_v36 = vmax.f32 %v2600_v37, %v2601_v47  ;;  %v2619_v9 = vmax.f32 %v2592_v44, %v2595_v46  ;;  %v1839_v49 = vpop.f32.mrf.mxu3 }
 0x17a   :  { %v1840_v62 = vadd.f32 %v1839_v49, %v1821_v41  ;;  %v1803_v40 = vpop.f32.mrf.mxu0 }
 0x17b   :  { %v2620_v60 = vrot.slane %v2619_v9, 4  ;;  %v1822_v61 = vpop.f32.mrf.mxu1  ;;  %v2603_v63 = vrot.slane %v2602_v36, 1 }
 0x17c   :  { %v1924_v34 = vrot.slane %v1840_v62, 2  ;;  %v1823_v55 = vadd.f32 %v1822_v61, %v1803_v40 }
 0x17d   :  { %v2621_v0 = vmax.f32 %v2619_v9, %v2620_v60  ;;  %v2604_v58 = vmax.f32 %v2602_v36, %v2603_v63 }
 0x17e   :  { %v1925_v1 = vsel %vm632_vm0, %v1917_v11, %v1924_v34 }
 0x17f   :  { %v2622_v48 = vrot.slane %v2621_v0, 2  ;;  %v4839_v2 = vadd.f32 %v1925_v1, %v1279_v35  ;;  %v1855_v52 = vpop.f32.mrf.mxu2  ;;  %v2648_v22 = vadd.f32 %v2642_v43, %v2604_v58 }
 0x181   :  { %v2623_v26 = vmax.f32 %v2621_v0, %v2622_v48  ;;  %v1841_v6 = vpop.f32.mrf.mxu3  ;;  %v2654_v10 = vpack.c.bf16 %v2648_v22, %v2648_v22 }
 0x182   :  { %v4842_v57 = vadd.f32 %v1841_v6, %v1823_v55  ;;  %v1872_v12 = vpop.f32.mrf.mxu0  ;;  %v4269_v55 = vld [vmem:[#allocation12 + $0x70] sm:$0xff] }
 0x183   :  { %v2624_v3 = vrot.slane %v2623_v26, 1  ;;  %v1873_v15 = vadd.f32 %v1872_v12, %v1853_v51  ;;  %v1891_v16 = vpop.f32.mrf.mxu1  ;;  %v2718_v54 = vunpack.c.l.b16 %v2654_v10 }
 0x184   :  { %v1930_v17 = vrot.slane %v4842_v57, 2 }
 0x185   :  { %v2625_v21 = vmax.f32 %v2623_v26, %v2624_v3  ;;  %v1892_v19 = vadd.f32 %v1891_v16, %v1873_v15  ;;  %v4268_v26 = vld [vmem:[#allocation12 + $0x68] sm:$0xff]  ;;  %v4267_v15 = vld [vmem:[#allocation12 + $0x60] sm:$0xff] }
 0x186   :  { %v1931_v24 = vsel %vm632_vm0, %v1924_v34, %v1930_v17  ;;  %v4270_v34 = vld [vmem:[#allocation12 + $0x78] sm:$0xff] }
 0x187   :  { %v2651_v20 = vadd.f32 %v2642_v43, %v2625_v21  ;;  %v4849_v5 = vadd.f32 %v1931_v24, %v4787_v4  ;;  %v1858_v25 = vpop.f32.mrf.mxu2  ;;  %v1919_v56 = vrot.slane %v1892_v19, 2  ;;  %2894 = vmatpush.bf16.msrb.mxu0 %v4270_v34  ;;  %v4266_v19 = vld [vmem:[#allocation12 + $0x58] sm:$0xff] }
 0x189   :  { %v2657_v7 = vpack.c.bf16 %v2651_v20, %v2651_v20  ;;  %v2202_v28 = vpop.f32.mrf.mxu3 }
 0x18a   :  { %v1874_v18 = vpop.f32.mrf.mxu0 }
 0x18b   :  { %v2721_v42 = vunpack.c.l.b16 %v2657_v7  ;;  %v1875_v29 = vadd.f32 %v1874_v18, %v1855_v52  ;;  %v1893_v30 = vpop.f32.mrf.mxu1  ;;  %2895 = vmatpush.bf16.msrb.mxu0 %v4269_v55  ;;  %v4265_v18 = vld [vmem:[#allocation12 + $0x50] sm:$0xff] }
 0x18d   :  { %v1894_v31 = vadd.f32 %v1893_v30, %v1875_v29  ;;  %v2724_v59 = vrot.slane %v2721_v42, 7 }
 0x18f   :  { %v1920_v11 = vrot.slane %v1894_v31, 2  ;;  %v1860_v33 = vpop.f32.mrf.mxu2  ;;  %v2726_v13 = vsel %vm2725_vm3, %v2724_v59, %v2718_v54  ;;  %2896 = vmatpush.bf16.msrb.mxu0 %v4268_v26  ;;  %v4264_v54 = vld [vmem:[#allocation12 + $0x48] sm:$0xff]  ;;  %v2581_v59 = vld [vmem:[#allocation11 + $0x8] sm:$0xff] }
 0x190   :  { %v2731_v37 = vpack.c.b16 %v2726_v13, %v2726_v13  ;;  %v4278_v26 = vld [vmem:[#allocation12 + $0xb8] sm:$0xff] }
 0x191   :  { %v1921_v4 = vsel %vm632_vm0, %v1919_v56, %v1920_v11  ;;  %v2204_v38 = vpop.f32.mrf.mxu3  ;;  %2907 = vmatpush.bf16.msrb.mxu1 %v4278_v26 }
 0x192   :  { %v4854_v39 = vadd.f32 %v1921_v4, %v4799_v23  ;;  %2889 = vmatmul.bf16.vlgmr.msrb.gmra.mxu2 %v2731_v37  ;;  %v1877_v41 = vpop.f32.mrf.mxu0 }
 0x193   :  { %v1878_v44 = vadd.f32 %v1877_v41, %v1858_v25  ;;  %v1896_v46 = vpop.f32.mrf.mxu1  ;;  %2897 = vmatpush.bf16.msrb.mxu0 %v4267_v15 }
 0x195   :  { %v1897_v47 = vadd.f32 %v1896_v46, %v1878_v44  ;;  %v4263_v46 = vld [vmem:[#allocation12 + $0x40] sm:$0xff] }
 0x197   :  { %v1926_v51 = vrot.slane %v1897_v47, 2  ;;  %v2221_v53 = vpop.f32.mrf.mxu2  ;;  %2898 = vmatpush.bf16.msrb.mxu0 %v4266_v19  ;;  %v1947_v47 = vsel %vm632_vm0, %v1930_v17, 0.0 }
 0x198   :  { %v2222_v16 = vadd.f32 %v2221_v53, %v2202_v28 }
 0x199   :  { %v1927_v36 = vsel %vm632_vm0, %v1920_v11, %v1926_v51  ;;  %v2207_v9 = vpop.f32.mrf.mxu3  ;;  %v2584_v11 = vld [vmem:[#allocation11 + $0x20] sm:$0xff] }
 0x19a   :  { %v4858_v49 = vadd.f32 %v1927_v36, %v4807_v27  ;;  %v1879_v62 = vpop.f32.mrf.mxu0 }
 0x19b   :  { %v1880_v40 = vadd.f32 %v1879_v62, %v1860_v33  ;;  %v1898_v60 = vpop.f32.mrf.mxu1  ;;  %2899 = vmatpush.bf16.msrb.mxu0 %v4265_v18 }
 0x19d   :  { %v1899_v61 = vadd.f32 %v1898_v60, %v1880_v40 }
 0x19f   :  { %v1932_v23 = vrot.slane %v1899_v61, 2  ;;  %v2223_v35 = vpop.f32.mrf.mxu2  ;;  %2900 = vmatpush.bf16.msrb.mxu0 %v4264_v54 }
 0x1a0   :  { %v2224_v6 = vadd.f32 %v2223_v35, %v2204_v38 }
 0x1a1   :  { %v1933_v63 = vsel %vm632_vm0, %v1926_v51, %v1932_v23  ;;  %v1948_v0 = vsel %vm632_vm0, %v1932_v23, 0.0  ;;  %v2209_v1 = vpop.f32.mrf.mxu3 }
 0x1a2   :  { %v4863_v48 = vadd.f32 %v1933_v63, %v4809_v32  ;;  %v4866_v52 = vadd.f32 %v1948_v0, %v4815_v8  ;;  %v2240_v27 = vpop.f32.mrf.mxu0 }
 0x1a3   :  { %v4868_v58 = vpop.f32.mrf.mxu1  ;;  %v2241_v8 = vadd.f32 %v2240_v27, %v2222_v16  ;;  %2901 = vmatpush.bf16.msrb.mxu0 %v4263_v46 }
 0x1a5   :  { %v2316_v20 = vrot.slane %v2241_v8, 3 }
 0x1a7   :  { %v2226_v43 = vpop.f32.mrf.mxu2 }
 0x1a8   :  { %v2227_v25 = vadd.f32 %v2226_v43, %v2207_v9 }
 0x1a9   :  { %v4870_v12 = vpop.f32.mrf.mxu3 }
 0x1aa   :  { %v2242_v3 = vpop.f32.mrf.mxu0  ;;  %v2279_v18 = vadd.f32 %v4870_v12, %v4868_v58  ;;  %v4274_v58 = vld [vmem:[#allocation12 + $0x98] sm:$0xff] }
 0x1ab   :  { %v2243_v21 = vadd.f32 %v2242_v3, %v2224_v6  ;;  %v4872_v32 = vpop.f32.mrf.mxu1  ;;  %v4277_v3 = vld [vmem:[#allocation12 + $0xb0] sm:$0xff] }
 0x1ac   :  { %2908 = vmatpush.bf16.msrb.mxu1 %v4277_v3  ;;  %v2582_v3 = vld [vmem:[#allocation11 + $0x10] sm:$0xff] }
 0x1ad   :  { %v2317_v22 = vrot.slane %v2243_v21, 3 }
 0x1af   :  { %v2228_v24 = vpop.f32.mrf.mxu2  ;;  %v2318_v42 = vsel %vm2315_vm4, %v2316_v20, %v2317_v22 }
 0x1b0   :  { %v2568_v31 = vadd.f32 %v2318_v42, %v4829_v50  ;;  %v2229_v13 = vadd.f32 %v2228_v24, %v2209_v1  ;;  %v4276_v24 = vld [vmem:[#allocation12 + $0xa8] sm:$0xff] }
 0x1b1   :  { %v2280_v7 = vpop.f32.mrf.mxu3  ;;  %2909 = vmatpush.bf16.msrb.mxu1 %v4276_v24 }
 0x1b2   :  { %v2245_v10 = vpop.f32.mrf.mxu0  ;;  %v2587_v38 = vadd.f32 %v2581_v59, %v2568_v31  ;;  %v2281_v20 = vadd.f32 %v2280_v7, %v4872_v32 }
 0x1b3   :  { %v2246_v29 = vadd.f32 %v2245_v10, %v2227_v25  ;;  %v2264_v30 = vpop.f32.mrf.mxu1 }
 0x1b5   :  { %v2322_v28 = vrot.slane %v2246_v29, 3 }
 0x1b7   :  { %v2323_v56 = vsel %vm2315_vm4, %v2317_v22, %v2322_v28  ;;  %v2297_v37 = vpop.f32.mrf.mxu2  ;;  %v2643_v22 = vperm.slane %v4836_v45, 1 }
 0x1b8   :  { %v2569_v33 = vadd.f32 %v2323_v56, %v4839_v2  ;;  %v1959_v2 = vadd.f32 %v1947_v47, %v4794_v14  ;;  %v4275_v56 = vld [vmem:[#allocation12 + $0xa0] sm:$0xff] }
 0x1b9   :  { %v2283_v4 = vpop.f32.mrf.mxu3  ;;  %2910 = vmatpush.bf16.msrb.mxu1 %v4275_v56 }
 0x1ba   :  { %v2247_v41 = vpop.f32.mrf.mxu0  ;;  %v2590_v44 = vadd.f32 %v2584_v11, %v2569_v33  ;;  %v2284_v42 = vadd.f32 %v2283_v4, %v2264_v30 }
 0x1bb   :  { %v2248_v50 = vadd.f32 %v2247_v41, %v2229_v13  ;;  %v4881_v51 = vpop.f32.mrf.mxu1  ;;  %v2298_v13 = vadd.f32 %v2297_v37, %v2279_v18 }
 0x1bc   :  { %v2605_v53 = vmax.f32 %v2587_v38, %v2590_v44 }
 0x1bd   :  { %v2326_v36 = vrot.slane %v2248_v50, 3  ;;  %v2319_v30 = vrot.slane %v2298_v13, 3  ;;  %2911 = vmatpush.bf16.msrb.mxu1 %v4274_v58 }
 0x1be   :  { %v2606_v9 = vrot.slane %v2605_v53, 4 }
 0x1bf   :  { %v2327_v62 = vsel %vm2315_vm4, %v2322_v28, %v2326_v36  ;;  %v2338_v40 = vsel %vm2315_vm4, %v2326_v36, 0.0  ;;  %v2299_v0 = vpop.f32.mrf.mxu2 }
 0x1c0   :  { %v2570_v60 = vadd.f32 %v2327_v62, %v4849_v5  ;;  %v2571_v61 = vadd.f32 %v2338_v40, %v1959_v2  ;;  %v2607_v34 = vmax.f32 %v2605_v53, %v2606_v9  ;;  %v2300_v29 = vadd.f32 %v2299_v0, %v2281_v20 }
 0x1c1   :  { %v2285_v57 = vpop.f32.mrf.mxu3 }
 0x1c2   :  { %v2593_v23 = vadd.f32 %v2581_v59, %v2570_v60  ;;  %v2596_v17 = vadd.f32 %v2584_v11, %v2571_v61  ;;  %v2608_v35 = vrot.slane %v2607_v34, 2  ;;  %v2503_v63 = vpop.f32.mrf.mxu0  ;;  %v2320_v46 = vrot.slane %v2300_v29, 3  ;;  %v4273_v61 = vld [vmem:[#allocation12 + $0x90] sm:$0xff] }
 0x1c3   :  { %v2522_v1 = vpop.f32.mrf.mxu1  ;;  %v2286_v2 = vadd.f32 %v2285_v57, %v4881_v51  ;;  %2912 = vmatpush.bf16.msrb.mxu1 %v4273_v61  ;;  %v2930_v61 = vld [vmem:[#allocation2] sm:$0x1] }
 0x1c4   :  { %v2609_v27 = vmax.f32 %v2607_v34, %v2608_v35  ;;  %v2626_v55 = vmax.f32 %v2593_v23, %v2596_v17  ;;  %v2523_v31 = vadd.f32 %v2522_v1, %v2503_v63  ;;  %v2321_v37 = vsel %vm2315_vm4, %v2319_v30, %v2320_v46 }
 0x1c5   :  { %v2572_v51 = vadd.f32 %v2321_v37, %v4854_v39 }
 0x1c6   :  { %v2627_v14 = vrot.slane %v2626_v55, 4  ;;  %v2610_v43 = vrot.slane %v2609_v27, 1 }
 0x1c7   :  { %v2302_v25 = vpop.f32.mrf.mxu2 }
 0x1c8   :  { %v2628_v6 = vmax.f32 %v2626_v55, %v2627_v14  ;;  %v2611_v8 = vmax.f32 %v2609_v27, %v2610_v43  ;;  %v2303_v11 = vadd.f32 %v2302_v25, %v2284_v42  ;;  %v4272_v27 = vld [vmem:[#allocation12 + $0x88] sm:$0xff] }
 0x1c9   :  { %v2541_v15 = vpop.f32.mrf.mxu3  ;;  %2913 = vmatpush.bf16.msrb.mxu1 %v4272_v27 }
 0x1ca   :  { %v2629_v16 = vrot.slane %v2628_v6, 2  ;;  %v2505_v5 = vpop.f32.mrf.mxu0  ;;  %v2649_v59 = vadd.f32 %v2643_v22, %v2611_v8  ;;  %v2542_v47 = vadd.f32 %v2541_v15, %v2523_v31  ;;  %v2324_v12 = vrot.slane %v2303_v11, 3 }
 0x1cb   :  { %v2524_v21 = vpop.f32.mrf.mxu1 }
 0x1cc   :  { %v2630_v19 = vmax.f32 %v2628_v6, %v2629_v16  ;;  %v2525_v54 = vadd.f32 %v2524_v21, %v2505_v5  ;;  %v2655_v50 = vpack.c.bf16 %v2649_v59, %v2649_v59  ;;  %v2556_v62 = vrot.slane %v2542_v47, 4  ;;  %v2585_v16 = vld [vmem:[#allocation11 + $0x28] sm:$0xff]  ;;  %v4271_v5 = vld [vmem:[#allocation12 + $0x80] sm:$0xff] }
 0x1cd   :  { %v2325_v34 = vsel %vm2315_vm4, %v2320_v46, %v2324_v12  ;;  %2914 = vmatpush.bf16.msrb.mxu1 %v4271_v5 }
 0x1ce   :  { %v2631_v10 = vrot.slane %v2630_v19, 1  ;;  %v2719_v40 = vunpack.c.l.b16 %v2655_v50  ;;  %v2573_v55 = vadd.f32 %v2325_v34, %v4858_v49  ;;  %v4490_v34 = vmov 0  }
 0x1cf   :  { %v2304_v9 = vpop.f32.mrf.mxu2  ;;  %4295 = vset.pattern.permute.xlu0 %v4490_v34 }
 0x1d0   :  { %v2632_v28 = vmax.f32 %v2630_v19, %v2631_v10  ;;  %v2305_v17 = vadd.f32 %v2304_v9, %v2286_v2  ;;  %2933 = vperm.xlu0 %4295, %v2930_v61  }
 0x1d1   :  { %v2543_v33 = vpop.f32.mrf.mxu3 }
 0x1d2   :  { %v2652_v38 = vadd.f32 %v2643_v22, %v2632_v28  ;;  %v2544_v41 = vadd.f32 %v2543_v33, %v2525_v54  ;;  %v2508_v32 = vpop.f32.mrf.mxu0  ;;  %v2328_v6 = vrot.slane %v2305_v17, 3  ;;  %v4296_v17 = vld [vmem:[%s4923_s7] ss:$0 sm:$0xff]  ;;  %s4491_s7 = smov [#allocation14]  }
 0x1d3   :  { %v2527_v7 = vpop.f32.mrf.mxu1  ;;  %s2950_s29 = sshll.u32 %s4491_s7, 4  ;;  %s2951_s29 = int_to_ptr.vmem [resolvable:$true] %s2950_s29 }
 0x1d4   :  { %v2658_v44 = vpack.c.bf16 %v2652_v38, %v2652_v38  ;;  %v2557_v53 = vrot.slane %v2544_v41, 4  ;;  %v2528_v36 = vadd.f32 %v2527_v7, %v2508_v32  ;;  %v2329_v24 = vsel %vm2315_vm4, %v2324_v12, %v2328_v6 }
 0x1d5   :  { %v2339_v49 = vsel %vm2315_vm4, %v2328_v6, 0.0  ;;  %v2574_v18 = vadd.f32 %v2329_v24, %v4863_v48 }
 0x1d6   :  { %v2722_v4 = vunpack.c.l.b16 %v2658_v44  ;;  %v2558_v35 = vsel %vm2555_vm5, %v2556_v62, %v2557_v53  ;;  %v2575_v42 = vadd.f32 %v2339_v49, %v4866_v52  ;;  %v2644_v52 = vperm.slane %v4836_v45, 2 }
 0x1d7   :  { %v2576_v26 = vadd.f32 %v2572_v51, %v2558_v35 }
 0x1d8   :  { %v2727_v60 = vrot.slane %v2722_v4, 7 }
 0x1d9   :  { %v2546_v23 = vpop.f32.mrf.mxu3  ;;  %v2588_v19 = vadd.f32 %v2582_v3, %v2576_v26 }
 0x1da   :  { %v2547_v63 = vadd.f32 %v2546_v23, %v2528_v36  ;;  %v2728_v0 = vsel %vm2725_vm3, %v2727_v60, %v2719_v40  ;;  %v2510_v14 = vpop.f32.mrf.mxu0 }
 0x1db   :  { %v2732_v57 = vpack.c.b16 %v2728_v0, %v2728_v0  ;;  %v2529_v43 = vpop.f32.mrf.mxu1 }
 0x1dc   :  { %v2559_v1 = vrot.slane %v2547_v63, 4  ;;  %v2530_v8 = vadd.f32 %v2529_v43, %v2510_v14  ;;  %v2939_v43 = vlaneseq }
 0x1dd   :  { %2902 = vmatmul.bf16.vlgmr.msrb.gmra.mxu0 %v2732_v57  ;;  %v4297_v57 = vld [vmem:[%s4924_s8] ss:$0 sm:$0xff] }
 0x1de   :  { %v2560_v15 = vsel %vm2555_vm5, %v2557_v53, %v2559_v1 }
 0x1df   :  { %v2577_v21 = vadd.f32 %v2573_v55, %v2560_v15 }
 0x1e1   :  { %v2548_v39 = vpop.f32.mrf.mxu3  ;;  %v2591_v22 = vadd.f32 %v2585_v16, %v2577_v21 }
 0x1e2   :  { %v2549_v20 = vadd.f32 %v2548_v39, %v2530_v8 }
 0x1e3   :  { %v2612_v25 = vmax.f32 %v2588_v19, %v2591_v22 }
 0x1e4   :  { %v2561_v10 = vrot.slane %v2549_v20, 4 }
 0x1e5   :  { %v2613_v29 = vrot.slane %v2612_v25, 4 }
 0x1e6   :  { %v2562_v28 = vsel %vm2555_vm5, %v2559_v1, %v2561_v10  ;;  %v2567_v31 = vsel %vm2555_vm5, %v2561_v10, 0.0 }
 0x1e7   :  { %v2578_v54 = vadd.f32 %v2574_v18, %v2562_v28  ;;  %v2579_v59 = vadd.f32 %v2575_v42, %v2567_v31  ;;  %v2614_v56 = vmax.f32 %v2612_v25, %v2613_v29 }
 0x1e9   :  { %v2594_v11 = vadd.f32 %v2582_v3, %v2578_v54  ;;  %v2597_v33 = vadd.f32 %v2585_v16, %v2579_v59  ;;  %v2615_v13 = vrot.slane %v2614_v56, 2  ;;  %v2940_v3 = vand.u32 127, %v2939_v43 }
 0x1eb   :  { %v2616_v38 = vmax.f32 %v2614_v56, %v2615_v13  ;;  %v2633_v41 = vmax.f32 %v2594_v11, %v2597_v33 }
 0x1ed   :  { %v2634_v32 = vrot.slane %v2633_v41, 4  ;;  %v2617_v7 = vrot.slane %v2616_v38, 1 }
 0x1ef   :  { %v2635_v44 = vmax.f32 %v2633_v41, %v2634_v32  ;;  %v2618_v48 = vmax.f32 %v2616_v38, %v2617_v7 }
 0x1f1   :  { %v2636_v46 = vrot.slane %v2635_v44, 2  ;;  %v2650_v12 = vadd.f32 %v2644_v52, %v2618_v48 }
 0x1f3   :  { %v2637_v47 = vmax.f32 %v2635_v44, %v2636_v46  ;;  %v2656_v53 = vpack.c.bf16 %v2650_v12, %v2650_v12 }
 0x1f5   :  { %v2638_v50 = vrot.slane %v2637_v47, 1  ;;  %v2720_v2 = vunpack.c.l.b16 %v2656_v53 }
 0x1f7   :  { %v2639_v58 = vmax.f32 %v2637_v47, %v2638_v50 }
 0x1f9   :  { %v2653_v30 = vadd.f32 %v2644_v52, %v2639_v58 }
 0x1fb   :  { %v2659_v4 = vpack.c.bf16 %v2653_v30, %v2653_v30 }
 0x1fd   :  { %v2723_v36 = vunpack.c.l.b16 %v2659_v4 }
 0x1ff   :  { %v2729_v9 = vrot.slane %v2723_v36, 7 }
 0x201   :  { %v2730_v37 = vsel %vm2725_vm3, %v2729_v9, %v2720_v2 }
 0x202   :  { %v2733_v62 = vpack.c.b16 %v2730_v37, %v2730_v37 }
 0x204   :  { %2915 = vmatmul.bf16.vlgmr.msrb.gmra.mxu1 %v2733_v62 }
 0x215   :  { %v2890_v40 = vpop.f32.mrf.mxu2 }
 0x216   :  { %v2891_v35 = vadd.f32 %v4296_v17, %v2890_v40 }
 0x21d   :  { %v2892_v60 = vpop.f32.mrf.mxu2 }
 0x242   :  { %v2934_v14 = vpop.permute.xlu0 %2933 }
 0x243   :  { %v2936_v6 = vperm.slane %v2934_v14, 0 }
 0x25a   :  { %v2903_v45 = vpop.f32.mrf.mxu0 }
 0x25b   :  { %v2904_v63 = vadd.f32 %v2903_v45, %v2891_v35 }
 0x262   :  { %v2905_v23 = vpop.f32.mrf.mxu0 }
 0x281   :  { %v2916_v0 = vpop.f32.mrf.mxu1 }
 0x282   :  { %v2917_v51 = vadd.f32 %v2916_v0, %v2904_v63 }
 0x284   :  { %v2920_v1 = vmax.f32 %v2917_v51, 0.0 }
 0x286   :  { %v2925_v27 = vmul.f32 %v4297_v57, %v2920_v1 }
 0x288   :  { %v2927_v55 = vsel %vm2926_vm6, %v2925_v27, 0.0 }
 0x289   :  { %v2918_v26 = vpop.f32.mrf.mxu1  ;;  %2928 = vadd.xlane.f32.xlu0 %v2927_v55 }
 0x2fc   :  { %v2929_v15 = vpop.xlane.xlu0 %2928 }
 0x2fd   :  { %v2937_v16 = vadd.f32 %v2936_v6, %v2929_v15 }
 0x2ff   :  { %v2941_v5 = vperm.slane %v2937_v16, %v2940_v3 }
 0x301   :  { %2944 = vst.msk [vmem:[#allocation14] sm:$0x1] %vm2943_vm7, %v2941_v5 }
 0x302   :  { %2955 = dma.vmem_to_hbm [thread:$0]  %s2951_s29, 16, %s2953_s11, [#allocation5]  }
 0x303   :  { %4474 = dma.done.wait [#allocation5], 16  }
 0x304   :  { %4475 = vsyncadd [#allocation5], 4294967280 }
 0x305   :  { %2960 = vsyncpa [#allocation4], 1 }
 0x306   :  { %2961 = vsyncpa [#allocation7], 1 }
 0x307   :  { %2962 = vsyncpa [#allocation10], 1 }
 0x308   :  { %2963 = vsyncpa [#allocation13], 1 }
 0x309   :  { %2964 = vsyncpa [#allocation5], 1 }

</bundles_post_ra>
